<compile_context>
chip_gen: v5e
topology: v5e:2x2
jax: 0.10.0
libtpu: 0.0.40
codegen_flags: <defaults>
</compile_context>

<pallas_src>
import numpy as np
import jax
import jax.numpy as jnp
from jax.experimental import pallas as pl
from jax.experimental.pallas import tpu as pltpu

# ---------------- model config (small, consistent with the module) ----------
DAY = 5                   # sequence length ("day")
S_PAD = 8                 # per-batch row padding (sublane tile)
P = 32                    # n // day
N = DAY * P               # n = 160
D = 128                   # dim[0]
NUM_BLOCKS = 2            # len(dim) -> two transformer blocks (all at dim[0])
NUM_HEADS = 2
HEAD_DIM = D // NUM_HEADS
MLP_HIDDEN = 4 * D        # timm Block default mlp_ratio=4
M = 16                    # m  -> head output dim
OUT = M
LN_EPS = 1e-5
B = 2
NEG = -1e30

_GELU_C = float(np.sqrt(2.0 / np.pi))


# ---------------- fixed 2d sin-cos positional embedding (numpy glue) --------
def _sincos_1d(embed_dim, pos):
    omega = np.arange(embed_dim // 2, dtype=np.float64) / (embed_dim / 2.0)
    omega = 1.0 / 10000 ** omega
    out = np.einsum("m,d->md", pos.reshape(-1), omega)
    return np.concatenate([np.sin(out), np.cos(out)], axis=1)


def get_2d_sincos_pos_embed(embed_dim, grid_size):
    gh, gw = grid_size
    grid = np.meshgrid(np.arange(gw, dtype=np.float64),
                       np.arange(gh, dtype=np.float64))
    grid = np.stack(grid, axis=0).reshape([2, 1, gh, gw])
    emb_h = _sincos_1d(embed_dim // 2, grid[0])
    emb_w = _sincos_1d(embed_dim // 2, grid[1])
    return np.concatenate([emb_h, emb_w], axis=1)  # [gh*gw, embed_dim]


# ---------------- small math helpers (shared by kernel and reference) -------
def _layer_norm(v, g, b):
    mu = jnp.mean(v, axis=-1, keepdims=True)
    d = v - mu
    var = jnp.mean(d * d, axis=-1, keepdims=True)
    return d * jax.lax.rsqrt(var + LN_EPS) * g + b


def _gelu(x):
    # TODO(synk): torch.nn.GELU() default is the exact erf form; erf has no
    # clean Mosaic lowering, so the tanh approximation is used (|diff| ~1e-3).
    return 0.5 * x * (1.0 + jnp.tanh(_GELU_C * (x + 0.044715 * x * x * x)))


# ---------------- Pallas kernel ---------------------------------------------
def encoder_kernel(x_ref, pos_ref, mask_ref, poscol_ref, selb_ref,
                   pw_ref, pb_ref,
                   ln1g_ref, ln1b_ref, qkvw_ref, qkvb_ref,
                   projw_ref, projb_ref, ln2g_ref, ln2b_ref,
                   fc1w_ref, fc1b_ref, fc2w_ref, fc2b_ref,
                   hw_ref, hb_ref, out_ref):
    scale = HEAD_DIM ** -0.5
    bf16 = jnp.bfloat16

    # ---- patch embedding + positional embedding on the fused [R, P] slab ----
    x16 = x_ref[...].astype(bf16)                                   # [R, P]
    h = jnp.dot(x16, pw_ref[...], preferred_element_type=jnp.float32)
    h = h + pb_ref[...] + pos_ref[...]                              # [R, D] f32

    mask = mask_ref[...]                                            # [R, R]

    for l in range(NUM_BLOCKS):                                     # static (=2)
        # ---------- multi-head self attention ----------
        y = _layer_norm(h, ln1g_ref[l], ln1b_ref[l]).astype(bf16)
        qkv = jnp.dot(y, qkvw_ref[l],
                      preferred_element_type=jnp.float32) + qkvb_ref[l]  # [R,3D]

        heads = []
        for hh in range(NUM_HEADS):                                 # static (=2)
            lo = hh * HEAD_DIM
            q = qkv[:, lo:lo + HEAD_DIM].astype(bf16)
            k = qkv[:, D + lo:D + lo + HEAD_DIM].astype(bf16)
            v = qkv[:, 2 * D + lo:2 * D + lo + HEAD_DIM].astype(bf16)
            att = jax.lax.dot_general(
                q, k, (((1,), (1,)), ((), ())),
                preferred_element_type=jnp.float32) * scale + mask  # [R, R]
            mx = jnp.max(att, axis=-1, keepdims=True)
            e = jnp.exp(att - mx)
            p = e * pl.reciprocal(jnp.sum(e, axis=-1, keepdims=True),
                                  approx=True)
            heads.append(jnp.dot(p.astype(bf16), v,
                                 preferred_element_type=jnp.float32))
        # concat heads -> one full-width (128-lane) projection matmul
        o = jnp.concatenate(heads, axis=-1).astype(bf16)            # [R, D]
        attn = jnp.dot(o, projw_ref[l], preferred_element_type=jnp.float32)
        h = h + attn + projb_ref[l]

        # ---------- MLP ----------
        y = _layer_norm(h, ln2g_ref[l], ln2b_ref[l]).astype(bf16)
        y = jnp.dot(y, fc1w_ref[l],
                    preferred_element_type=jnp.float32) + fc1b_ref[l]
        y = _gelu(y).astype(bf16)
        y = jnp.dot(y, fc2w_ref[l],
                    preferred_element_type=jnp.float32) + fc2b_ref[l]
        h = h + y

    # ---------- head: Linear(day*D -> OUT), batch-fused ----------
    # acc[r] = h[r] @ Wh[pos(r)]  (zero for padded rows), then reduce rows of
    # each batch block with one small matmul against a 0/1 selector.
    h16 = h.astype(bf16)
    acc = jnp.zeros((h.shape[0], OUT), jnp.float32)
    for s in range(DAY):                                            # static (=5)
        acc = acc + poscol_ref[s] * jnp.dot(
            h16, hw_ref[s], preferred_element_type=jnp.float32)
    out = jnp.dot(selb_ref[...], acc, preferred_element_type=jnp.float32)
    out_ref[...] = (out + hb_ref[...]).astype(out_ref.dtype)


# ---------------- wrapper -----------------------------------------------------
def _const_index_map(ndim):
    def im(i):
        return (0,) * ndim
    return im


def _full_spec(a):
    return pl.BlockSpec(a.shape, _const_index_map(a.ndim))


def _build_constants(tb):
    r = tb * S_PAD
    pos = get_2d_sincos_pos_embed(D, (DAY, 1)).astype(np.float32)   # [DAY, D]
    pos_pad = np.zeros((S_PAD, D), np.float32)
    pos_pad[:DAY] = pos
    pos_block = np.tile(pos_pad, (tb, 1))                           # [R, D]

    rows = np.arange(r)
    blk = rows // S_PAD
    s_of = rows % S_PAD
    key_valid = s_of < DAY
    # additive mask: 0 within the same batch block & valid key, else -1e30
    mask = np.where((blk[:, None] == blk[None, :]) & key_valid[None, :],
                    0.0, NEG).astype(np.float32)                    # [R, R]

    # poscol[s, r, 0] = 1 if row r is sequence position s (padded rows -> 0)
    poscol = (s_of[None, :] == np.arange(DAY)[:, None]).astype(np.float32)
    poscol = poscol[:, :, None]                                     # [DAY, R, 1]

    # selb[b, r] = 1 if row r belongs to (local) batch b
    selb = (blk[None, :] == np.arange(tb)[:, None]).astype(np.float32)  # [TB, R]
    return pos_block, mask, poscol, selb


@jax.jit
def encoder_forward(x, params):
    bsz = x.shape[0]
    tb = bsz if bsz <= 8 else 8          # batch tile per grid step
    assert bsz % tb == 0, "batch must be a multiple of the batch tile"
    grid = (bsz // tb,)
    r = tb * S_PAD

    # [B, n] -> [B, day, P] -> pad day 5->8 -> fuse to [B*8, P]
    xr = x.reshape(bsz, DAY, P)
    xp = jnp.pad(xr, ((0, 0), (0, S_PAD - DAY), (0, 0))).reshape(bsz * S_PAD, P)

    pos_block, mask, poscol, selb = _build_constants(tb)
    consts = (jnp.asarray(pos_block), jnp.asarray(mask),
              jnp.asarray(poscol), jnp.asarray(selb))

    weights = (params["patch_w"], params["patch_b"],
               params["ln1_g"], params["ln1_b"],
               params["qkv_w"], params["qkv_b"],
               params["proj_w"], params["proj_b"],
               params["ln2_g"], params["ln2_b"],
               params["fc1_w"], params["fc1_b"],
               params["fc2_w"], params["fc2_b"],
               params["head_w"], params["head_b"])

    in_specs = ([pl.BlockSpec((r, P), lambda i: (i, 0))]     # x: tiled on batch
                + [_full_spec(a) for a in consts]            # constants: resident
                + [_full_spec(a) for a in weights])          # weights: resident

    return pl.pallas_call(
        encoder_kernel,
        out_shape=jax.ShapeDtypeStruct((bsz, OUT), jnp.float32),
        grid=grid,
        in_specs=in_specs,
        out_specs=pl.BlockSpec((tb, OUT), lambda i: (i, 0)),
        compiler_params=pltpu.CompilerParams(
            dimension_semantics=("parallel",)),
    )(xp, *consts, *weights)


# ---------------- deterministic parameter init (mirrors _init_weights) -------
def _xavier_uniform(key, shape):
    fan_in, fan_out = shape[-2], shape[-1]
    limit = float(np.sqrt(6.0 / (fan_in + fan_out)))
    return jax.random.uniform(key, shape, jnp.float32, -limit, limit)


def init_params(key):
    ks = jax.random.split(key, 6)
    L = NUM_BLOCKS
    bf = jnp.bfloat16
    return {
        # weights in bf16 (halved DMA / vreg-load traffic); f32 accumulation in kernel
        "patch_w": _xavier_uniform(ks[0], (P, D)).astype(bf),
        "patch_b": jnp.zeros((1, D), jnp.float32),
        "ln1_g": jnp.ones((L, 1, D), jnp.float32),
        "ln1_b": jnp.zeros((L, 1, D), jnp.float32),
        "qkv_w": _xavier_uniform(ks[1], (L, D, 3 * D)).astype(bf),
        "qkv_b": jnp.zeros((L, 1, 3 * D), jnp.float32),
        "proj_w": _xavier_uniform(ks[2], (L, D, D)).astype(bf),
        "proj_b": jnp.zeros((L, 1, D), jnp.float32),
        "ln2_g": jnp.ones((L, 1, D), jnp.float32),
        "ln2_b": jnp.zeros((L, 1, D), jnp.float32),
        "fc1_w": _xavier_uniform(ks[3], (L, D, MLP_HIDDEN)).astype(bf),
        "fc1_b": jnp.zeros((L, 1, MLP_HIDDEN), jnp.float32),
        "fc2_w": _xavier_uniform(ks[4], (L, MLP_HIDDEN, D)).astype(bf),
        "fc2_b": jnp.zeros((L, 1, D), jnp.float32),
        # head weight stored as [DAY, D, OUT] (row index s*D+d of the torch Linear)
        "head_w": _xavier_uniform(ks[5], (DAY * D, OUT)).astype(bf).reshape(DAY, D, OUT),
        "head_b": jnp.zeros((1, OUT), jnp.float32),
    }


# ---------------- pure-JAX reference (for a sanity check) --------------------
def encoder_reference(x, params):
    hp = jax.lax.Precision.HIGHEST
    f32 = lambda a: a.astype(jnp.float32)
    bsz = x.shape[0]
    xr = x.reshape(bsz, DAY, P)
    pos = jnp.asarray(get_2d_sincos_pos_embed(D, (DAY, 1)), jnp.float32)
    h = jnp.einsum("bsp,pd->bsd", xr, f32(params["patch_w"]), precision=hp)
    h = h + params["patch_b"] + pos
    for l in range(NUM_BLOCKS):
        y = _layer_norm(h, params["ln1_g"][l], params["ln1_b"][l])
        qkv = jnp.einsum("bsd,de->bse", y, f32(params["qkv_w"][l]), precision=hp)
        qkv = qkv + params["qkv_b"][l]
        q, k, v = jnp.split(qkv, 3, axis=-1)
        q = q.reshape(bsz, DAY, NUM_HEADS, HEAD_DIM)
        k = k.reshape(bsz, DAY, NUM_HEADS, HEAD_DIM)
        v = v.reshape(bsz, DAY, NUM_HEADS, HEAD_DIM)
        att = jnp.einsum("bqhd,bkhd->bhqk", q, k, precision=hp) * (HEAD_DIM ** -0.5)
        att = jax.nn.softmax(att, axis=-1)
        o = jnp.einsum("bhqk,bkhd->bqhd", att, v, precision=hp).reshape(bsz, DAY, D)
        o = jnp.einsum("bsd,de->bse", o, f32(params["proj_w"][l]), precision=hp)
        h = h + o + params["proj_b"][l]
        y = _layer_norm(h, params["ln2_g"][l], params["ln2_b"][l])
        y = jnp.einsum("bsd,de->bse", y, f32(params["fc1_w"][l]), precision=hp)
        y = _gelu(y + params["fc1_b"][l])
        y = jnp.einsum("bse,ed->bsd", y, f32(params["fc2_w"][l]), precision=hp)
        h = h + y + params["fc2_b"][l]
    hf = h.reshape(bsz, DAY * D)
    hw = f32(params["head_w"]).reshape(DAY * D, OUT)
    return jnp.dot(hf, hw, precision=hp) + params["head_b"]


if __name__ == "__main__":
    key = jax.random.PRNGKey(0)
    pkey, xkey = jax.random.split(key)
    params = init_params(pkey)
    # TODO(synk): the "-4 token" row-reordering and the `recent` concat paths of
    # the original forward are data-dependent gathers; this script assumes the
    # default eval path (no token rows, recent=None) where they are identity.
    x = jax.random.normal(xkey, (B, N), jnp.float32)

    out = encoder_forward(x, params)
    jax.block_until_ready(out)
    assert out.shape == (B, OUT)

    ref = encoder_reference(x, params)
    max_diff = float(jnp.max(jnp.abs(out - ref)))
    # tolerance covers bf16 matmul inputs + approx reciprocal vs. the f32 reference
    assert max_diff < 5e-2, f"mismatch vs JAX reference: {max_diff}"

    print("KERNEL_OK")
</pallas_src>

<mosaic_0001>
module attributes {stable_mosaic.version = 11 : i64} {
  func.func @encoder_kernel(%arg0: i32, %arg1: memref<16x32xf32, #tpu.memory_space<vmem>>, %arg2: memref<16x128xf32, #tpu.memory_space<vmem>>, %arg3: memref<16x16xf32, #tpu.memory_space<vmem>>, %arg4: memref<5x16x1xf32, #tpu.memory_space<vmem>>, %arg5: memref<2x16xf32, #tpu.memory_space<vmem>>, %arg6: memref<32x128xbf16, #tpu.memory_space<vmem>>, %arg7: memref<1x128xf32, #tpu.memory_space<vmem>>, %arg8: memref<2x1x128xf32, #tpu.memory_space<vmem>>, %arg9: memref<2x1x128xf32, #tpu.memory_space<vmem>>, %arg10: memref<2x128x384xbf16, #tpu.memory_space<vmem>>, %arg11: memref<2x1x384xf32, #tpu.memory_space<vmem>>, %arg12: memref<2x128x128xbf16, #tpu.memory_space<vmem>>, %arg13: memref<2x1x128xf32, #tpu.memory_space<vmem>>, %arg14: memref<2x1x128xf32, #tpu.memory_space<vmem>>, %arg15: memref<2x1x128xf32, #tpu.memory_space<vmem>>, %arg16: memref<2x128x512xbf16, #tpu.memory_space<vmem>>, %arg17: memref<2x1x512xf32, #tpu.memory_space<vmem>>, %arg18: memref<2x512x128xbf16, #tpu.memory_space<vmem>>, %arg19: memref<2x1x128xf32, #tpu.memory_space<vmem>>, %arg20: memref<5x128x16xbf16, #tpu.memory_space<vmem>>, %arg21: memref<1x16xf32, #tpu.memory_space<vmem>>, %arg22: memref<2x16xf32, #tpu.memory_space<vmem>>) attributes {dimension_semantics = [#tpu.dimension_semantics<parallel>], iteration_bounds = array<i64: 1>, scalar_prefetch = 0 : i64, scratch_operands = 0 : i64, tpu.core_type = #tpu.core_type<tc>, window_params = [{transform_indices = @transform_0, window_bounds = array<i64: 16, 32>}, {pipeline_mode = #tpu.pipeline_mode<synchronous>, transform_indices = @transform_1, window_bounds = array<i64: 16, 128>}, {pipeline_mode = #tpu.pipeline_mode<synchronous>, transform_indices = @transform_2, window_bounds = array<i64: 16, 16>}, {pipeline_mode = #tpu.pipeline_mode<synchronous>, transform_indices = @transform_3, window_bounds = array<i64: 5, 16, 1>}, {pipeline_mode = #tpu.pipeline_mode<synchronous>, transform_indices = @transform_4, window_bounds = array<i64: 2, 16>}, {pipeline_mode = #tpu.pipeline_mode<synchronous>, transform_indices = @transform_5, window_bounds = array<i64: 32, 128>}, {pipeline_mode = #tpu.pipeline_mode<synchronous>, transform_indices = @transform_6, window_bounds = array<i64: 1, 128>}, {pipeline_mode = #tpu.pipeline_mode<synchronous>, transform_indices = @transform_7, window_bounds = array<i64: 2, 1, 128>}, {pipeline_mode = #tpu.pipeline_mode<synchronous>, transform_indices = @transform_8, window_bounds = array<i64: 2, 1, 128>}, {pipeline_mode = #tpu.pipeline_mode<synchronous>, transform_indices = @transform_9, window_bounds = array<i64: 2, 128, 384>}, {pipeline_mode = #tpu.pipeline_mode<synchronous>, transform_indices = @transform_10, window_bounds = array<i64: 2, 1, 384>}, {pipeline_mode = #tpu.pipeline_mode<synchronous>, transform_indices = @transform_11, window_bounds = array<i64: 2, 128, 128>}, {pipeline_mode = #tpu.pipeline_mode<synchronous>, transform_indices = @transform_12, window_bounds = array<i64: 2, 1, 128>}, {pipeline_mode = #tpu.pipeline_mode<synchronous>, transform_indices = @transform_13, window_bounds = array<i64: 2, 1, 128>}, {pipeline_mode = #tpu.pipeline_mode<synchronous>, transform_indices = @transform_14, window_bounds = array<i64: 2, 1, 128>}, {pipeline_mode = #tpu.pipeline_mode<synchronous>, transform_indices = @transform_15, window_bounds = array<i64: 2, 128, 512>}, {pipeline_mode = #tpu.pipeline_mode<synchronous>, transform_indices = @transform_16, window_bounds = array<i64: 2, 1, 512>}, {pipeline_mode = #tpu.pipeline_mode<synchronous>, transform_indices = @transform_17, window_bounds = array<i64: 2, 512, 128>}, {pipeline_mode = #tpu.pipeline_mode<synchronous>, transform_indices = @transform_18, window_bounds = array<i64: 2, 1, 128>}, {pipeline_mode = #tpu.pipeline_mode<synchronous>, transform_indices = @transform_19, window_bounds = array<i64: 5, 128, 16>}, {pipeline_mode = #tpu.pipeline_mode<synchronous>, transform_indices = @transform_20, window_bounds = array<i64: 1, 16>}, {transform_indices = @transform_21, window_bounds = array<i64: 2, 16>}]} {
    %c0 = arith.constant 0 : index
    %c0_0 = arith.constant 0 : index
    %0 = vector.load %arg1[%c0, %c0_0] : memref<16x32xf32, #tpu.memory_space<vmem>>, vector<16x32xf32>
    %1 = arith.truncf %0 : vector<16x32xf32> to vector<16x32xbf16>
    %c0_1 = arith.constant 0 : index
    %c0_2 = arith.constant 0 : index
    %2 = vector.load %arg6[%c0_1, %c0_2] : memref<32x128xbf16, #tpu.memory_space<vmem>>, vector<32x128xbf16>
    %cst = arith.constant dense<0.000000e+00> : vector<16x128xf32>
    %3 = tpu.matmul %1, %2, %cst {dimension_numbers = #tpu.dot_dimension_numbers<[1], [0], [0], [1], [0, 0, 1, 1], [], []>} : vector<16x32xbf16>, vector<32x128xbf16>, vector<16x128xf32> -> vector<16x128xf32>
    %c0_3 = arith.constant 0 : index
    %c0_4 = arith.constant 0 : index
    %4 = vector.load %arg7[%c0_3, %c0_4] : memref<1x128xf32, #tpu.memory_space<vmem>>, vector<1x128xf32>
    %5 = vector.broadcast %4 : vector<1x128xf32> to vector<16x128xf32>
    %6 = arith.addf %3, %5 : vector<16x128xf32>
    %c0_5 = arith.constant 0 : index
    %c0_6 = arith.constant 0 : index
    %7 = vector.load %arg2[%c0_5, %c0_6] : memref<16x128xf32, #tpu.memory_space<vmem>>, vector<16x128xf32>
    %8 = arith.addf %6, %7 : vector<16x128xf32>
    %c0_7 = arith.constant 0 : index
    %c0_8 = arith.constant 0 : index
    %9 = vector.load %arg3[%c0_7, %c0_8] : memref<16x16xf32, #tpu.memory_space<vmem>>, vector<16x16xf32>
    %c0_9 = arith.constant 0 : index
    %c0_10 = arith.constant 0 : index
    %c0_11 = arith.constant 0 : index
    %10 = vector.load %arg8[%c0_9, %c0_10, %c0_11] : memref<2x1x128xf32, #tpu.memory_space<vmem>>, vector<1x1x128xf32>
    %11 = vector.shape_cast %10 : vector<1x1x128xf32> to vector<1x128xf32>
    %c0_12 = arith.constant 0 : index
    %c0_13 = arith.constant 0 : index
    %c0_14 = arith.constant 0 : index
    %12 = vector.load %arg9[%c0_12, %c0_13, %c0_14] : memref<2x1x128xf32, #tpu.memory_space<vmem>>, vector<1x1x128xf32>
    %13 = vector.shape_cast %12 : vector<1x1x128xf32> to vector<1x128xf32>
    %cst_15 = arith.constant dense<0.000000e+00> : vector<16xf32>
    %14 = vector.multi_reduction <add>, %8, %cst_15 [1] : vector<16x128xf32> to vector<16xf32>
    %15 = vector.shape_cast %14 : vector<16xf32> to vector<16x1xf32>
    %cst_16 = arith.constant 1.280000e+02 : f32
    %16 = vector.broadcast %cst_16 : f32 to vector<16x1xf32>
    %17 = arith.divf %15, %16 : vector<16x1xf32>
    %18 = vector.broadcast %17 : vector<16x1xf32> to vector<16x128xf32>
    %19 = arith.subf %8, %18 : vector<16x128xf32>
    %20 = arith.mulf %19, %19 : vector<16x128xf32>
    %cst_17 = arith.constant dense<0.000000e+00> : vector<16xf32>
    %21 = vector.multi_reduction <add>, %20, %cst_17 [1] : vector<16x128xf32> to vector<16xf32>
    %22 = vector.shape_cast %21 : vector<16xf32> to vector<16x1xf32>
    %cst_18 = arith.constant 1.280000e+02 : f32
    %23 = vector.broadcast %cst_18 : f32 to vector<16x1xf32>
    %24 = arith.divf %22, %23 : vector<16x1xf32>
    %cst_19 = arith.constant 9.99999974E-6 : f32
    %25 = vector.broadcast %cst_19 : f32 to vector<16x1xf32>
    %26 = arith.addf %24, %25 : vector<16x1xf32>
    %27 = math.rsqrt %26 : vector<16x1xf32>
    %28 = vector.broadcast %27 : vector<16x1xf32> to vector<16x128xf32>
    %29 = arith.mulf %19, %28 : vector<16x128xf32>
    %30 = vector.broadcast %11 : vector<1x128xf32> to vector<16x128xf32>
    %31 = arith.mulf %29, %30 : vector<16x128xf32>
    %32 = vector.broadcast %13 : vector<1x128xf32> to vector<16x128xf32>
    %33 = arith.addf %31, %32 : vector<16x128xf32>
    %34 = arith.truncf %33 : vector<16x128xf32> to vector<16x128xbf16>
    %c0_20 = arith.constant 0 : index
    %c0_21 = arith.constant 0 : index
    %c0_22 = arith.constant 0 : index
    %35 = vector.load %arg10[%c0_20, %c0_21, %c0_22] : memref<2x128x384xbf16, #tpu.memory_space<vmem>>, vector<1x128x384xbf16>
    %36 = vector.shape_cast %35 : vector<1x128x384xbf16> to vector<128x384xbf16>
    %cst_23 = arith.constant dense<0.000000e+00> : vector<16x384xf32>
    %37 = tpu.matmul %34, %36, %cst_23 {dimension_numbers = #tpu.dot_dimension_numbers<[1], [0], [0], [1], [0, 0, 1, 1], [], []>} : vector<16x128xbf16>, vector<128x384xbf16>, vector<16x384xf32> -> vector<16x384xf32>
    %c0_24 = arith.constant 0 : index
    %c0_25 = arith.constant 0 : index
    %c0_26 = arith.constant 0 : index
    %38 = vector.load %arg11[%c0_24, %c0_25, %c0_26] : memref<2x1x384xf32, #tpu.memory_space<vmem>>, vector<1x1x384xf32>
    %39 = vector.shape_cast %38 : vector<1x1x384xf32> to vector<1x384xf32>
    %40 = vector.broadcast %39 : vector<1x384xf32> to vector<16x384xf32>
    %41 = arith.addf %37, %40 : vector<16x384xf32>
    %42 = vector.extract_strided_slice %41 {offsets = [0, 0], sizes = [16, 64], strides = [1, 1]} : vector<16x384xf32> to vector<16x64xf32>
    %43 = arith.truncf %42 : vector<16x64xf32> to vector<16x64xbf16>
    %44 = vector.extract_strided_slice %41 {offsets = [0, 128], sizes = [16, 64], strides = [1, 1]} : vector<16x384xf32> to vector<16x64xf32>
    %45 = arith.truncf %44 : vector<16x64xf32> to vector<16x64xbf16>
    %46 = vector.extract_strided_slice %41 {offsets = [0, 256], sizes = [16, 64], strides = [1, 1]} : vector<16x384xf32> to vector<16x64xf32>
    %47 = arith.truncf %46 : vector<16x64xf32> to vector<16x64xbf16>
    %cst_27 = arith.constant dense<0.000000e+00> : vector<16x16xf32>
    %48 = tpu.matmul %43, %45, %cst_27 {dimension_numbers = #tpu.dot_dimension_numbers<[1], [1], [0], [0], [0, 0, 1, 0], [], []>} : vector<16x64xbf16>, vector<16x64xbf16>, vector<16x16xf32> -> vector<16x16xf32>
    %cst_28 = arith.constant 1.250000e-01 : f32
    %49 = vector.broadcast %cst_28 : f32 to vector<16x16xf32>
    %50 = arith.mulf %48, %49 : vector<16x16xf32>
    %51 = arith.addf %50, %9 : vector<16x16xf32>
    %cst_29 = arith.constant dense<0xFF800000> : vector<16xf32>
    %52 = vector.multi_reduction <maximumf>, %51, %cst_29 [1] : vector<16x16xf32> to vector<16xf32>
    %53 = vector.shape_cast %52 : vector<16xf32> to vector<16x1xf32>
    %54 = vector.broadcast %53 : vector<16x1xf32> to vector<16x16xf32>
    %55 = arith.subf %51, %54 : vector<16x16xf32>
    %56 = math.exp %55 : vector<16x16xf32>
    %cst_30 = arith.constant dense<0.000000e+00> : vector<16xf32>
    %57 = vector.multi_reduction <add>, %56, %cst_30 [1] : vector<16x16xf32> to vector<16xf32>
    %58 = vector.shape_cast %57 : vector<16xf32> to vector<16x1xf32>
    %59 = tpu.reciprocal %58 {approx = true} : vector<16x1xf32> -> vector<16x1xf32>
    %60 = vector.broadcast %59 : vector<16x1xf32> to vector<16x16xf32>
    %61 = arith.mulf %56, %60 : vector<16x16xf32>
    %62 = arith.truncf %61 : vector<16x16xf32> to vector<16x16xbf16>
    %cst_31 = arith.constant dense<0.000000e+00> : vector<16x64xf32>
    %63 = tpu.matmul %62, %47, %cst_31 {dimension_numbers = #tpu.dot_dimension_numbers<[1], [0], [0], [1], [0, 0, 1, 1], [], []>} : vector<16x16xbf16>, vector<16x64xbf16>, vector<16x64xf32> -> vector<16x64xf32>
    %64 = vector.extract_strided_slice %41 {offsets = [0, 64], sizes = [16, 64], strides = [1, 1]} : vector<16x384xf32> to vector<16x64xf32>
    %65 = arith.truncf %64 : vector<16x64xf32> to vector<16x64xbf16>
    %66 = vector.extract_strided_slice %41 {offsets = [0, 192], sizes = [16, 64], strides = [1, 1]} : vector<16x384xf32> to vector<16x64xf32>
    %67 = arith.truncf %66 : vector<16x64xf32> to vector<16x64xbf16>
    %68 = vector.extract_strided_slice %41 {offsets = [0, 320], sizes = [16, 64], strides = [1, 1]} : vector<16x384xf32> to vector<16x64xf32>
    %69 = arith.truncf %68 : vector<16x64xf32> to vector<16x64xbf16>
    %cst_32 = arith.constant dense<0.000000e+00> : vector<16x16xf32>
    %70 = tpu.matmul %65, %67, %cst_32 {dimension_numbers = #tpu.dot_dimension_numbers<[1], [1], [0], [0], [0, 0, 1, 0], [], []>} : vector<16x64xbf16>, vector<16x64xbf16>, vector<16x16xf32> -> vector<16x16xf32>
    %cst_33 = arith.constant 1.250000e-01 : f32
    %71 = vector.broadcast %cst_33 : f32 to vector<16x16xf32>
    %72 = arith.mulf %70, %71 : vector<16x16xf32>
    %73 = arith.addf %72, %9 : vector<16x16xf32>
    %cst_34 = arith.constant dense<0xFF800000> : vector<16xf32>
    %74 = vector.multi_reduction <maximumf>, %73, %cst_34 [1] : vector<16x16xf32> to vector<16xf32>
    %75 = vector.shape_cast %74 : vector<16xf32> to vector<16x1xf32>
    %76 = vector.broadcast %75 : vector<16x1xf32> to vector<16x16xf32>
    %77 = arith.subf %73, %76 : vector<16x16xf32>
    %78 = math.exp %77 : vector<16x16xf32>
    %cst_35 = arith.constant dense<0.000000e+00> : vector<16xf32>
    %79 = vector.multi_reduction <add>, %78, %cst_35 [1] : vector<16x16xf32> to vector<16xf32>
    %80 = vector.shape_cast %79 : vector<16xf32> to vector<16x1xf32>
    %81 = tpu.reciprocal %80 {approx = true} : vector<16x1xf32> -> vector<16x1xf32>
    %82 = vector.broadcast %81 : vector<16x1xf32> to vector<16x16xf32>
    %83 = arith.mulf %78, %82 : vector<16x16xf32>
    %84 = arith.truncf %83 : vector<16x16xf32> to vector<16x16xbf16>
    %cst_36 = arith.constant dense<0.000000e+00> : vector<16x64xf32>
    %85 = tpu.matmul %84, %69, %cst_36 {dimension_numbers = #tpu.dot_dimension_numbers<[1], [0], [0], [1], [0, 0, 1, 1], [], []>} : vector<16x16xbf16>, vector<16x64xbf16>, vector<16x64xf32> -> vector<16x64xf32>
    %86 = tpu.concatenate %63, %85 in 1 : vector<16x64xf32>, vector<16x64xf32> -> vector<16x128xf32>
    %87 = arith.truncf %86 : vector<16x128xf32> to vector<16x128xbf16>
    %c0_37 = arith.constant 0 : index
    %c0_38 = arith.constant 0 : index
    %c0_39 = arith.constant 0 : index
    %88 = vector.load %arg12[%c0_37, %c0_38, %c0_39] : memref<2x128x128xbf16, #tpu.memory_space<vmem>>, vector<1x128x128xbf16>
    %89 = vector.shape_cast %88 : vector<1x128x128xbf16> to vector<128x128xbf16>
    %cst_40 = arith.constant dense<0.000000e+00> : vector<16x128xf32>
    %90 = tpu.matmul %87, %89, %cst_40 {dimension_numbers = #tpu.dot_dimension_numbers<[1], [0], [0], [1], [0, 0, 1, 1], [], []>} : vector<16x128xbf16>, vector<128x128xbf16>, vector<16x128xf32> -> vector<16x128xf32>
    %91 = arith.addf %8, %90 : vector<16x128xf32>
    %c0_41 = arith.constant 0 : index
    %c0_42 = arith.constant 0 : index
    %c0_43 = arith.constant 0 : index
    %92 = vector.load %arg13[%c0_41, %c0_42, %c0_43] : memref<2x1x128xf32, #tpu.memory_space<vmem>>, vector<1x1x128xf32>
    %93 = vector.shape_cast %92 : vector<1x1x128xf32> to vector<1x128xf32>
    %94 = vector.broadcast %93 : vector<1x128xf32> to vector<16x128xf32>
    %95 = arith.addf %91, %94 : vector<16x128xf32>
    %c0_44 = arith.constant 0 : index
    %c0_45 = arith.constant 0 : index
    %c0_46 = arith.constant 0 : index
    %96 = vector.load %arg14[%c0_44, %c0_45, %c0_46] : memref<2x1x128xf32, #tpu.memory_space<vmem>>, vector<1x1x128xf32>
    %97 = vector.shape_cast %96 : vector<1x1x128xf32> to vector<1x128xf32>
    %c0_47 = arith.constant 0 : index
    %c0_48 = arith.constant 0 : index
    %c0_49 = arith.constant 0 : index
    %98 = vector.load %arg15[%c0_47, %c0_48, %c0_49] : memref<2x1x128xf32, #tpu.memory_space<vmem>>, vector<1x1x128xf32>
    %99 = vector.shape_cast %98 : vector<1x1x128xf32> to vector<1x128xf32>
    %cst_50 = arith.constant dense<0.000000e+00> : vector<16xf32>
    %100 = vector.multi_reduction <add>, %95, %cst_50 [1] : vector<16x128xf32> to vector<16xf32>
    %101 = vector.shape_cast %100 : vector<16xf32> to vector<16x1xf32>
    %cst_51 = arith.constant 1.280000e+02 : f32
    %102 = vector.broadcast %cst_51 : f32 to vector<16x1xf32>
    %103 = arith.divf %101, %102 : vector<16x1xf32>
    %104 = vector.broadcast %103 : vector<16x1xf32> to vector<16x128xf32>
    %105 = arith.subf %95, %104 : vector<16x128xf32>
    %106 = arith.mulf %105, %105 : vector<16x128xf32>
    %cst_52 = arith.constant dense<0.000000e+00> : vector<16xf32>
    %107 = vector.multi_reduction <add>, %106, %cst_52 [1] : vector<16x128xf32> to vector<16xf32>
    %108 = vector.shape_cast %107 : vector<16xf32> to vector<16x1xf32>
    %cst_53 = arith.constant 1.280000e+02 : f32
    %109 = vector.broadcast %cst_53 : f32 to vector<16x1xf32>
    %110 = arith.divf %108, %109 : vector<16x1xf32>
    %cst_54 = arith.constant 9.99999974E-6 : f32
    %111 = vector.broadcast %cst_54 : f32 to vector<16x1xf32>
    %112 = arith.addf %110, %111 : vector<16x1xf32>
    %113 = math.rsqrt %112 : vector<16x1xf32>
    %114 = vector.broadcast %113 : vector<16x1xf32> to vector<16x128xf32>
    %115 = arith.mulf %105, %114 : vector<16x128xf32>
    %116 = vector.broadcast %97 : vector<1x128xf32> to vector<16x128xf32>
    %117 = arith.mulf %115, %116 : vector<16x128xf32>
    %118 = vector.broadcast %99 : vector<1x128xf32> to vector<16x128xf32>
    %119 = arith.addf %117, %118 : vector<16x128xf32>
    %120 = arith.truncf %119 : vector<16x128xf32> to vector<16x128xbf16>
    %c0_55 = arith.constant 0 : index
    %c0_56 = arith.constant 0 : index
    %c0_57 = arith.constant 0 : index
    %121 = vector.load %arg16[%c0_55, %c0_56, %c0_57] : memref<2x128x512xbf16, #tpu.memory_space<vmem>>, vector<1x128x512xbf16>
    %122 = vector.shape_cast %121 : vector<1x128x512xbf16> to vector<128x512xbf16>
    %cst_58 = arith.constant dense<0.000000e+00> : vector<16x512xf32>
    %123 = tpu.matmul %120, %122, %cst_58 {dimension_numbers = #tpu.dot_dimension_numbers<[1], [0], [0], [1], [0, 0, 1, 1], [], []>} : vector<16x128xbf16>, vector<128x512xbf16>, vector<16x512xf32> -> vector<16x512xf32>
    %c0_59 = arith.constant 0 : index
    %c0_60 = arith.constant 0 : index
    %c0_61 = arith.constant 0 : index
    %124 = vector.load %arg17[%c0_59, %c0_60, %c0_61] : memref<2x1x512xf32, #tpu.memory_space<vmem>>, vector<1x1x512xf32>
    %125 = vector.shape_cast %124 : vector<1x1x512xf32> to vector<1x512xf32>
    %126 = vector.broadcast %125 : vector<1x512xf32> to vector<16x512xf32>
    %127 = arith.addf %123, %126 : vector<16x512xf32>
    %cst_62 = arith.constant 5.000000e-01 : f32
    %128 = vector.broadcast %cst_62 : f32 to vector<16x512xf32>
    %129 = arith.mulf %128, %127 : vector<16x512xf32>
    %cst_63 = arith.constant 4.471500e-02 : f32
    %130 = vector.broadcast %cst_63 : f32 to vector<16x512xf32>
    %131 = arith.mulf %130, %127 : vector<16x512xf32>
    %132 = arith.mulf %131, %127 : vector<16x512xf32>
    %133 = arith.mulf %132, %127 : vector<16x512xf32>
    %134 = arith.addf %127, %133 : vector<16x512xf32>
    %cst_64 = arith.constant 0.797884583 : f32
    %135 = vector.broadcast %cst_64 : f32 to vector<16x512xf32>
    %136 = arith.mulf %135, %134 : vector<16x512xf32>
    %137 = math.tanh %136 : vector<16x512xf32>
    %cst_65 = arith.constant 1.000000e+00 : f32
    %138 = vector.broadcast %cst_65 : f32 to vector<16x512xf32>
    %139 = arith.addf %138, %137 : vector<16x512xf32>
    %140 = arith.mulf %129, %139 : vector<16x512xf32>
    %141 = arith.truncf %140 : vector<16x512xf32> to vector<16x512xbf16>
    %c0_66 = arith.constant 0 : index
    %c0_67 = arith.constant 0 : index
    %c0_68 = arith.constant 0 : index
    %142 = vector.load %arg18[%c0_66, %c0_67, %c0_68] : memref<2x512x128xbf16, #tpu.memory_space<vmem>>, vector<1x512x128xbf16>
    %143 = vector.shape_cast %142 : vector<1x512x128xbf16> to vector<512x128xbf16>
    %cst_69 = arith.constant dense<0.000000e+00> : vector<16x128xf32>
    %144 = tpu.matmul %141, %143, %cst_69 {dimension_numbers = #tpu.dot_dimension_numbers<[1], [0], [0], [1], [0, 0, 1, 1], [], []>} : vector<16x512xbf16>, vector<512x128xbf16>, vector<16x128xf32> -> vector<16x128xf32>
    %c0_70 = arith.constant 0 : index
    %c0_71 = arith.constant 0 : index
    %c0_72 = arith.constant 0 : index
    %145 = vector.load %arg19[%c0_70, %c0_71, %c0_72] : memref<2x1x128xf32, #tpu.memory_space<vmem>>, vector<1x1x128xf32>
    %146 = vector.shape_cast %145 : vector<1x1x128xf32> to vector<1x128xf32>
    %147 = vector.broadcast %146 : vector<1x128xf32> to vector<16x128xf32>
    %148 = arith.addf %144, %147 : vector<16x128xf32>
    %149 = arith.addf %95, %148 : vector<16x128xf32>
    %c1 = arith.constant 1 : index
    %c0_73 = arith.constant 0 : index
    %c0_74 = arith.constant 0 : index
    %150 = vector.load %arg8[%c1, %c0_73, %c0_74] : memref<2x1x128xf32, #tpu.memory_space<vmem>>, vector<1x1x128xf32>
    %151 = vector.shape_cast %150 : vector<1x1x128xf32> to vector<1x128xf32>
    %c1_75 = arith.constant 1 : index
    %c0_76 = arith.constant 0 : index
    %c0_77 = arith.constant 0 : index
    %152 = vector.load %arg9[%c1_75, %c0_76, %c0_77] : memref<2x1x128xf32, #tpu.memory_space<vmem>>, vector<1x1x128xf32>
    %153 = vector.shape_cast %152 : vector<1x1x128xf32> to vector<1x128xf32>
    %cst_78 = arith.constant dense<0.000000e+00> : vector<16xf32>
    %154 = vector.multi_reduction <add>, %149, %cst_78 [1] : vector<16x128xf32> to vector<16xf32>
    %155 = vector.shape_cast %154 : vector<16xf32> to vector<16x1xf32>
    %cst_79 = arith.constant 1.280000e+02 : f32
    %156 = vector.broadcast %cst_79 : f32 to vector<16x1xf32>
    %157 = arith.divf %155, %156 : vector<16x1xf32>
    %158 = vector.broadcast %157 : vector<16x1xf32> to vector<16x128xf32>
    %159 = arith.subf %149, %158 : vector<16x128xf32>
    %160 = arith.mulf %159, %159 : vector<16x128xf32>
    %cst_80 = arith.constant dense<0.000000e+00> : vector<16xf32>
    %161 = vector.multi_reduction <add>, %160, %cst_80 [1] : vector<16x128xf32> to vector<16xf32>
    %162 = vector.shape_cast %161 : vector<16xf32> to vector<16x1xf32>
    %cst_81 = arith.constant 1.280000e+02 : f32
    %163 = vector.broadcast %cst_81 : f32 to vector<16x1xf32>
    %164 = arith.divf %162, %163 : vector<16x1xf32>
    %cst_82 = arith.constant 9.99999974E-6 : f32
    %165 = vector.broadcast %cst_82 : f32 to vector<16x1xf32>
    %166 = arith.addf %164, %165 : vector<16x1xf32>
    %167 = math.rsqrt %166 : vector<16x1xf32>
    %168 = vector.broadcast %167 : vector<16x1xf32> to vector<16x128xf32>
    %169 = arith.mulf %159, %168 : vector<16x128xf32>
    %170 = vector.broadcast %151 : vector<1x128xf32> to vector<16x128xf32>
    %171 = arith.mulf %169, %170 : vector<16x128xf32>
    %172 = vector.broadcast %153 : vector<1x128xf32> to vector<16x128xf32>
    %173 = arith.addf %171, %172 : vector<16x128xf32>
    %174 = arith.truncf %173 : vector<16x128xf32> to vector<16x128xbf16>
    %c1_83 = arith.constant 1 : index
    %c0_84 = arith.constant 0 : index
    %c0_85 = arith.constant 0 : index
    %175 = vector.load %arg10[%c1_83, %c0_84, %c0_85] : memref<2x128x384xbf16, #tpu.memory_space<vmem>>, vector<1x128x384xbf16>
    %176 = vector.shape_cast %175 : vector<1x128x384xbf16> to vector<128x384xbf16>
    %cst_86 = arith.constant dense<0.000000e+00> : vector<16x384xf32>
    %177 = tpu.matmul %174, %176, %cst_86 {dimension_numbers = #tpu.dot_dimension_numbers<[1], [0], [0], [1], [0, 0, 1, 1], [], []>} : vector<16x128xbf16>, vector<128x384xbf16>, vector<16x384xf32> -> vector<16x384xf32>
    %c1_87 = arith.constant 1 : index
    %c0_88 = arith.constant 0 : index
    %c0_89 = arith.constant 0 : index
    %178 = vector.load %arg11[%c1_87, %c0_88, %c0_89] : memref<2x1x384xf32, #tpu.memory_space<vmem>>, vector<1x1x384xf32>
    %179 = vector.shape_cast %178 : vector<1x1x384xf32> to vector<1x384xf32>
    %180 = vector.broadcast %179 : vector<1x384xf32> to vector<16x384xf32>
    %181 = arith.addf %177, %180 : vector<16x384xf32>
    %182 = vector.extract_strided_slice %181 {offsets = [0, 0], sizes = [16, 64], strides = [1, 1]} : vector<16x384xf32> to vector<16x64xf32>
    %183 = arith.truncf %182 : vector<16x64xf32> to vector<16x64xbf16>
    %184 = vector.extract_strided_slice %181 {offsets = [0, 128], sizes = [16, 64], strides = [1, 1]} : vector<16x384xf32> to vector<16x64xf32>
    %185 = arith.truncf %184 : vector<16x64xf32> to vector<16x64xbf16>
    %186 = vector.extract_strided_slice %181 {offsets = [0, 256], sizes = [16, 64], strides = [1, 1]} : vector<16x384xf32> to vector<16x64xf32>
    %187 = arith.truncf %186 : vector<16x64xf32> to vector<16x64xbf16>
    %cst_90 = arith.constant dense<0.000000e+00> : vector<16x16xf32>
    %188 = tpu.matmul %183, %185, %cst_90 {dimension_numbers = #tpu.dot_dimension_numbers<[1], [1], [0], [0], [0, 0, 1, 0], [], []>} : vector<16x64xbf16>, vector<16x64xbf16>, vector<16x16xf32> -> vector<16x16xf32>
    %cst_91 = arith.constant 1.250000e-01 : f32
    %189 = vector.broadcast %cst_91 : f32 to vector<16x16xf32>
    %190 = arith.mulf %188, %189 : vector<16x16xf32>
    %191 = arith.addf %190, %9 : vector<16x16xf32>
    %cst_92 = arith.constant dense<0xFF800000> : vector<16xf32>
    %192 = vector.multi_reduction <maximumf>, %191, %cst_92 [1] : vector<16x16xf32> to vector<16xf32>
    %193 = vector.shape_cast %192 : vector<16xf32> to vector<16x1xf32>
    %194 = vector.broadcast %193 : vector<16x1xf32> to vector<16x16xf32>
    %195 = arith.subf %191, %194 : vector<16x16xf32>
    %196 = math.exp %195 : vector<16x16xf32>
    %cst_93 = arith.constant dense<0.000000e+00> : vector<16xf32>
    %197 = vector.multi_reduction <add>, %196, %cst_93 [1] : vector<16x16xf32> to vector<16xf32>
    %198 = vector.shape_cast %197 : vector<16xf32> to vector<16x1xf32>
    %199 = tpu.reciprocal %198 {approx = true} : vector<16x1xf32> -> vector<16x1xf32>
    %200 = vector.broadcast %199 : vector<16x1xf32> to vector<16x16xf32>
    %201 = arith.mulf %196, %200 : vector<16x16xf32>
    %202 = arith.truncf %201 : vector<16x16xf32> to vector<16x16xbf16>
    %cst_94 = arith.constant dense<0.000000e+00> : vector<16x64xf32>
    %203 = tpu.matmul %202, %187, %cst_94 {dimension_numbers = #tpu.dot_dimension_numbers<[1], [0], [0], [1], [0, 0, 1, 1], [], []>} : vector<16x16xbf16>, vector<16x64xbf16>, vector<16x64xf32> -> vector<16x64xf32>
    %204 = vector.extract_strided_slice %181 {offsets = [0, 64], sizes = [16, 64], strides = [1, 1]} : vector<16x384xf32> to vector<16x64xf32>
    %205 = arith.truncf %204 : vector<16x64xf32> to vector<16x64xbf16>
    %206 = vector.extract_strided_slice %181 {offsets = [0, 192], sizes = [16, 64], strides = [1, 1]} : vector<16x384xf32> to vector<16x64xf32>
    %207 = arith.truncf %206 : vector<16x64xf32> to vector<16x64xbf16>
    %208 = vector.extract_strided_slice %181 {offsets = [0, 320], sizes = [16, 64], strides = [1, 1]} : vector<16x384xf32> to vector<16x64xf32>
    %209 = arith.truncf %208 : vector<16x64xf32> to vector<16x64xbf16>
    %cst_95 = arith.constant dense<0.000000e+00> : vector<16x16xf32>
    %210 = tpu.matmul %205, %207, %cst_95 {dimension_numbers = #tpu.dot_dimension_numbers<[1], [1], [0], [0], [0, 0, 1, 0], [], []>} : vector<16x64xbf16>, vector<16x64xbf16>, vector<16x16xf32> -> vector<16x16xf32>
    %cst_96 = arith.constant 1.250000e-01 : f32
    %211 = vector.broadcast %cst_96 : f32 to vector<16x16xf32>
    %212 = arith.mulf %210, %211 : vector<16x16xf32>
    %213 = arith.addf %212, %9 : vector<16x16xf32>
    %cst_97 = arith.constant dense<0xFF800000> : vector<16xf32>
    %214 = vector.multi_reduction <maximumf>, %213, %cst_97 [1] : vector<16x16xf32> to vector<16xf32>
    %215 = vector.shape_cast %214 : vector<16xf32> to vector<16x1xf32>
    %216 = vector.broadcast %215 : vector<16x1xf32> to vector<16x16xf32>
    %217 = arith.subf %213, %216 : vector<16x16xf32>
    %218 = math.exp %217 : vector<16x16xf32>
    %cst_98 = arith.constant dense<0.000000e+00> : vector<16xf32>
    %219 = vector.multi_reduction <add>, %218, %cst_98 [1] : vector<16x16xf32> to vector<16xf32>
    %220 = vector.shape_cast %219 : vector<16xf32> to vector<16x1xf32>
    %221 = tpu.reciprocal %220 {approx = true} : vector<16x1xf32> -> vector<16x1xf32>
    %222 = vector.broadcast %221 : vector<16x1xf32> to vector<16x16xf32>
    %223 = arith.mulf %218, %222 : vector<16x16xf32>
    %224 = arith.truncf %223 : vector<16x16xf32> to vector<16x16xbf16>
    %cst_99 = arith.constant dense<0.000000e+00> : vector<16x64xf32>
    %225 = tpu.matmul %224, %209, %cst_99 {dimension_numbers = #tpu.dot_dimension_numbers<[1], [0], [0], [1], [0, 0, 1, 1], [], []>} : vector<16x16xbf16>, vector<16x64xbf16>, vector<16x64xf32> -> vector<16x64xf32>
    %226 = tpu.concatenate %203, %225 in 1 : vector<16x64xf32>, vector<16x64xf32> -> vector<16x128xf32>
    %227 = arith.truncf %226 : vector<16x128xf32> to vector<16x128xbf16>
    %c1_100 = arith.constant 1 : index
    %c0_101 = arith.constant 0 : index
    %c0_102 = arith.constant 0 : index
    %228 = vector.load %arg12[%c1_100, %c0_101, %c0_102] : memref<2x128x128xbf16, #tpu.memory_space<vmem>>, vector<1x128x128xbf16>
    %229 = vector.shape_cast %228 : vector<1x128x128xbf16> to vector<128x128xbf16>
    %cst_103 = arith.constant dense<0.000000e+00> : vector<16x128xf32>
    %230 = tpu.matmul %227, %229, %cst_103 {dimension_numbers = #tpu.dot_dimension_numbers<[1], [0], [0], [1], [0, 0, 1, 1], [], []>} : vector<16x128xbf16>, vector<128x128xbf16>, vector<16x128xf32> -> vector<16x128xf32>
    %231 = arith.addf %149, %230 : vector<16x128xf32>
    %c1_104 = arith.constant 1 : index
    %c0_105 = arith.constant 0 : index
    %c0_106 = arith.constant 0 : index
    %232 = vector.load %arg13[%c1_104, %c0_105, %c0_106] : memref<2x1x128xf32, #tpu.memory_space<vmem>>, vector<1x1x128xf32>
    %233 = vector.shape_cast %232 : vector<1x1x128xf32> to vector<1x128xf32>
    %234 = vector.broadcast %233 : vector<1x128xf32> to vector<16x128xf32>
    %235 = arith.addf %231, %234 : vector<16x128xf32>
    %c1_107 = arith.constant 1 : index
    %c0_108 = arith.constant 0 : index
    %c0_109 = arith.constant 0 : index
    %236 = vector.load %arg14[%c1_107, %c0_108, %c0_109] : memref<2x1x128xf32, #tpu.memory_space<vmem>>, vector<1x1x128xf32>
    %237 = vector.shape_cast %236 : vector<1x1x128xf32> to vector<1x128xf32>
    %c1_110 = arith.constant 1 : index
    %c0_111 = arith.constant 0 : index
    %c0_112 = arith.constant 0 : index
    %238 = vector.load %arg15[%c1_110, %c0_111, %c0_112] : memref<2x1x128xf32, #tpu.memory_space<vmem>>, vector<1x1x128xf32>
    %239 = vector.shape_cast %238 : vector<1x1x128xf32> to vector<1x128xf32>
    %cst_113 = arith.constant dense<0.000000e+00> : vector<16xf32>
    %240 = vector.multi_reduction <add>, %235, %cst_113 [1] : vector<16x128xf32> to vector<16xf32>
    %241 = vector.shape_cast %240 : vector<16xf32> to vector<16x1xf32>
    %cst_114 = arith.constant 1.280000e+02 : f32
    %242 = vector.broadcast %cst_114 : f32 to vector<16x1xf32>
    %243 = arith.divf %241, %242 : vector<16x1xf32>
    %244 = vector.broadcast %243 : vector<16x1xf32> to vector<16x128xf32>
    %245 = arith.subf %235, %244 : vector<16x128xf32>
    %246 = arith.mulf %245, %245 : vector<16x128xf32>
    %cst_115 = arith.constant dense<0.000000e+00> : vector<16xf32>
    %247 = vector.multi_reduction <add>, %246, %cst_115 [1] : vector<16x128xf32> to vector<16xf32>
    %248 = vector.shape_cast %247 : vector<16xf32> to vector<16x1xf32>
    %cst_116 = arith.constant 1.280000e+02 : f32
    %249 = vector.broadcast %cst_116 : f32 to vector<16x1xf32>
    %250 = arith.divf %248, %249 : vector<16x1xf32>
    %cst_117 = arith.constant 9.99999974E-6 : f32
    %251 = vector.broadcast %cst_117 : f32 to vector<16x1xf32>
    %252 = arith.addf %250, %251 : vector<16x1xf32>
    %253 = math.rsqrt %252 : vector<16x1xf32>
    %254 = vector.broadcast %253 : vector<16x1xf32> to vector<16x128xf32>
    %255 = arith.mulf %245, %254 : vector<16x128xf32>
    %256 = vector.broadcast %237 : vector<1x128xf32> to vector<16x128xf32>
    %257 = arith.mulf %255, %256 : vector<16x128xf32>
    %258 = vector.broadcast %239 : vector<1x128xf32> to vector<16x128xf32>
    %259 = arith.addf %257, %258 : vector<16x128xf32>
    %260 = arith.truncf %259 : vector<16x128xf32> to vector<16x128xbf16>
    %c1_118 = arith.constant 1 : index
    %c0_119 = arith.constant 0 : index
    %c0_120 = arith.constant 0 : index
    %261 = vector.load %arg16[%c1_118, %c0_119, %c0_120] : memref<2x128x512xbf16, #tpu.memory_space<vmem>>, vector<1x128x512xbf16>
    %262 = vector.shape_cast %261 : vector<1x128x512xbf16> to vector<128x512xbf16>
    %cst_121 = arith.constant dense<0.000000e+00> : vector<16x512xf32>
    %263 = tpu.matmul %260, %262, %cst_121 {dimension_numbers = #tpu.dot_dimension_numbers<[1], [0], [0], [1], [0, 0, 1, 1], [], []>} : vector<16x128xbf16>, vector<128x512xbf16>, vector<16x512xf32> -> vector<16x512xf32>
    %c1_122 = arith.constant 1 : index
    %c0_123 = arith.constant 0 : index
    %c0_124 = arith.constant 0 : index
    %264 = vector.load %arg17[%c1_122, %c0_123, %c0_124] : memref<2x1x512xf32, #tpu.memory_space<vmem>>, vector<1x1x512xf32>
    %265 = vector.shape_cast %264 : vector<1x1x512xf32> to vector<1x512xf32>
    %266 = vector.broadcast %265 : vector<1x512xf32> to vector<16x512xf32>
    %267 = arith.addf %263, %266 : vector<16x512xf32>
    %cst_125 = arith.constant 5.000000e-01 : f32
    %268 = vector.broadcast %cst_125 : f32 to vector<16x512xf32>
    %269 = arith.mulf %268, %267 : vector<16x512xf32>
    %cst_126 = arith.constant 4.471500e-02 : f32
    %270 = vector.broadcast %cst_126 : f32 to vector<16x512xf32>
    %271 = arith.mulf %270, %267 : vector<16x512xf32>
    %272 = arith.mulf %271, %267 : vector<16x512xf32>
    %273 = arith.mulf %272, %267 : vector<16x512xf32>
    %274 = arith.addf %267, %273 : vector<16x512xf32>
    %cst_127 = arith.constant 0.797884583 : f32
    %275 = vector.broadcast %cst_127 : f32 to vector<16x512xf32>
    %276 = arith.mulf %275, %274 : vector<16x512xf32>
    %277 = math.tanh %276 : vector<16x512xf32>
    %cst_128 = arith.constant 1.000000e+00 : f32
    %278 = vector.broadcast %cst_128 : f32 to vector<16x512xf32>
    %279 = arith.addf %278, %277 : vector<16x512xf32>
    %280 = arith.mulf %269, %279 : vector<16x512xf32>
    %281 = arith.truncf %280 : vector<16x512xf32> to vector<16x512xbf16>
    %c1_129 = arith.constant 1 : index
    %c0_130 = arith.constant 0 : index
    %c0_131 = arith.constant 0 : index
    %282 = vector.load %arg18[%c1_129, %c0_130, %c0_131] : memref<2x512x128xbf16, #tpu.memory_space<vmem>>, vector<1x512x128xbf16>
    %283 = vector.shape_cast %282 : vector<1x512x128xbf16> to vector<512x128xbf16>
    %cst_132 = arith.constant dense<0.000000e+00> : vector<16x128xf32>
    %284 = tpu.matmul %281, %283, %cst_132 {dimension_numbers = #tpu.dot_dimension_numbers<[1], [0], [0], [1], [0, 0, 1, 1], [], []>} : vector<16x512xbf16>, vector<512x128xbf16>, vector<16x128xf32> -> vector<16x128xf32>
    %c1_133 = arith.constant 1 : index
    %c0_134 = arith.constant 0 : index
    %c0_135 = arith.constant 0 : index
    %285 = vector.load %arg19[%c1_133, %c0_134, %c0_135] : memref<2x1x128xf32, #tpu.memory_space<vmem>>, vector<1x1x128xf32>
    %286 = vector.shape_cast %285 : vector<1x1x128xf32> to vector<1x128xf32>
    %287 = vector.broadcast %286 : vector<1x128xf32> to vector<16x128xf32>
    %288 = arith.addf %284, %287 : vector<16x128xf32>
    %289 = arith.addf %235, %288 : vector<16x128xf32>
    %290 = arith.truncf %289 : vector<16x128xf32> to vector<16x128xbf16>
    %cst_136 = arith.constant 0.000000e+00 : f32
    %291 = vector.broadcast %cst_136 : f32 to vector<16x16xf32>
    %c0_137 = arith.constant 0 : index
    %c0_138 = arith.constant 0 : index
    %c0_139 = arith.constant 0 : index
    %292 = vector.load %arg4[%c0_137, %c0_138, %c0_139] : memref<5x16x1xf32, #tpu.memory_space<vmem>>, vector<1x16x1xf32>
    %293 = vector.shape_cast %292 : vector<1x16x1xf32> to vector<16x1xf32>
    %c0_140 = arith.constant 0 : index
    %c0_141 = arith.constant 0 : index
    %c0_142 = arith.constant 0 : index
    %294 = vector.load %arg20[%c0_140, %c0_141, %c0_142] : memref<5x128x16xbf16, #tpu.memory_space<vmem>>, vector<1x128x16xbf16>
    %295 = vector.shape_cast %294 : vector<1x128x16xbf16> to vector<128x16xbf16>
    %cst_143 = arith.constant dense<0.000000e+00> : vector<16x16xf32>
    %296 = tpu.matmul %290, %295, %cst_143 {dimension_numbers = #tpu.dot_dimension_numbers<[1], [0], [0], [1], [0, 0, 1, 1], [], []>} : vector<16x128xbf16>, vector<128x16xbf16>, vector<16x16xf32> -> vector<16x16xf32>
    %297 = vector.broadcast %293 : vector<16x1xf32> to vector<16x16xf32>
    %298 = arith.mulf %297, %296 : vector<16x16xf32>
    %299 = arith.addf %291, %298 : vector<16x16xf32>
    %c1_144 = arith.constant 1 : index
    %c0_145 = arith.constant 0 : index
    %c0_146 = arith.constant 0 : index
    %300 = vector.load %arg4[%c1_144, %c0_145, %c0_146] : memref<5x16x1xf32, #tpu.memory_space<vmem>>, vector<1x16x1xf32>
    %301 = vector.shape_cast %300 : vector<1x16x1xf32> to vector<16x1xf32>
    %c1_147 = arith.constant 1 : index
    %c0_148 = arith.constant 0 : index
    %c0_149 = arith.constant 0 : index
    %302 = vector.load %arg20[%c1_147, %c0_148, %c0_149] : memref<5x128x16xbf16, #tpu.memory_space<vmem>>, vector<1x128x16xbf16>
    %303 = vector.shape_cast %302 : vector<1x128x16xbf16> to vector<128x16xbf16>
    %cst_150 = arith.constant dense<0.000000e+00> : vector<16x16xf32>
    %304 = tpu.matmul %290, %303, %cst_150 {dimension_numbers = #tpu.dot_dimension_numbers<[1], [0], [0], [1], [0, 0, 1, 1], [], []>} : vector<16x128xbf16>, vector<128x16xbf16>, vector<16x16xf32> -> vector<16x16xf32>
    %305 = vector.broadcast %301 : vector<16x1xf32> to vector<16x16xf32>
    %306 = arith.mulf %305, %304 : vector<16x16xf32>
    %307 = arith.addf %299, %306 : vector<16x16xf32>
    %c2 = arith.constant 2 : index
    %c0_151 = arith.constant 0 : index
    %c0_152 = arith.constant 0 : index
    %308 = vector.load %arg4[%c2, %c0_151, %c0_152] : memref<5x16x1xf32, #tpu.memory_space<vmem>>, vector<1x16x1xf32>
    %309 = vector.shape_cast %308 : vector<1x16x1xf32> to vector<16x1xf32>
    %c2_153 = arith.constant 2 : index
    %c0_154 = arith.constant 0 : index
    %c0_155 = arith.constant 0 : index
    %310 = vector.load %arg20[%c2_153, %c0_154, %c0_155] : memref<5x128x16xbf16, #tpu.memory_space<vmem>>, vector<1x128x16xbf16>
    %311 = vector.shape_cast %310 : vector<1x128x16xbf16> to vector<128x16xbf16>
    %cst_156 = arith.constant dense<0.000000e+00> : vector<16x16xf32>
    %312 = tpu.matmul %290, %311, %cst_156 {dimension_numbers = #tpu.dot_dimension_numbers<[1], [0], [0], [1], [0, 0, 1, 1], [], []>} : vector<16x128xbf16>, vector<128x16xbf16>, vector<16x16xf32> -> vector<16x16xf32>
    %313 = vector.broadcast %309 : vector<16x1xf32> to vector<16x16xf32>
    %314 = arith.mulf %313, %312 : vector<16x16xf32>
    %315 = arith.addf %307, %314 : vector<16x16xf32>
    %c3 = arith.constant 3 : index
    %c0_157 = arith.constant 0 : index
    %c0_158 = arith.constant 0 : index
    %316 = vector.load %arg4[%c3, %c0_157, %c0_158] : memref<5x16x1xf32, #tpu.memory_space<vmem>>, vector<1x16x1xf32>
    %317 = vector.shape_cast %316 : vector<1x16x1xf32> to vector<16x1xf32>
    %c3_159 = arith.constant 3 : index
    %c0_160 = arith.constant 0 : index
    %c0_161 = arith.constant 0 : index
    %318 = vector.load %arg20[%c3_159, %c0_160, %c0_161] : memref<5x128x16xbf16, #tpu.memory_space<vmem>>, vector<1x128x16xbf16>
    %319 = vector.shape_cast %318 : vector<1x128x16xbf16> to vector<128x16xbf16>
    %cst_162 = arith.constant dense<0.000000e+00> : vector<16x16xf32>
    %320 = tpu.matmul %290, %319, %cst_162 {dimension_numbers = #tpu.dot_dimension_numbers<[1], [0], [0], [1], [0, 0, 1, 1], [], []>} : vector<16x128xbf16>, vector<128x16xbf16>, vector<16x16xf32> -> vector<16x16xf32>
    %321 = vector.broadcast %317 : vector<16x1xf32> to vector<16x16xf32>
    %322 = arith.mulf %321, %320 : vector<16x16xf32>
    %323 = arith.addf %315, %322 : vector<16x16xf32>
    %c4 = arith.constant 4 : index
    %c0_163 = arith.constant 0 : index
    %c0_164 = arith.constant 0 : index
    %324 = vector.load %arg4[%c4, %c0_163, %c0_164] : memref<5x16x1xf32, #tpu.memory_space<vmem>>, vector<1x16x1xf32>
    %325 = vector.shape_cast %324 : vector<1x16x1xf32> to vector<16x1xf32>
    %c4_165 = arith.constant 4 : index
    %c0_166 = arith.constant 0 : index
    %c0_167 = arith.constant 0 : index
    %326 = vector.load %arg20[%c4_165, %c0_166, %c0_167] : memref<5x128x16xbf16, #tpu.memory_space<vmem>>, vector<1x128x16xbf16>
    %327 = vector.shape_cast %326 : vector<1x128x16xbf16> to vector<128x16xbf16>
    %cst_168 = arith.constant dense<0.000000e+00> : vector<16x16xf32>
    %328 = tpu.matmul %290, %327, %cst_168 {dimension_numbers = #tpu.dot_dimension_numbers<[1], [0], [0], [1], [0, 0, 1, 1], [], []>} : vector<16x128xbf16>, vector<128x16xbf16>, vector<16x16xf32> -> vector<16x16xf32>
    %329 = vector.broadcast %325 : vector<16x1xf32> to vector<16x16xf32>
    %330 = arith.mulf %329, %328 : vector<16x16xf32>
    %331 = arith.addf %323, %330 : vector<16x16xf32>
    %c0_169 = arith.constant 0 : index
    %c0_170 = arith.constant 0 : index
    %332 = vector.load %arg5[%c0_169, %c0_170] : memref<2x16xf32, #tpu.memory_space<vmem>>, vector<2x16xf32>
    %cst_171 = arith.constant dense<0.000000e+00> : vector<2x16xf32>
    %333 = tpu.matmul %332, %331, %cst_171 {dimension_numbers = #tpu.dot_dimension_numbers<[1], [0], [0], [1], [0, 0, 1, 1], [], []>} : vector<2x16xf32>, vector<16x16xf32>, vector<2x16xf32> -> vector<2x16xf32>
    %c0_172 = arith.constant 0 : index
    %c0_173 = arith.constant 0 : index
    %334 = vector.load %arg21[%c0_172, %c0_173] : memref<1x16xf32, #tpu.memory_space<vmem>>, vector<1x16xf32>
    %335 = vector.broadcast %334 : vector<1x16xf32> to vector<2x16xf32>
    %336 = arith.addf %333, %335 : vector<2x16xf32>
    %c0_174 = arith.constant 0 : index
    %c0_175 = arith.constant 0 : index
    %337 = vector.load %arg22[%c0_174, %c0_175] : memref<2x16xf32, #tpu.memory_space<vmem>>, vector<2x16xf32>
    tpu.vector_store %arg22[%c0_174, %c0_175], %336 {strides = array<i32>} : memref<2x16xf32, #tpu.memory_space<vmem>>, vector<2x16xf32>,
    return
  }
  func.func @transform_0(%arg0: i32) -> (i32, i32) {
    %c0_i32 = arith.constant 0 : i32
    %c0_i32_0 = arith.constant 0 : i32
    return %arg0, %c0_i32 : i32, i32
  }
  func.func @transform_1(%arg0: i32) -> (i32, i32) {
    %c0_i32 = arith.constant 0 : i32
    %c0_i32_0 = arith.constant 0 : i32
    %c0_i32_1 = arith.constant 0 : i32
    return %c0_i32, %c0_i32_0 : i32, i32
  }
  func.func @transform_2(%arg0: i32) -> (i32, i32) {
    %c0_i32 = arith.constant 0 : i32
    %c0_i32_0 = arith.constant 0 : i32
    %c0_i32_1 = arith.constant 0 : i32
    return %c0_i32, %c0_i32_0 : i32, i32
  }
  func.func @transform_3(%arg0: i32) -> (i32, i32, i32) {
    %c0_i32 = arith.constant 0 : i32
    %c0_i32_0 = arith.constant 0 : i32
    %c0_i32_1 = arith.constant 0 : i32
    %c0_i32_2 = arith.constant 0 : i32
    return %c0_i32, %c0_i32_0, %c0_i32_1 : i32, i32, i32
  }
  func.func @transform_4(%arg0: i32) -> (i32, i32) {
    %c0_i32 = arith.constant 0 : i32
    %c0_i32_0 = arith.constant 0 : i32
    %c0_i32_1 = arith.constant 0 : i32
    return %c0_i32, %c0_i32_0 : i32, i32
  }
  func.func @transform_5(%arg0: i32) -> (i32, i32) {
    %c0_i32 = arith.constant 0 : i32
    %c0_i32_0 = arith.constant 0 : i32
    %c0_i32_1 = arith.constant 0 : i32
    return %c0_i32, %c0_i32_0 : i32, i32
  }
  func.func @transform_6(%arg0: i32) -> (i32, i32) {
    %c0_i32 = arith.constant 0 : i32
    %c0_i32_0 = arith.constant 0 : i32
    %c0_i32_1 = arith.constant 0 : i32
    return %c0_i32, %c0_i32_0 : i32, i32
  }
  func.func @transform_7(%arg0: i32) -> (i32, i32, i32) {
    %c0_i32 = arith.constant 0 : i32
    %c0_i32_0 = arith.constant 0 : i32
    %c0_i32_1 = arith.constant 0 : i32
    %c0_i32_2 = arith.constant 0 : i32
    return %c0_i32, %c0_i32_0, %c0_i32_1 : i32, i32, i32
  }
  func.func @transform_8(%arg0: i32) -> (i32, i32, i32) {
    %c0_i32 = arith.constant 0 : i32
    %c0_i32_0 = arith.constant 0 : i32
    %c0_i32_1 = arith.constant 0 : i32
    %c0_i32_2 = arith.constant 0 : i32
    return %c0_i32, %c0_i32_0, %c0_i32_1 : i32, i32, i32
  }
  func.func @transform_9(%arg0: i32) -> (i32, i32, i32) {
    %c0_i32 = arith.constant 0 : i32
    %c0_i32_0 = arith.constant 0 : i32
    %c0_i32_1 = arith.constant 0 : i32
    %c0_i32_2 = arith.constant 0 : i32
    return %c0_i32, %c0_i32_0, %c0_i32_1 : i32, i32, i32
  }
  func.func @transform_10(%arg0: i32) -> (i32, i32, i32) {
    %c0_i32 = arith.constant 0 : i32
    %c0_i32_0 = arith.constant 0 : i32
    %c0_i32_1 = arith.constant 0 : i32
    %c0_i32_2 = arith.constant 0 : i32
    return %c0_i32, %c0_i32_0, %c0_i32_1 : i32, i32, i32
  }
  func.func @transform_11(%arg0: i32) -> (i32, i32, i32) {
    %c0_i32 = arith.constant 0 : i32
    %c0_i32_0 = arith.constant 0 : i32
    %c0_i32_1 = arith.constant 0 : i32
    %c0_i32_2 = arith.constant 0 : i32
    return %c0_i32, %c0_i32_0, %c0_i32_1 : i32, i32, i32
  }
  func.func @transform_12(%arg0: i32) -> (i32, i32, i32) {
    %c0_i32 = arith.constant 0 : i32
    %c0_i32_0 = arith.constant 0 : i32
    %c0_i32_1 = arith.constant 0 : i32
    %c0_i32_2 = arith.constant 0 : i32
    return %c0_i32, %c0_i32_0, %c0_i32_1 : i32, i32, i32
  }
  func.func @transform_13(%arg0: i32) -> (i32, i32, i32) {
    %c0_i32 = arith.constant 0 : i32
    %c0_i32_0 = arith.constant 0 : i32
    %c0_i32_1 = arith.constant 0 : i32
    %c0_i32_2 = arith.constant 0 : i32
    return %c0_i32, %c0_i32_0, %c0_i32_1 : i32, i32, i32
  }
  func.func @transform_14(%arg0: i32) -> (i32, i32, i32) {
    %c0_i32 = arith.constant 0 : i32
    %c0_i32_0 = arith.constant 0 : i32
    %c0_i32_1 = arith.constant 0 : i32
    %c0_i32_2 = arith.constant 0 : i32
    return %c0_i32, %c0_i32_0, %c0_i32_1 : i32, i32, i32
  }
  func.func @transform_15(%arg0: i32) -> (i32, i32, i32) {
    %c0_i32 = arith.constant 0 : i32
    %c0_i32_0 = arith.constant 0 : i32
    %c0_i32_1 = arith.constant 0 : i32
    %c0_i32_2 = arith.constant 0 : i32
    return %c0_i32, %c0_i32_0, %c0_i32_1 : i32, i32, i32
  }
  func.func @transform_16(%arg0: i32) -> (i32, i32, i32) {
    %c0_i32 = arith.constant 0 : i32
    %c0_i32_0 = arith.constant 0 : i32
    %c0_i32_1 = arith.constant 0 : i32
    %c0_i32_2 = arith.constant 0 : i32
    return %c0_i32, %c0_i32_0, %c0_i32_1 : i32, i32, i32
  }
  func.func @transform_17(%arg0: i32) -> (i32, i32, i32) {
    %c0_i32 = arith.constant 0 : i32
    %c0_i32_0 = arith.constant 0 : i32
    %c0_i32_1 = arith.constant 0 : i32
    %c0_i32_2 = arith.constant 0 : i32
    return %c0_i32, %c0_i32_0, %c0_i32_1 : i32, i32, i32
  }
  func.func @transform_18(%arg0: i32) -> (i32, i32, i32) {
    %c0_i32 = arith.constant 0 : i32
    %c0_i32_0 = arith.constant 0 : i32
    %c0_i32_1 = arith.constant 0 : i32
    %c0_i32_2 = arith.constant 0 : i32
    return %c0_i32, %c0_i32_0, %c0_i32_1 : i32, i32, i32
  }
  func.func @transform_19(%arg0: i32) -> (i32, i32, i32) {
    %c0_i32 = arith.constant 0 : i32
    %c0_i32_0 = arith.constant 0 : i32
    %c0_i32_1 = arith.constant 0 : i32
    %c0_i32_2 = arith.constant 0 : i32
    return %c0_i32, %c0_i32_0, %c0_i32_1 : i32, i32, i32
  }
  func.func @transform_20(%arg0: i32) -> (i32, i32) {
    %c0_i32 = arith.constant 0 : i32
    %c0_i32_0 = arith.constant 0 : i32
    %c0_i32_1 = arith.constant 0 : i32
    return %c0_i32, %c0_i32_0 : i32, i32
  }
  func.func @transform_21(%arg0: i32) -> (i32, i32) {
    %c0_i32 = arith.constant 0 : i32
    %c0_i32_0 = arith.constant 0 : i32
    return %arg0, %c0_i32 : i32, i32
  }
}

</mosaic_0001>

<bundles_post_ra>
// kernel: encoder_forward.1
= control target key start
LH: loop header
LB: loop body
LE: loop exit
PB: predicated region body
PF: predicated region fallthrough
CT: control target
= control target key end

     0   :  { %s5285_s0 = inlined_call_operand.vmem [shape: f32[16,32], index: 0, kind: input, shape index: {}]   ;;  %s5286_s1 = inlined_call_operand.vmem [shape: f32[16,128], index: 1, kind: input, shape index: {}]   ;;  %s5287_s2 = inlined_call_operand.vmem [shape: f32[16,16], index: 2, kind: input, shape index: {}]   ;;  %s5288_s3 = inlined_call_operand.vmem [shape: f32[5,16,1], index: 3, kind: input, shape index: {}]   ;;  %s5289_s4 = inlined_call_operand.vmem [shape: f32[2,16], index: 4, kind: input, shape index: {}]   ;;  %s5290_s5 = inlined_call_operand.vmem [shape: bf16[32,128], index: 5, kind: input, shape index: {}]   ;;  %s5291_s6 = inlined_call_operand.vmem [shape: f32[1,128], index: 6, kind: input, shape index: {}]   ;;  %s5292_s7 = inlined_call_operand.vmem [shape: f32[2,1,128], index: 7, kind: input, shape index: {}]   ;;  %s5293_s8 = inlined_call_operand.vmem [shape: f32[2,1,128], index: 8, kind: input, shape index: {}]   ;;  %s5294_s9 = inlined_call_operand.hbm [shape: bf16[2,128,384], index: 9, kind: input, shape index: {}]   ;;  %s5295_s10 = inlined_call_operand.vmem [shape: f32[2,1,384], index: 10, kind: input, shape index: {}]   ;;  %s5296_s11 = inlined_call_operand.vmem [shape: bf16[2,128,128], index: 11, kind: input, shape index: {}]   ;;  %s5297_s12 = inlined_call_operand.vmem [shape: f32[2,1,128], index: 12, kind: input, shape index: {}]   ;;  %s5298_s13 = inlined_call_operand.vmem [shape: f32[2,1,128], index: 13, kind: input, shape index: {}]   ;;  %s5299_s14 = inlined_call_operand.vmem [shape: f32[2,1,128], index: 14, kind: input, shape index: {}]   ;;  %s5300_s15 = inlined_call_operand.hbm [shape: bf16[2,128,512], index: 15, kind: input, shape index: {}]   ;;  %s5301_s16 = inlined_call_operand.vmem [shape: f32[2,1,512], index: 16, kind: input, shape index: {}]   ;;  %s5302_s17 = inlined_call_operand.hbm [shape: bf16[2,512,128], index: 17, kind: input, shape index: {}]   ;;  %s5303_s18 = inlined_call_operand.vmem [shape: f32[2,1,128], index: 18, kind: input, shape index: {}]   ;;  %s5304_s19 = inlined_call_operand.vmem [shape: bf16[5,128,16], index: 19, kind: input, shape index: {}]   ;;  %s5305_s20 = inlined_call_operand.vmem [shape: f32[1,16], index: 20, kind: input, shape index: {}]   ;;  %s5306_s21 = inlined_call_operand.hbm [shape: f32[2,16], index: 21, kind: output, shape index: {}]  }
   0x1   :  { %5312 = sst [smem:[#allocation12_spill]] %s5285_s0 }
   0x2   :  { %5313 = sst [smem:[#allocation13_spill]] %s5286_s1 }
   0x3   :  { %5314 = sst [smem:[#allocation14_spill]] %s5287_s2 }
   0x4   :  { %5315 = sst [smem:[#allocation15_spill]] %s5288_s3 }
   0x5   :  { %5316 = sst [smem:[#allocation16_spill]] %s5289_s4 }
   0x6   :  { %5317 = sst [smem:[#allocation17_spill]] %s5290_s5 }
   0x7   :  { %26 = vsyncpa [#allocation3], 0 }
   0x8   :  { %27 = vsyncpa [#allocation6], 0  ;;  %s74_s26 = sshll.u32 %s5300_s15, 4  ;;  %s75_s26 = int_to_ptr.hbm [resolvable:$true] %s74_s26 }
   0x9   :  { %28 = vsyncpa [#allocation4], 0  ;;  %s4625_s27 = smov [#allocation5]   ;;  %s51_s0 = sshll.u32 %s5294_s9, 4  ;;  %s52_s0 = int_to_ptr.hbm [resolvable:$true] %s51_s0 }
   0xa   :  { %s76_s3 = sshll.u32 %s4625_s27, 4  ;;  %s4626_s4 = smov 256   ;;  %s77_s3 = int_to_ptr.vmem [resolvable:$true] %s76_s3 }
   0xb   :  { %s4627_s30 = smov 16   ;;  %s4628_s5 = smov [#allocation2]  }
   0xc   :  { %82 = dma.hbm_to_vmem [thread:$0]  %s75_s26, 8192, %s77_s3, [#allocation6], %s4626_s4, %s4626_s4, %s4627_s30  }
   0xd   :  { %s53_s22 = sshll.u32 %s4628_s5, 4  ;;  %s4629_s23 = smov 192   ;;  %s54_s22 = int_to_ptr.vmem [resolvable:$true] %s53_s22 }
   0xe   :  { %s4630_s1 = smov 12   ;;  %s89_s2 = sshll.u32 %s5302_s17, 4  ;;  %s90_s2 = int_to_ptr.hbm [resolvable:$true] %s89_s2 }
   0xf   :  { %59 = dma.hbm_to_vmem [thread:$0]  %s52_s0, 6144, %s54_s22, [#allocation3], %s4629_s23, %s4629_s23, %s4630_s1  }
  0x10   :  { %s4631_s25 = smov [#allocation7]   ;;  %s4632_s28 = smov 64  }
  0x11   :  { %s91_s27 = sshll.u32 %s4631_s25, 4  ;;  %s4633_s9 = smov 4   ;;  %s92_s27 = int_to_ptr.vmem [resolvable:$true] %s91_s27 }
  0x12   :  { %97 = dma.hbm_to_vmem [thread:$0]  %s90_s2, 8192, %s92_s27, [#allocation6], %s4632_s28, %s4632_s28, %s4633_s9  }
  0x13   :  { %4619 = dma.done.wait [#allocation3], 6144  }
  0x14   :  { %4620 = vsyncadd [#allocation3], 4294961152 }
  0x15   :  { %4621 = dma.done.wait [#allocation6], 16384  }
  0x16   :  { %4622 = vsyncadd [#allocation6], 4294950912  ;;  %s5318_s29 = sld [smem:[#allocation17_spill]]  ;;  %vm140_vm0 = vcmask 261120   ;;  %v4425_v5 = vld [vmem:[%s5291_s6] ss:$0 sm:$0xff] }
  0x17   :  { %s5319_s5 = sld [smem:[#allocation12_spill]]  ;;  %v4634_v14 = vmov 128.0   ;;  %v3219_v29 = vld [vmem:[#allocation2 + $0xa8] sm:$0xf]  ;;  %v4190_v30 = vld [vmem:[#allocation2 + $0xb0] sm:$0xf0] }
  0x18   :  { %s5320_s25 = sld [smem:[#allocation13_spill]]  ;;  %4439 = vrcp.f32 %v4634_v14  ;;  %v4189_v31 = vld [vmem:[#allocation2 + $0xac] sm:$0xf]  ;;  %v3220_v32 = vor.u32 %v4190_v30, %v3219_v29  ;;  %v3221_v33 = vld [vmem:[#allocation2 + $0xb4] sm:$0xf0]  ;;  %vm437_vm8 = vcmask 523264  }
  0x19   :  { %v3227_v34 = vld [vmem:[#allocation2 + $0xb0] sm:$0xf]  ;;  %v4191_v35 = vld [vmem:[#allocation2 + $0xb8] sm:$0xf0]  ;;  %v3224_v36 = vor.u32 %v4189_v31, %v3221_v33  ;;  %v4186_v40 = vld [vmem:[#allocation2 + $0x94] sm:$0xf] }
  0x1a   :  { %v3228_v37 = vor.u32 %v4191_v35, %v3227_v34  ;;  %392 = vmatpush.bf16.msra.mxu1 %v3220_v32  ;;  %v3207_v38 = vld [vmem:[#allocation2 + $0x90] sm:$0xf]  ;;  %v4187_v39 = vld [vmem:[#allocation2 + $0x98] sm:$0xf0]  ;;  %v3209_v42 = vld [vmem:[#allocation2 + $0x9c] sm:$0xf0] }
  0x1b   :  { %v3208_v41 = vor.u32 %v4187_v39, %v3207_v38  ;;  %v3215_v43 = vld [vmem:[#allocation2 + $0x98] sm:$0xf]  ;;  %v4188_v44 = vld [vmem:[#allocation2 + $0xa0] sm:$0xf0]  ;;  %v3212_v45 = vor.u32 %v4186_v40, %v3209_v42  ;;  %v4183_v49 = vld [vmem:[#allocation2 + $0x7c] sm:$0xf] }
  0x1c   :  { %v4167_v0 = vld [vmem:[%s5318_s29 + $0x8] sm:$0xff]  ;;  %v4166_v1 = vld [vmem:[%s5318_s29] sm:$0xff]  ;;  %420 = vmatpush.bf16.msra.mxu3 %v3228_v37  ;;  %v3216_v46 = vor.u32 %v4188_v44, %v3215_v43  ;;  %v3195_v47 = vld [vmem:[#allocation2 + $0x78] sm:$0xf]  ;;  %vm462_vm9 = vcmask 130048   ;;  %s5322_s22 = sld [smem:[#allocation15_spill]] }
  0x1d   :  { %v117_v2 = vld [vmem:[%s5319_s5] sm:$0xff]  ;;  %v118_v3 = vld [vmem:[%s5319_s5 + $0x8] sm:$0xff]  ;;  %150 = vmatpush.bf16.msra.mxu2 %v4167_v0  ;;  %v3185_v60 = vld [vmem:[#allocation2 + $0x6c] sm:$0xf0]  ;;  %s5321_s5 = sld [smem:[#allocation14_spill]]  ;;  %s3113_s1 = sshll.u32 %s5306_s21, 4  ;;  %s3114_s1 = int_to_ptr.hbm [resolvable:$true] %s3113_s1 }
  0x1e   :  { %v119_v4 = vpack.c.bf16 %v118_v3, %v117_v2  ;;  %v158_v7 = vld [vmem:[%s5320_s25] sm:$0xff]  ;;  %v159_v11 = vld [vmem:[%s5320_s25 + $0x8] sm:$0xff]  ;;  %v4440_v15 = vpop.eup %4439  ;;  %393 = vmatpush.bf16.msra.mxu1 %v3208_v41  ;;  %v4182_v62 = vld [vmem:[#allocation2 + $0x70] sm:$0xf0] }
  0x1f   :  { %v171_v16 = vmul.f32 128.0, %v4440_v15  ;;  %vm175_vm1 = vweird.f32 %v4440_v15  ;;  %v4184_v48 = vld [vmem:[#allocation2 + $0x80] sm:$0xf0]  ;;  %v3197_v51 = vld [vmem:[#allocation2 + $0x84] sm:$0xf0] }
  0x20   :  { %421 = vmatpush.bf16.msra.mxu3 %v3216_v46  ;;  %v3196_v50 = vor.u32 %v4184_v48, %v3195_v47  ;;  %v3203_v52 = vld [vmem:[#allocation2 + $0x80] sm:$0xf]  ;;  %v4185_v53 = vld [vmem:[#allocation2 + $0x88] sm:$0xf0]  ;;  %v3200_v54 = vor.u32 %v4183_v49, %v3197_v51  ;;  %v4180_v58 = vld [vmem:[#allocation2 + $0x64] sm:$0xf] }
  0x21   :  { %151 = vmatpush.bf16.msra.mxu2 %v4166_v1  ;;  %v172_v17 = vsub.f32 1.0, %v171_v16  ;;  %v3204_v55 = vor.u32 %v4185_v53, %v3203_v52  ;;  %v3183_v56 = vld [vmem:[#allocation2 + $0x60] sm:$0xf]  ;;  %v4181_v57 = vld [vmem:[#allocation2 + $0x68] sm:$0xf0]  ;;  %v3188_v63 = vor.u32 %v4180_v58, %v3185_v60 }
  0x22   :  { %394 = vmatpush.bf16.msra.mxu1 %v3196_v50  ;;  %v3184_v59 = vor.u32 %v4181_v57, %v3183_v56  ;;  %v3191_v61 = vld [vmem:[#allocation2 + $0x68] sm:$0xf]  ;;  %v4178_v2 = vld [vmem:[#allocation2 + $0x50] sm:$0xf0]  ;;  %v4177_v3 = vld [vmem:[#allocation2 + $0x4c] sm:$0xf] }
  0x23   :  { %v173_v18 = vmul.f32 %v4440_v15, %v172_v17  ;;  %v3192_v0 = vor.u32 %v4182_v62, %v3191_v61  ;;  %v3171_v1 = vld [vmem:[#allocation2 + $0x48] sm:$0xf]  ;;  %v4174_v14 = vld [vmem:[#allocation2 + $0x34] sm:$0xf]  ;;  %v3161_v16 = vld [vmem:[#allocation2 + $0x3c] sm:$0xf0] }
  0x24   :  { %3132 = vmatmul.msk.bf16.vlgmr.msra.gmra.mxu2 %vm140_vm0, %v119_v4  ;;  %422 = vmatpush.bf16.msra.mxu3 %v3204_v55  ;;  %v3172_v4 = vor.u32 %v4178_v2, %v3171_v1  ;;  %v3167_v17 = vld [vmem:[#allocation2 + $0x38] sm:$0xf]  ;;  %v3155_v29 = vld [vmem:[#allocation2 + $0x20] sm:$0xf]  ;;  %v4173_v30 = vld [vmem:[#allocation2 + $0x28] sm:$0xf0] }
  0x25   :  { %v174_v19 = vadd.f32 %v4440_v15, %v173_v18  ;;  %406 = vmatpush.bf16.msrb.mxu2 %v3224_v36  ;;  %v4176_v18 = vld [vmem:[#allocation2 + $0x40] sm:$0xf0]  ;;  %v3156_v32 = vor.u32 %v4173_v30, %v3155_v29  ;;  %v3135_v33 = vld [vmem:[#allocation2] sm:$0xf]  ;;  %v4169_v34 = vld [vmem:[#allocation2 + $0x8] sm:$0xf0] }
  0x26   :  { %395 = vmatpush.bf16.msra.mxu1 %v3184_v59  ;;  %v4168_v35 = vld [vmem:[#allocation2 + $0x4] sm:$0xf]  ;;  %v3136_v37 = vor.u32 %v4169_v34, %v3135_v33  ;;  %v3137_v38 = vld [vmem:[#allocation2 + $0xc] sm:$0xf0]  ;;  %v3143_v39 = vld [vmem:[#allocation2 + $0x8] sm:$0xf] }
  0x27   :  { %v4785_v20 = vsel %vm175_vm1, %v4440_v15, %v174_v19  ;;  %v3164_v19 = vor.u32 %v4174_v14, %v3161_v16  ;;  %v4170_v40 = vld [vmem:[#allocation2 + $0x10] sm:$0xf0]  ;;  %v3140_v42 = vor.u32 %v4168_v35, %v3137_v38  ;;  %v4426_v61 = vld [vmem:[%s5292_s7] ss:$0 sm:$0xff] }
  0x28   :  { %423 = vmatpush.bf16.msra.mxu3 %v3192_v0  ;;  %v3144_v43 = vor.u32 %v4170_v40, %v3143_v39  ;;  %v4427_v2 = vld [vmem:[%s5293_s8] ss:$0 sm:$0xff] }
  0x29   :  { %407 = vmatpush.bf16.msrb.mxu2 %v3212_v45  ;;  %v162_v34 = vld [vmem:[%s5321_s5] sm:$0xff] }
  0x2a   :  { %396 = vmatpush.bf16.msra.mxu1 %v3172_v4 }
  0x2d   :  { %408 = vmatpush.bf16.msrb.mxu2 %v3200_v54 }
  0x31   :  { %409 = vmatpush.bf16.msrb.mxu2 %v3188_v63 }
  0xa7   :  { %v153_v6 = vpop.f32.mrf.mxu2 }
  0xa8   :  { %v154_v8 = vadd.f32 %v4425_v5, %v153_v6  ;;  %v3179_v6 = vld [vmem:[#allocation2 + $0x50] sm:$0xf] }
  0xaa   :  { %v4776_v9 = vadd.f32 %v158_v7, %v154_v8  ;;  %v4179_v7 = vld [vmem:[#allocation2 + $0x58] sm:$0xf0] }
  0xac   :  { %166 = vadd.xlane.f32.xlu0 %v4776_v9 }
  0xaf   :  { %v155_v10 = vpop.f32.mrf.mxu2 }
  0xb0   :  { %v156_v12 = vadd.f32 %v4425_v5, %v155_v10  ;;  %v3173_v5 = vld [vmem:[#allocation2 + $0x54] sm:$0xf0]  ;;  %v3180_v10 = vor.u32 %v4179_v7, %v3179_v6 }
  0xb1   :  { %v3176_v8 = vor.u32 %v4177_v3, %v3173_v5 }
  0xb2   :  { %v4782_v13 = vadd.f32 %v159_v11, %v156_v12  ;;  %424 = vmatpush.bf16.msra.mxu3 %v3180_v10  ;;  %v3159_v11 = vld [vmem:[#allocation2 + $0x30] sm:$0xf]  ;;  %v4175_v12 = vld [vmem:[#allocation2 + $0x38] sm:$0xf0]  ;;  %v256_v10 = vld [vmem:[%s5295_s10] sm:$0x7] }
  0xb3   :  { %410 = vmatpush.bf16.msrb.mxu2 %v3176_v8  ;;  %v3160_v15 = vor.u32 %v4175_v12, %v3159_v11  ;;  %v260_v11 = vperm.slane %v256_v10, 2 }
  0xb4   :  { %168 = vadd.xlane.f32.xlu0 %v4782_v13 }
  0xb5   :  { %397 = vmatpush.bf16.msra.mxu1 %v3160_v15 }
  0xb7   :  { %411 = vmatpush.bf16.msrb.mxu2 %v3164_v19 }
 0x11f   :  { %v167_v21 = vpop.xlane.xlu0 %166 }
 0x120   :  { %v177_v22 = vmul.f32 %v4785_v20, %v167_v21  ;;  %v3168_v21 = vor.u32 %v4176_v18, %v3167_v17 }
 0x122   :  { %v4789_v23 = vsub.f32 %v4776_v9, %v177_v22  ;;  %425 = vmatpush.bf16.msra.mxu3 %v3168_v21  ;;  %v3147_v22 = vld [vmem:[#allocation2 + $0x18] sm:$0xf] }
 0x124   :  { %v181_v24 = vmul.f32 %v4789_v23, %v4789_v23 }
 0x126   :  { %183 = vadd.xlane.f32.xlu1 %v181_v24  ;;  %v4172_v24 = vld [vmem:[#allocation2 + $0x20] sm:$0xf0]  ;;  %426 = vmatpush.bf16.msra.mxu3 %v3156_v32 }
 0x127   :  { %v169_v25 = vpop.xlane.xlu0 %168 }
 0x128   :  { %v178_v26 = vmul.f32 %v4785_v20, %v169_v25  ;;  %v4171_v25 = vld [vmem:[#allocation2 + $0x1c] sm:$0xf] }
 0x12a   :  { %v4795_v27 = vsub.f32 %v4782_v13, %v178_v26  ;;  %v3148_v26 = vor.u32 %v4172_v24, %v3147_v22  ;;  %427 = vmatpush.bf16.msra.mxu3 %v3144_v43  ;;  %v258_v22 = vperm.slane %v256_v10, 0 }
 0x12c   :  { %v182_v28 = vmul.f32 %v4795_v27, %v4795_v27  ;;  %398 = vmatpush.bf16.msra.mxu1 %v3148_v26 }
 0x12e   :  { %185 = vadd.xlane.f32.xlu1 %v182_v28  ;;  %v3149_v28 = vld [vmem:[#allocation2 + $0x24] sm:$0xf0] }
 0x12f   :  { %v3152_v31 = vor.u32 %v4171_v25, %v3149_v28 }
 0x130   :  { %399 = vmatpush.bf16.msra.mxu1 %v3136_v37 }
 0x131   :  { %412 = vmatpush.bf16.msrb.mxu2 %v3152_v31 }
 0x135   :  { %413 = vmatpush.bf16.msrb.mxu2 %v3140_v42 }
 0x199   :  { %v184_v36 = vpop.xlane.xlu1 %183 }
 0x19a   :  { %v187_v41 = vmul.f32 %v184_v36, %v4785_v20 }
 0x19c   :  { %v189_v44 = vadd.f32 1e-05, %v187_v41 }
 0x19e   :  { %4441 = vrsqrt.f32 %v189_v44  ;;  %vm197_vm3 = vweird.f32 %v189_v44 }
 0x1a1   :  { %v186_v45 = vpop.xlane.xlu1 %185 }
 0x1a2   :  { %v188_v46 = vmul.f32 %v186_v45, %v4785_v20 }
 0x1a4   :  { %v4442_v47 = vpop.eup %4441  ;;  %v190_v48 = vadd.f32 1e-05, %v188_v46 }
 0x1a5   :  { %v192_v49 = vmul.f32 %v4442_v47, %v189_v44  ;;  %vm198_vm2 = vweird.f32 %v4442_v47  ;;  %v163_v44 = vld [vmem:[%s5321_s5 + $0x8] sm:$0xff] }
 0x1a6   :  { %4443 = vrsqrt.f32 %v190_v48  ;;  %vm199_vm4 = vmor %vm197_vm3, %vm198_vm2  ;;  %vm207_vm6 = vweird.f32 %v190_v48 }
 0x1a7   :  { %v193_v50 = vmul.f32 %v4442_v47, %v192_v49 }
 0x1a9   :  { %v194_v51 = vmul.f32 0.5, %v193_v50 }
 0x1ab   :  { %v195_v52 = vsub.f32 1.5, %v194_v51 }
 0x1ac   :  { %v4444_v53 = vpop.eup %4443 }
 0x1ad   :  { %v196_v54 = vmul.f32 %v4442_v47, %v195_v52  ;;  %v202_v55 = vmul.f32 %v4444_v53, %v190_v48  ;;  %vm208_vm5 = vweird.f32 %v4444_v53 }
 0x1ae   :  { %vm209_vm7 = vmor %vm207_vm6, %vm208_vm5 }
 0x1af   :  { %v203_v56 = vmul.f32 %v4444_v53, %v202_v55  ;;  %v200_v57 = vsel %vm199_vm4, %v4442_v47, %v196_v54 }
 0x1b0   :  { %v211_v60 = vmul.f32 %v200_v57, %v4789_v23 }
 0x1b1   :  { %v204_v58 = vmul.f32 0.5, %v203_v56 }
 0x1b2   :  { %v216_v1 = vmul.f32 %v4426_v61, %v211_v60 }
 0x1b3   :  { %v205_v59 = vsub.f32 1.5, %v204_v58 }
 0x1b4   :  { %v221_v4 = vadd.f32 %v4427_v2, %v216_v1 }
 0x1b5   :  { %v206_v62 = vmul.f32 %v4444_v53, %v205_v59 }
 0x1b7   :  { %v210_v63 = vsel %vm209_vm7, %v4444_v53, %v206_v62 }
 0x1b8   :  { %v212_v0 = vmul.f32 %v210_v63, %v4795_v27  ;;  %v259_v27 = vperm.slane %v256_v10, 1 }
 0x1ba   :  { %v217_v3 = vmul.f32 %v4426_v61, %v212_v0 }
 0x1bc   :  { %v222_v5 = vadd.f32 %v4427_v2, %v217_v3 }
 0x1be   :  { %v223_v6 = vpack.c.bf16 %v222_v5, %v221_v4 }
 0x1c0   :  { %400 = vmatmul.bf16.vlgmr.msra.gmra.mxu1 %v223_v6  ;;  %414 = vmatmul.bf16.vlgmr.msrb.gmra.mxu2 %v223_v6 }
 0x1c1   :  { %428 = vmatmul.bf16.vlgmr.msra.gmra.mxu3 %v223_v6 }
 0x23d   :  { %v401_v8 = vpop.f32.mrf.mxu1 }
 0x23e   :  { %v402_v28 = vadd.f32 %v401_v8, %v258_v22 }
 0x243   :  { %v415_v23 = vpop.f32.mrf.mxu2 }
 0x244   :  { %v429_v7 = vpop.f32.mrf.mxu3  ;;  %v416_v14 = vadd.f32 %v415_v23, %v259_v27 }
 0x245   :  { %v430_v18 = vadd.f32 %v429_v7, %v260_v11  ;;  %v403_v21 = vpop.f32.mrf.mxu1 }
 0x246   :  { %v404_v26 = vadd.f32 %v403_v21, %v258_v22 }
 0x248   :  { %v434_v29 = vpack.c.bf16 %v404_v26, %v402_v28  ;;  %v4197_v26 = vld [vmem:[%s5296_s11 + $0x28] sm:$0xff]  ;;  %v4196_v28 = vld [vmem:[%s5296_s11 + $0x20] sm:$0xff] }
 0x24b   :  { %v417_v12 = vpop.f32.mrf.mxu2 }
 0x24c   :  { %v418_v15 = vadd.f32 %v417_v12, %v259_v27  ;;  %v431_v16 = vpop.f32.mrf.mxu3 }
 0x24d   :  { %v432_v17 = vadd.f32 %v431_v16, %v260_v11 }
 0x24e   :  { %v435_v19 = vpack.c.bf16 %v418_v15, %v416_v14 }
 0x24f   :  { %v4814_v25 = vpack.c.bf16 %v432_v17, %v430_v18 }
 0x250   :  { %507 = vrot.lane.b32.xlu2 %v435_v19, %s4632_s28  ;;  %v442_v24 = vsel %vm437_vm8, %v435_v19, 0 }
 0x251   :  { %451 = vmatpush.bf16.xpose.msra.mxu0 %v442_v24  ;;  %v4199_v24 = vld [vmem:[%s5296_s11 + $0x38] sm:$0xff] }
 0x252   :  { %652 = vmatpush.bf16.msrb.mxu3 %v4199_v24  ;;  %v3355_v24 = vld [vmem:[#allocation5 + $0xa8] sm:$0xf] }
 0x258   :  { %504 = vrot.lane.b32.xlu2 %v434_v29, %s4632_s28  ;;  %3229 = vmatmul.msk.bf16.vlgmr.msra.gmra.mxu0 %vm437_vm8, %v434_v29  ;;  %v4195_v29 = vld [vmem:[%s5296_s11 + $0x18] sm:$0xff] }
 0x259   :  { %496 = vmatpush.bf16.msrb.mxu0 %v4814_v25 }
 0x2aa   :  { %v508_v30 = vpop.permute.xlu2 %507 }
 0x2ab   :  { %v513_v31 = vsel %vm437_vm8, %v508_v30, 0  ;;  %v4194_v30 = vld [vmem:[%s5296_s11 + $0x10] sm:$0xff] }
 0x2ac   :  { %522 = vmatpush.bf16.xpose.msrb.mxu1 %v513_v31 }
 0x2b2   :  { %v505_v32 = vpop.permute.xlu2 %504 }
 0x2b3   :  { %3231 = vmatmul.msk.bf16.vlgmr.msrb.gmra.mxu1 %vm437_vm8, %v505_v32  ;;  %v4193_v32 = vld [vmem:[%s5296_s11 + $0x8] sm:$0xff] }
 0x2d5   :  { %v453_v33 = vpop.f32.mrf.mxu0 }
 0x2d6   :  { %v458_v35 = vmul.f32 0.125, %v453_v33 }
 0x2d8   :  { %v460_v36 = vadd.f32 %v458_v35, %v162_v34  ;;  %v4192_v35 = vld [vmem:[%s5296_s11] sm:$0xff] }
 0x2da   :  { %v463_v37 = vsel %vm462_vm9, %v460_v36, -inf }
 0x2db   :  { %464 = vmax.xlane.f32.xlu2 %v463_v37 }
 0x2dd   :  { %v455_v40 = vpop.f32.mrf.mxu0 }
 0x2de   :  { %v459_v42 = vmul.f32 0.125, %v455_v40 }
 0x2e0   :  { %v461_v47 = vadd.f32 %v459_v42, %v163_v44 }
 0x2e2   :  { %v466_v50 = vsel %vm462_vm9, %v461_v47, -inf }
 0x330   :  { %v524_v38 = vpop.f32.mrf.mxu1 }
 0x331   :  { %v529_v39 = vmul.f32 0.125, %v524_v38 }
 0x333   :  { %v531_v41 = vadd.f32 %v529_v39, %v162_v34 }
 0x335   :  { %v533_v43 = vsel %vm462_vm9, %v531_v41, -inf }
 0x336   :  { %534 = vmax.xlane.f32.xlu0 %v533_v43 }
 0x338   :  { %v526_v45 = vpop.f32.mrf.mxu1 }
 0x339   :  { %v530_v46 = vmul.f32 0.125, %v526_v45 }
 0x33b   :  { %v532_v48 = vadd.f32 %v530_v46, %v163_v44  ;;  %v4428_v44 = vld [vmem:[%s5297_s12] ss:$0 sm:$0xff] }
 0x33d   :  { %v536_v49 = vsel %vm462_vm9, %v532_v48, -inf }
 0x33e   :  { %537 = vmax.xlane.f32.xlu1 %v536_v49  ;;  %467 = vmax.xlane.f32.xlu0 %v466_v50 }
 0x34e   :  { %v465_v54 = vpop.xlane.xlu2 %464 }
 0x34f   :  { %v469_v58 = vsub.f32 %v460_v36, %v465_v54 }
 0x351   :  { %v471_v61 = vmul.f32 1.442695, %v469_v58  ;;  %v4230_v58 = vld [vmem:[#allocation5 + $0xec] sm:$0xf0] }
 0x3a9   :  { %v535_v51 = vpop.xlane.xlu0 %534 }
 0x3aa   :  { %v539_v52 = vsub.f32 %v531_v41, %v535_v51 }
 0x3ac   :  { %v541_v53 = vmul.f32 1.442695, %v539_v52 }
 0x3ae   :  { %4445 = vpow2.f32 %v541_v53 }
 0x3b1   :  { %v538_v55 = vpop.xlane.xlu1 %537  ;;  %v468_v62 = vpop.xlane.xlu0 %467 }
 0x3b2   :  { %v540_v56 = vsub.f32 %v532_v48, %v538_v55  ;;  %v470_v0 = vsub.f32 %v461_v47, %v468_v62  ;;  %v3387_v62 = vld [vmem:[#allocation5 + $0xe8] sm:$0xf] }
 0x3b4   :  { %v4446_v57 = vpop.eup %4445  ;;  %v543_v59 = vmul.f32 1.442695, %v540_v56  ;;  %v473_v2 = vmul.f32 1.442695, %v470_v0 }
 0x3b5   :  { %v545_v60 = vsel %vm462_vm9, %v4446_v57, 0.0 }
 0x3b6   :  { %4447 = vpow2.f32 %v543_v59  ;;  %546 = vadd.xlane.f32.xlu1 %v545_v60  ;;  %v4228_v59 = vld [vmem:[#allocation5 + $0xe4] sm:$0xf] }
 0x3b7   :  { %4449 = vpow2.f32 %v471_v61  ;;  %v3381_v61 = vld [vmem:[#allocation5 + $0xf0] sm:$0xf0] }
 0x3b8   :  { %4451 = vpow2.f32 %v473_v2  ;;  %v3384_v0 = vor.u32 %v4228_v59, %v3381_v61  ;;  %v4229_v2 = vld [vmem:[#allocation5 + $0xec] sm:$0xf]  ;;  %v4210_v59 = vld [vmem:[#allocation5 + $0x4c] sm:$0xf0] }
 0x3ba   :  { %943 = vmatpush.bf16.msra.mxu1 %v3384_v0  ;;  %v4211_v0 = vld [vmem:[#allocation5 + $0x54] sm:$0xf0] }
 0x3bc   :  { %v4448_v63 = vpop.eup %4447 }
 0x3bd   :  { %v548_v1 = vsel %vm462_vm9, %v4448_v63, 0.0  ;;  %v4450_v3 = vpop.eup %4449 }
 0x3be   :  { %549 = vadd.xlane.f32.xlu0 %v548_v1  ;;  %v475_v4 = vsel %vm462_vm9, %v4450_v3, 0.0  ;;  %v4452_v5 = vpop.eup %4451 }
 0x3bf   :  { %v478_v6 = vsel %vm462_vm9, %v4452_v5, 0.0 }
 0x3c6   :  { %476 = vadd.xlane.f32.xlu0 %v475_v4 }
 0x3ce   :  { %479 = vadd.xlane.f32.xlu0 %v478_v6  ;;  %v4226_v6 = vld [vmem:[#allocation5 + $0xcc] sm:$0xf0] }
 0x3cf   :  { %557 = vrot.lane.b32.xlu1 %v4814_v25, %s4632_s28  ;;  %v4198_v25 = vld [vmem:[%s5296_s11 + $0x30] sm:$0xff] }
 0x3d0   :  { %653 = vmatpush.bf16.msrb.mxu3 %v4198_v25  ;;  %v4223_v25 = vld [vmem:[#allocation5 + $0xb4] sm:$0xf0] }
 0x3d4   :  { %654 = vmatpush.bf16.msrb.mxu3 %v4197_v26 }
 0x3d8   :  { %655 = vmatpush.bf16.msrb.mxu3 %v4196_v28  ;;  %v3356_v28 = vor.u32 %v4223_v25, %v3355_v24  ;;  %v4200_v24 = vld [vmem:[#allocation5 + $0x4] sm:$0xf]  ;;  %v3269_v25 = vld [vmem:[#allocation5 + $0x10] sm:$0xf0] }
 0x3dc   :  { %656 = vmatpush.bf16.msrb.mxu3 %v4195_v29  ;;  %v4221_v29 = vld [vmem:[#allocation5 + $0xac] sm:$0xf] }
 0x3e0   :  { %657 = vmatpush.bf16.msrb.mxu3 %v4194_v30  ;;  %v3357_v30 = vld [vmem:[#allocation5 + $0xb8] sm:$0xf0] }
 0x3e4   :  { %658 = vmatpush.bf16.msrb.mxu3 %v4193_v32  ;;  %v3331_v32 = vld [vmem:[#allocation5 + $0x80] sm:$0xf] }
 0x3e8   :  { %659 = vmatpush.bf16.msrb.mxu3 %v4192_v35 }
 0x429   :  { %v547_v7 = vpop.xlane.xlu1 %546 }
 0x431   :  { %v550_v23 = vpop.xlane.xlu0 %549 }
 0x432   :  { %4453 = vrcp.f32 %v550_v23  ;;  %v4224_v23 = vld [vmem:[#allocation5 + $0xc4] sm:$0xf] }
 0x433   :  { %4455 = vrcp.f32 %v547_v7 }
 0x438   :  { %v4454_v10 = vpop.eup %4453 }
 0x439   :  { %v477_v8 = vpop.xlane.xlu0 %476  ;;  %v4456_v27 = vpop.eup %4455  ;;  %v554_v11 = vmul.f32 %v4454_v10, %v4448_v63  ;;  %v4231_v63 = vld [vmem:[#allocation5 + $0xf4] sm:$0xf0]  ;;  %v3371_v10 = vld [vmem:[#allocation5 + $0xc8] sm:$0xf] }
 0x43a   :  { %4457 = vrcp.f32 %v477_v8  ;;  %v553_v12 = vmul.f32 %v4456_v27, %v4446_v57  ;;  %v3379_v57 = vld [vmem:[#allocation5 + $0xe0] sm:$0xf]  ;;  %v3388_v1 = vor.u32 %v4231_v63, %v3387_v62  ;;  %v3365_v8 = vld [vmem:[#allocation5 + $0xd0] sm:$0xf0]  ;;  %v4227_v27 = vld [vmem:[#allocation5 + $0xd4] sm:$0xf0] }
 0x43b   :  { %v3380_v60 = vor.u32 %v4230_v58, %v3379_v57  ;;  %v3299_v58 = vld [vmem:[#allocation5 + $0x40] sm:$0xf]  ;;  %v3301_v62 = vld [vmem:[#allocation5 + $0x50] sm:$0xf0]  ;;  %v3307_v63 = vld [vmem:[#allocation5 + $0x48] sm:$0xf] }
 0x43c   :  { %v555_v16 = vpack.c.bf16 %v554_v11, %v553_v12  ;;  %v3368_v11 = vor.u32 %v4224_v23, %v3365_v8  ;;  %v3372_v12 = vor.u32 %v4227_v27, %v3371_v10  ;;  %v3300_v61 = vor.u32 %v4210_v59, %v3299_v58  ;;  %v4206_v23 = vld [vmem:[#allocation5 + $0x2c] sm:$0xf0]  ;;  %v3285_v10 = vld [vmem:[#allocation5 + $0x30] sm:$0xf0]  ;;  %v3291_v27 = vld [vmem:[#allocation5 + $0x28] sm:$0xf] }
 0x43d   :  { %929 = vmatpush.bf16.msra.mxu0 %v3380_v60  ;;  %v4208_v60 = vld [vmem:[#allocation5 + $0x44] sm:$0xf]  ;;  %v4430_v59 = vld [vmem:[%s5299_s14] ss:$0 sm:$0xff] }
 0x43e   :  { %944 = vmatpush.bf16.msra.mxu1 %v3368_v11  ;;  %v4207_v11 = vld [vmem:[#allocation5 + $0x34] sm:$0xf0] }
 0x440   :  { %v4458_v17 = vpop.eup %4457 }
 0x441   :  { %v558_v14 = vpop.permute.xlu1 %557  ;;  %v480_v15 = vpop.xlane.xlu0 %479  ;;  %v483_v19 = vmul.f32 %v4458_v17, %v4450_v3  ;;  %v3389_v3 = vld [vmem:[#allocation5 + $0xf8] sm:$0xf0]  ;;  %v3347_v17 = vld [vmem:[#allocation5 + $0xa0] sm:$0xf] }
 0x442   :  { %4459 = vrcp.f32 %v480_v15  ;;  %570 = vmatpush.bf16.msra.mxu2 %v558_v14  ;;  %v3392_v4 = vor.u32 %v4229_v2, %v3389_v3  ;;  %v4225_v14 = vld [vmem:[#allocation5 + $0xcc] sm:$0xf]  ;;  %v3373_v15 = vld [vmem:[#allocation5 + $0xd8] sm:$0xf0]  ;;  %v3308_v2 = vor.u32 %v4211_v0, %v3307_v63 }
 0x443   :  { %v4209_v3 = vld [vmem:[#allocation5 + $0x4c] sm:$0xf]  ;;  %v4247_v0 = vld [vmem:[#allocation7 + $0x78] sm:$0xff] }
 0x444   :  { %971 = vmatpush.bf16.msra.mxu3 %v3392_v4  ;;  %v3309_v4 = vld [vmem:[#allocation5 + $0x58] sm:$0xf0] }
 0x445   :  { %3232 = vmatmul.msk.bf16.vlgmr.msra.gmra.mxu2 %vm462_vm9, %v555_v16  ;;  %v3376_v16 = vor.u32 %v4225_v14, %v3373_v15  ;;  %v3292_v15 = vor.u32 %v4207_v11, %v3291_v27  ;;  %v4261_v27 = vld [vmem:[#allocation7 + $0xe8] sm:$0xff]  ;;  %v4235_v11 = vld [vmem:[#allocation7 + $0x18] sm:$0xff] }
 0x446   :  { %957 = vmatpush.bf16.msrb.mxu2 %v3388_v1  ;;  %v3304_v1 = vor.u32 %v4208_v60, %v3301_v62 }
 0x448   :  { %v4460_v18 = vpop.eup %4459  ;;  %972 = vmatpush.bf16.msra.mxu3 %v3376_v16  ;;  %v4205_v16 = vld [vmem:[#allocation5 + $0x2c] sm:$0xf] }
 0x449   :  { %v484_v21 = vmul.f32 %v4460_v18, %v4452_v5  ;;  %v3363_v5 = vld [vmem:[#allocation5 + $0xc0] sm:$0xf]  ;;  %v4222_v18 = vld [vmem:[#allocation5 + $0xac] sm:$0xf0] }
 0x44a   :  { %v3364_v7 = vor.u32 %v4226_v6, %v3363_v5  ;;  %958 = vmatpush.bf16.msrb.mxu2 %v3372_v12  ;;  %v3312_v5 = vor.u32 %v4209_v3, %v3309_v4  ;;  %v3283_v6 = vld [vmem:[#allocation5 + $0x20] sm:$0xf]  ;;  %v4263_v3 = vld [vmem:[#allocation7 + $0xf8] sm:$0xff]  ;;  %v4237_v4 = vld [vmem:[#allocation7 + $0x28] sm:$0xff] }
 0x44b   :  { %v485_v22 = vpack.c.bf16 %v484_v21, %v483_v19  ;;  %v4220_v19 = vld [vmem:[#allocation5 + $0xa4] sm:$0xf]  ;;  %v3348_v21 = vor.u32 %v4222_v18, %v3347_v17  ;;  %v3284_v8 = vor.u32 %v4206_v23, %v3283_v6  ;;  %v3293_v17 = vld [vmem:[#allocation5 + $0x38] sm:$0xf0]  ;;  %v3267_v18 = vld [vmem:[#allocation5] sm:$0xf] }
 0x44c   :  { %930 = vmatpush.bf16.msra.mxu0 %v3364_v7  ;;  %v4204_v7 = vld [vmem:[#allocation5 + $0x24] sm:$0xf]  ;;  %v4254_v6 = vld [vmem:[#allocation7 + $0xb0] sm:$0xff] }
 0x44d   :  { %3230 = vmatmul.msk.bf16.vlgmr.msrb.gmra.mxu0 %vm462_vm9, %v485_v22  ;;  %v3349_v22 = vld [vmem:[#allocation5 + $0xb0] sm:$0xf0]  ;;  %v3288_v14 = vor.u32 %v4204_v7, %v3285_v10  ;;  %v4236_v7 = vld [vmem:[#allocation7 + $0x20] sm:$0xff]  ;;  %v4253_v10 = vld [vmem:[#allocation7 + $0xa8] sm:$0xff] }
 0x44e   :  { %v3352_v26 = vor.u32 %v4220_v19, %v3349_v22  ;;  %959 = vmatpush.bf16.msrb.mxu2 %v3356_v28  ;;  %v4202_v22 = vld [vmem:[#allocation5 + $0xc] sm:$0xf0]  ;;  %v3272_v28 = vor.u32 %v4200_v24, %v3269_v25  ;;  %v4241_v24 = vld [vmem:[#allocation7 + $0x48] sm:$0xff] }
 0x44f   :  { %v4262_v23 = vld [vmem:[#allocation7 + $0xf0] sm:$0xff] }
 0x450   :  { %931 = vmatpush.bf16.msra.mxu0 %v3348_v21  ;;  %945 = vmatpush.bf16.msra.mxu1 %v3352_v26  ;;  %v3296_v21 = vor.u32 %v4205_v16, %v3293_v17  ;;  %v3268_v26 = vor.u32 %v4202_v22, %v3267_v18  ;;  %v4234_v16 = vld [vmem:[#allocation7 + $0x10] sm:$0xff]  ;;  %v4251_v18 = vld [vmem:[#allocation7 + $0x98] sm:$0xff]  ;;  %v4233_v22 = vld [vmem:[#allocation7 + $0x8] sm:$0xff] }
 0x451   :  { %v4242_v17 = vld [vmem:[#allocation7 + $0x50] sm:$0xff] }
 0x452   :  { %v4250_v25 = vld [vmem:[#allocation7 + $0x90] sm:$0xff] }
 0x4c8   :  { %v572_v31 = vpop.f32.mrf.mxu2 }
 0x4ca   :  { %v498_v36 = vpop.f32.mrf.mxu0 }
 0x4d0   :  { %v574_v33 = vpop.f32.mrf.mxu2 }
 0x4d1   :  { %v4412_v34 = vpack.i.bf16 %v574_v33, %v572_v31  ;;  %v3360_v31 = vor.u32 %v4221_v29, %v3357_v30  ;;  %v4218_v33 = vld [vmem:[#allocation5 + $0x8c] sm:$0xf0]  ;;  %v3275_v29 = vld [vmem:[#allocation5 + $0x8] sm:$0xf]  ;;  %v4203_v30 = vld [vmem:[#allocation5 + $0x14] sm:$0xf0] }
 0x4d2   :  { %v500_v40 = vpop.f32.mrf.mxu0  ;;  %v3332_v35 = vor.u32 %v4218_v33, %v3331_v32  ;;  %v3276_v33 = vor.u32 %v4203_v30, %v3275_v29  ;;  %v4232_v30 = vld [vmem:[#allocation7] sm:$0xff] }
 0x4d3   :  { %4413 = vrot.lane.b32.xlu0 %v4412_v34, %s4632_s28  ;;  %v4216_v34 = vld [vmem:[#allocation5 + $0x84] sm:$0xf]  ;;  %973 = vmatpush.bf16.msra.mxu3 %v3360_v31  ;;  %v4201_v31 = vld [vmem:[#allocation5 + $0xc] sm:$0xf] }
 0x4d4   :  { %932 = vmatpush.bf16.msra.mxu0 %v3332_v35 }
 0x545   :  { %v4414_v37 = vpop.permute.xlu0 %4413 }
 0x546   :  { %v4416_v38 = vunpack.i.h.bf16 %v4414_v37  ;;  %v4415_v39 = vunpack.i.l.bf16 %v4414_v37  ;;  %v3339_v37 = vld [vmem:[#allocation5 + $0x88] sm:$0xf] }
 0x548   :  { %v585_v41 = vsel %vm437_vm8, %v498_v36, %v4415_v39  ;;  %v586_v42 = vsel %vm437_vm8, %v500_v40, %v4416_v38  ;;  %v3333_v36 = vld [vmem:[#allocation5 + $0x90] sm:$0xf0]  ;;  %v4219_v38 = vld [vmem:[#allocation5 + $0x94] sm:$0xf0] }
 0x549   :  { %v587_v43 = vpack.c.bf16 %v586_v42, %v585_v41  ;;  %v3336_v39 = vor.u32 %v4216_v34, %v3333_v36  ;;  %v3340_v40 = vor.u32 %v4219_v38, %v3339_v37  ;;  %v4217_v41 = vld [vmem:[#allocation5 + $0x8c] sm:$0xf]  ;;  %v3341_v42 = vld [vmem:[#allocation5 + $0x98] sm:$0xf0] }
 0x54a   :  { %v3277_v34 = vld [vmem:[#allocation5 + $0x18] sm:$0xf0] }
 0x54b   :  { %660 = vmatmul.bf16.vlgmr.msrb.gmra.mxu3 %v587_v43  ;;  %v3344_v43 = vor.u32 %v4217_v41, %v3341_v42  ;;  %946 = vmatpush.bf16.msra.mxu1 %v3336_v39  ;;  %v3280_v35 = vor.u32 %v4201_v31, %v3277_v34  ;;  %v4240_v31 = vld [vmem:[#allocation7 + $0x40] sm:$0xff] }
 0x54c   :  { %960 = vmatpush.bf16.msrb.mxu2 %v3340_v40 }
 0x54d   :  { %974 = vmatpush.bf16.msra.mxu3 %v3344_v43 }
 0x5ce   :  { %v661_v45 = vpop.f32.mrf.mxu3 }
 0x5cf   :  { %v666_v46 = vadd.f32 %v661_v45, %v4776_v9  ;;  %v4214_v45 = vld [vmem:[#allocation5 + $0x6c] sm:$0xf0] }
 0x5d1   :  { %v4870_v47 = vadd.f32 %v4428_v44, %v666_v46  ;;  %v4212_v46 = vld [vmem:[#allocation5 + $0x64] sm:$0xf] }
 0x5d3   :  { %676 = vadd.xlane.f32.xlu1 %v4870_v47 }
 0x5d6   :  { %v663_v48 = vpop.f32.mrf.mxu3 }
 0x5d7   :  { %v667_v49 = vadd.f32 %v663_v48, %v4782_v13 }
 0x5d9   :  { %v4874_v50 = vadd.f32 %v4428_v44, %v667_v49  ;;  %v3315_v44 = vld [vmem:[#allocation5 + $0x60] sm:$0xf]  ;;  %v3317_v49 = vld [vmem:[#allocation5 + $0x70] sm:$0xf0] }
 0x5da   :  { %v3316_v48 = vor.u32 %v4214_v45, %v3315_v44 }
 0x5db   :  { %678 = vadd.xlane.f32.xlu2 %v4874_v50 }
 0x5dc   :  { %933 = vmatpush.bf16.msra.mxu0 %v3316_v48 }
 0x5e0   :  { %934 = vmatpush.bf16.msra.mxu0 %v3300_v61 }
 0x5e4   :  { %935 = vmatpush.bf16.msra.mxu0 %v3284_v8  ;;  %v4244_v8 = vld [vmem:[#allocation7 + $0x60] sm:$0xff] }
 0x5e8   :  { %936 = vmatpush.bf16.msra.mxu0 %v3268_v26  ;;  %v4258_v26 = vld [vmem:[#allocation7 + $0xd0] sm:$0xff] }
 0x646   :  { %v677_v51 = vpop.xlane.xlu1 %676 }
 0x647   :  { %v680_v52 = vmul.f32 %v677_v51, %v4785_v20  ;;  %v3323_v51 = vld [vmem:[#allocation5 + $0x68] sm:$0xf] }
 0x649   :  { %v4879_v53 = vsub.f32 %v4870_v47, %v680_v52  ;;  %v4215_v52 = vld [vmem:[#allocation5 + $0x74] sm:$0xf0] }
 0x64b   :  { %v684_v9 = vmul.f32 %v4879_v53, %v4879_v53 }
 0x64d   :  { %686 = vadd.xlane.f32.xlu2 %v684_v9  ;;  %v3320_v9 = vor.u32 %v4212_v46, %v3317_v49 }
 0x64e   :  { %v679_v54 = vpop.xlane.xlu2 %678 }
 0x64f   :  { %v681_v55 = vmul.f32 %v679_v54, %v4785_v20  ;;  %v3324_v54 = vor.u32 %v4215_v52, %v3323_v51  ;;  %947 = vmatpush.bf16.msra.mxu1 %v3320_v9 }
 0x651   :  { %v4885_v56 = vsub.f32 %v4874_v50, %v681_v55  ;;  %v4213_v55 = vld [vmem:[#allocation5 + $0x6c] sm:$0xf]  ;;  %961 = vmatpush.bf16.msrb.mxu2 %v3324_v54  ;;  %v4429_v54 = vld [vmem:[%s5298_s13] ss:$0 sm:$0xff] }
 0x653   :  { %v685_v13 = vmul.f32 %v4885_v56, %v4885_v56  ;;  %948 = vmatpush.bf16.msra.mxu1 %v3304_v1  ;;  %v4238_v1 = vld [vmem:[#allocation7 + $0x30] sm:$0xff] }
 0x655   :  { %688 = vadd.xlane.f32.xlu2 %v685_v13  ;;  %v3325_v13 = vld [vmem:[#allocation5 + $0x78] sm:$0xf0]  ;;  %962 = vmatpush.bf16.msrb.mxu2 %v3308_v2  ;;  %v4246_v2 = vld [vmem:[#allocation7 + $0x70] sm:$0xff] }
 0x656   :  { %v3328_v57 = vor.u32 %v4213_v55, %v3325_v13 }
 0x657   :  { %949 = vmatpush.bf16.msra.mxu1 %v3288_v14  ;;  %v4252_v14 = vld [vmem:[#allocation7 + $0xa0] sm:$0xff] }
 0x658   :  { %975 = vmatpush.bf16.msra.mxu3 %v3328_v57 }
 0x659   :  { %963 = vmatpush.bf16.msrb.mxu2 %v3292_v15  ;;  %v4260_v15 = vld [vmem:[#allocation7 + $0xe0] sm:$0xff] }
 0x65b   :  { %950 = vmatpush.bf16.msra.mxu1 %v3272_v28 }
 0x65c   :  { %976 = vmatpush.bf16.msra.mxu3 %v3312_v5  ;;  %v4245_v5 = vld [vmem:[#allocation7 + $0x68] sm:$0xff] }
 0x65d   :  { %964 = vmatpush.bf16.msrb.mxu2 %v3276_v33  ;;  %v4257_v33 = vld [vmem:[#allocation7 + $0xc8] sm:$0xff] }
 0x65f   :  { %1335 = vmatpush.bf16.msrb.mxu1 %v4247_v0 }
 0x660   :  { %977 = vmatpush.bf16.msra.mxu3 %v3296_v21  ;;  %v4902_v21 = vld [vmem:[%s5301_s16] sm:$0xf] }
 0x661   :  { %v761_v28 = vperm.slane %v4902_v21, 0  ;;  %v762_v29 = vperm.slane %v4902_v21, 1 }
 0x663   :  { %1336 = vmatpush.bf16.msrb.mxu1 %v4246_v2 }
 0x664   :  { %978 = vmatpush.bf16.msra.mxu3 %v3280_v35 }
 0x667   :  { %1337 = vmatpush.bf16.msrb.mxu1 %v4245_v5 }
 0x668   :  { %1363 = vmatpush.bf16.msrb.mxu3 %v4263_v3 }
 0x66b   :  { %1338 = vmatpush.bf16.msrb.mxu1 %v4244_v8 }
 0x66c   :  { %1364 = vmatpush.bf16.msrb.mxu3 %v4262_v23 }
 0x670   :  { %1365 = vmatpush.bf16.msrb.mxu3 %v4261_v27 }
 0x674   :  { %1366 = vmatpush.bf16.msrb.mxu3 %v4260_v15 }
 0x6c0   :  { %v687_v12 = vpop.xlane.xlu2 %686 }
 0x6c1   :  { %v690_v19 = vmul.f32 %v687_v12, %v4785_v20  ;;  %v4243_v12 = vld [vmem:[#allocation7 + $0x58] sm:$0xff] }
 0x6c2   :  { %1339 = vmatpush.bf16.msrb.mxu1 %v4243_v12 }
 0x6c3   :  { %v692_v32 = vadd.f32 1e-05, %v690_v19  ;;  %v4259_v19 = vld [vmem:[#allocation7 + $0xd8] sm:$0xff] }
 0x6c4   :  { %1367 = vmatpush.bf16.msrb.mxu3 %v4259_v19 }
 0x6c5   :  { %4461 = vrsqrt.f32 %v692_v32  ;;  %vm700_vm11 = vweird.f32 %v692_v32 }
 0x6c6   :  { %1340 = vmatpush.bf16.msrb.mxu1 %v4242_v17 }
 0x6c8   :  { %v689_v36 = vpop.xlane.xlu2 %688  ;;  %1368 = vmatpush.bf16.msrb.mxu3 %v4258_v26 }
 0x6c9   :  { %v691_v37 = vmul.f32 %v689_v36, %v4785_v20 }
 0x6ca   :  { %1341 = vmatpush.bf16.msrb.mxu1 %v4241_v24 }
 0x6cb   :  { %v4462_v38 = vpop.eup %4461  ;;  %v693_v39 = vadd.f32 1e-05, %v691_v37 }
 0x6cc   :  { %v695_v40 = vmul.f32 %v4462_v38, %v692_v32  ;;  %vm701_vm10 = vweird.f32 %v4462_v38  ;;  %v4249_v32 = vld [vmem:[#allocation7 + $0x88] sm:$0xff]  ;;  %1369 = vmatpush.bf16.msrb.mxu3 %v4257_v33 }
 0x6cd   :  { %4463 = vrsqrt.f32 %v693_v39  ;;  %vm702_vm12 = vmor %vm700_vm11, %vm701_vm10  ;;  %vm710_vm14 = vweird.f32 %v693_v39 }
 0x6ce   :  { %v696_v41 = vmul.f32 %v4462_v38, %v695_v40  ;;  %1342 = vmatpush.bf16.msrb.mxu1 %v4240_v31  ;;  %v763_v40 = vperm.slane %v4902_v21, 2 }
 0x6d0   :  { %v697_v42 = vmul.f32 0.5, %v696_v41  ;;  %v764_v41 = vperm.slane %v4902_v21, 3 }
 0x6d2   :  { %v698_v43 = vsub.f32 1.5, %v697_v42  ;;  %v4248_v42 = vld [vmem:[#allocation7 + $0x80] sm:$0xff] }
 0x6d3   :  { %v4464_v44 = vpop.eup %4463 }
 0x6d4   :  { %v699_v45 = vmul.f32 %v4462_v38, %v698_v43  ;;  %v705_v46 = vmul.f32 %v4464_v44, %v693_v39  ;;  %vm711_vm13 = vweird.f32 %v4464_v44  ;;  %v4256_v43 = vld [vmem:[#allocation7 + $0xc0] sm:$0xff] }
 0x6d5   :  { %vm712_vm15 = vmor %vm710_vm14, %vm711_vm13  ;;  %1370 = vmatpush.bf16.msrb.mxu3 %v4256_v43  ;;  %vm3104_vm13 = vcmask 123904  }
 0x6d6   :  { %v706_v48 = vmul.f32 %v4464_v44, %v705_v46  ;;  %v703_v49 = vsel %vm702_vm12, %v4462_v38, %v699_v45 }
 0x6d7   :  { %v714_v9 = vmul.f32 %v703_v49, %v4879_v53  ;;  %v4239_v53 = vld [vmem:[#allocation7 + $0x38] sm:$0xff] }
 0x6d8   :  { %v707_v51 = vmul.f32 0.5, %v706_v48  ;;  %1321 = vmatpush.bf16.msrb.mxu0 %v4239_v53 }
 0x6d9   :  { %v719_v58 = vmul.f32 %v4429_v54, %v714_v9 }
 0x6da   :  { %v708_v52 = vsub.f32 1.5, %v707_v51 }
 0x6db   :  { %v724_v61 = vadd.f32 %v4430_v59, %v719_v58 }
 0x6dc   :  { %v709_v55 = vmul.f32 %v4464_v44, %v708_v52  ;;  %1322 = vmatpush.bf16.msrb.mxu0 %v4238_v1 }
 0x6de   :  { %v713_v13 = vsel %vm712_vm15, %v4464_v44, %v709_v55 }
 0x6df   :  { %v715_v57 = vmul.f32 %v713_v13, %v4885_v56  ;;  %v4255_v56 = vld [vmem:[#allocation7 + $0xb8] sm:$0xff] }
 0x6e0   :  { %1349 = vmatpush.bf16.msra.mxu2 %v4255_v56  ;;  %1323 = vmatpush.bf16.msrb.mxu0 %v4237_v4 }
 0x6e1   :  { %v720_v60 = vmul.f32 %v4429_v54, %v715_v57 }
 0x6e3   :  { %v725_v62 = vadd.f32 %v4430_v59, %v720_v60 }
 0x6e4   :  { %1350 = vmatpush.bf16.msra.mxu2 %v4254_v6  ;;  %1324 = vmatpush.bf16.msrb.mxu0 %v4236_v7 }
 0x6e5   :  { %v726_v63 = vpack.c.bf16 %v725_v62, %v724_v61 }
 0x6e7   :  { %937 = vmatmul.bf16.vlgmr.msra.gmra.mxu0 %v726_v63  ;;  %951 = vmatmul.bf16.vlgmr.msra.gmra.mxu1 %v726_v63 }
 0x6e8   :  { %965 = vmatmul.bf16.vlgmr.msrb.gmra.mxu2 %v726_v63  ;;  %979 = vmatmul.bf16.vlgmr.msra.gmra.mxu3 %v726_v63 }
 0x6e9   :  { %1351 = vmatpush.bf16.msra.mxu2 %v4253_v10  ;;  %1325 = vmatpush.bf16.msrb.mxu0 %v4235_v11 }
 0x6ed   :  { %1352 = vmatpush.bf16.msra.mxu2 %v4252_v14  ;;  %1326 = vmatpush.bf16.msrb.mxu0 %v4234_v16 }
 0x6f1   :  { %1353 = vmatpush.bf16.msra.mxu2 %v4251_v18  ;;  %1327 = vmatpush.bf16.msrb.mxu0 %v4233_v22 }
 0x6f5   :  { %1354 = vmatpush.bf16.msra.mxu2 %v4250_v25  ;;  %1328 = vmatpush.bf16.msrb.mxu0 %v4232_v30 }
 0x6f9   :  { %1355 = vmatpush.bf16.msra.mxu2 %v4249_v32 }
 0x6fd   :  { %1356 = vmatpush.bf16.msra.mxu2 %v4248_v42 }
 0x764   :  { %v938_v34 = vpop.f32.mrf.mxu0  ;;  %v952_v35 = vpop.f32.mrf.mxu1 }
 0x765   :  { %v4906_v36 = vadd.f32 %v938_v34, %v761_v28  ;;  %v4908_v37 = vadd.f32 %v952_v35, %v762_v29 }
 0x767   :  { %v993_v38 = vmul.f32 0.044715, %v4906_v36  ;;  %v994_v39 = vmul.f32 0.044715, %v4908_v37 }
 0x769   :  { %v1001_v44 = vmul.f32 %v993_v38, %v4906_v36  ;;  %v1002_v45 = vmul.f32 %v994_v39, %v4908_v37 }
 0x76b   :  { %v1009_v46 = vmul.f32 %v1001_v44, %v4906_v36  ;;  %v1010_v48 = vmul.f32 %v1002_v45, %v4908_v37  ;;  %v966_v49 = vpop.f32.mrf.mxu2  ;;  %v980_v51 = vpop.f32.mrf.mxu3  ;;  %v986_v44 = vmul.f32 0.5, %v4908_v37 }
 0x76c   :  { %v4918_v52 = vadd.f32 %v966_v49, %v763_v40  ;;  %v4920_v9 = vadd.f32 %v980_v51, %v764_v41  ;;  %v940_v54 = vpop.f32.mrf.mxu0  ;;  %v954_v55 = vpop.f32.mrf.mxu1 }
 0x76d   :  { %v1017_v13 = vadd.f32 %v1009_v46, %v4906_v36  ;;  %v941_v57 = vadd.f32 %v940_v54, %v761_v28  ;;  %v955_v58 = vadd.f32 %v954_v55, %v762_v29  ;;  %v1018_v59 = vadd.f32 %v1010_v48, %v4908_v37 }
 0x76e   :  { %v995_v60 = vmul.f32 0.044715, %v4918_v52  ;;  %v996_v61 = vmul.f32 0.044715, %v4920_v9 }
 0x76f   :  { %v997_v62 = vmul.f32 0.044715, %v941_v57  ;;  %v998_v0 = vmul.f32 0.044715, %v955_v58  ;;  %v1025_v1 = vmul.f32 0.7978846, %v1017_v13 }
 0x770   :  { %v1003_v63 = vmul.f32 %v995_v60, %v4918_v52  ;;  %v1004_v53 = vmul.f32 %v996_v61, %v4920_v9  ;;  %v1026_v56 = vmul.f32 0.7978846, %v1018_v59  ;;  %v989_v42 = vmul.f32 0.5, %v941_v57 }
 0x771   :  { %v1005_v2 = vmul.f32 %v997_v62, %v941_v57  ;;  %v1006_v5 = vmul.f32 %v998_v0, %v955_v58  ;;  %4465 = vtanh.f32 %v1025_v1  ;;  %v990_v45 = vmul.f32 0.5, %v955_v58 }
 0x772   :  { %v1011_v3 = vmul.f32 %v1003_v63, %v4918_v52  ;;  %v1012_v4 = vmul.f32 %v1004_v53, %v4920_v9  ;;  %4467 = vtanh.f32 %v1026_v56  ;;  %v987_v63 = vmul.f32 0.5, %v4918_v52 }
 0x773   :  { %v1013_v6 = vmul.f32 %v1005_v2, %v941_v57  ;;  %v968_v23 = vpop.f32.mrf.mxu2  ;;  %v982_v7 = vpop.f32.mrf.mxu3  ;;  %v1014_v10 = vmul.f32 %v1006_v5, %v955_v58  ;;  %v988_v53 = vmul.f32 0.5, %v4920_v9 }
 0x774   :  { %v1019_v8 = vadd.f32 %v1011_v3, %v4918_v52  ;;  %v969_v27 = vadd.f32 %v968_v23, %v763_v40  ;;  %v1020_v11 = vadd.f32 %v1012_v4, %v4920_v9  ;;  %v983_v14 = vadd.f32 %v982_v7, %v764_v41  ;;  %v4431_v7 = vld [vmem:[%s5303_s18] ss:$0 sm:$0xff] }
 0x775   :  { %v1021_v12 = vadd.f32 %v1013_v6, %v941_v57  ;;  %v1022_v15 = vadd.f32 %v1014_v10, %v955_v58  ;;  %v985_v41 = vmul.f32 0.5, %v4906_v36 }
 0x776   :  { %v999_v16 = vmul.f32 0.044715, %v969_v27  ;;  %v1000_v18 = vmul.f32 0.044715, %v983_v14  ;;  %v1027_v19 = vmul.f32 0.7978846, %v1019_v8 }
 0x777   :  { %v1029_v17 = vmul.f32 0.7978846, %v1021_v12  ;;  %v1030_v21 = vmul.f32 0.7978846, %v1022_v15  ;;  %v1028_v24 = vmul.f32 0.7978846, %v1020_v11  ;;  %v4466_v28 = vpop.eup %4465 }
 0x778   :  { %v1007_v22 = vmul.f32 %v999_v16, %v969_v27  ;;  %v1008_v25 = vmul.f32 %v1000_v18, %v983_v14  ;;  %v4468_v30 = vpop.eup %4467  ;;  %v1041_v34 = vadd.f32 1.0, %v4466_v28  ;;  %v991_v37 = vmul.f32 0.5, %v969_v27 }
 0x779   :  { %4469 = vtanh.f32 %v1029_v17  ;;  %v1042_v39 = vadd.f32 1.0, %v4468_v30  ;;  %v992_v0 = vmul.f32 0.5, %v983_v14 }
 0x77a   :  { %v1015_v26 = vmul.f32 %v1007_v22, %v969_v27  ;;  %4471 = vtanh.f32 %v1030_v21  ;;  %v1016_v29 = vmul.f32 %v1008_v25, %v983_v14  ;;  %v1049_v49 = vmul.f32 %v1041_v34, %v985_v41  ;;  %v4286_v34 = vld [vmem:[#allocation2 + $0x170] sm:$0xf0]  ;;  %v4287_v41 = vld [vmem:[#allocation2 + $0x178] sm:$0xf0] }
 0x77b   :  { %4473 = vtanh.f32 %v1027_v19  ;;  %v1050_v55 = vmul.f32 %v1042_v39, %v986_v44  ;;  %v3612_v39 = vld [vmem:[#allocation2 + $0x174] sm:$0xf0]  ;;  %v3598_v44 = vld [vmem:[#allocation2 + $0x150] sm:$0xf] }
 0x77c   :  { %v1023_v31 = vadd.f32 %v1015_v26, %v969_v27  ;;  %v1024_v32 = vadd.f32 %v1016_v29, %v983_v14  ;;  %4475 = vtanh.f32 %v1028_v24 }
 0x77e   :  { %v1031_v33 = vmul.f32 0.7978846, %v1023_v31  ;;  %v1032_v38 = vmul.f32 0.7978846, %v1024_v32 }
 0x77f   :  { %v4470_v35 = vpop.eup %4469 }
 0x780   :  { %v4472_v40 = vpop.eup %4471  ;;  %v1045_v43 = vadd.f32 1.0, %v4470_v35  ;;  %4477 = vtanh.f32 %v1031_v33  ;;  %v3610_v33 = vld [vmem:[#allocation2 + $0x168] sm:$0xf]  ;;  %v4285_v35 = vld [vmem:[#allocation2 + $0x16c] sm:$0xf] }
 0x781   :  { %v1046_v46 = vadd.f32 1.0, %v4472_v40  ;;  %4479 = vtanh.f32 %v1032_v38  ;;  %v4474_v48 = vpop.eup %4473  ;;  %v3611_v38 = vor.u32 %v4286_v34, %v3610_v33  ;;  %v3618_v40 = vld [vmem:[#allocation2 + $0x170] sm:$0xf]  ;;  %v3540_v33 = vld [vmem:[#allocation2 + $0xe4] sm:$0xf0] }
 0x782   :  { %v1053_v51 = vmul.f32 %v1045_v43, %v989_v42  ;;  %v4476_v54 = vpop.eup %4475  ;;  %v1043_v61 = vadd.f32 1.0, %v4474_v48  ;;  %v3615_v42 = vor.u32 %v4285_v35, %v3612_v39  ;;  %v3619_v43 = vor.u32 %v4287_v41, %v3618_v40  ;;  %v3546_v34 = vld [vmem:[#allocation2 + $0xe0] sm:$0xf]  ;;  %v4269_v35 = vld [vmem:[#allocation2 + $0xe8] sm:$0xf0] }
 0x783   :  { %v1054_v13 = vmul.f32 %v1046_v46, %v990_v45  ;;  %v1044_v36 = vadd.f32 1.0, %v4476_v54  ;;  %1604 = vmatpush.bf16.msra.mxu0 %v3611_v38  ;;  %v4283_v45 = vld [vmem:[#allocation2 + $0x158] sm:$0xf0]  ;;  %v4282_v46 = vld [vmem:[#allocation2 + $0x154] sm:$0xf]  ;;  %v3547_v40 = vor.u32 %v4269_v35, %v3546_v34 }
 0x784   :  { %v1057_v59 = vpack.c.bf16 %v1053_v51, %v1049_v49  ;;  %v1051_v2 = vmul.f32 %v1043_v61, %v987_v63  ;;  %1618 = vmatpush.bf16.msra.mxu1 %v3615_v42  ;;  %1632 = vmatpush.bf16.msrb.mxu2 %v3619_v43  ;;  %v3599_v48 = vor.u32 %v4283_v45, %v3598_v44  ;;  %v3600_v49 = vld [vmem:[#allocation2 + $0x15c] sm:$0xf0]  ;;  %v3606_v51 = vld [vmem:[#allocation2 + $0x158] sm:$0xf]  ;;  %v4284_v54 = vld [vmem:[#allocation2 + $0x160] sm:$0xf0] }
 0x785   :  { %v1058_v60 = vpack.c.bf16 %v1054_v13, %v1050_v55  ;;  %v1052_v3 = vmul.f32 %v1044_v36, %v988_v53  ;;  %v3603_v55 = vor.u32 %v4282_v46, %v3600_v49  ;;  %v3607_v13 = vor.u32 %v4284_v54, %v3606_v51  ;;  %v4279_v61 = vld [vmem:[#allocation2 + $0x13c] sm:$0xf]  ;;  %v3588_v36 = vld [vmem:[#allocation2 + $0x144] sm:$0xf0]  ;;  %v4281_v63 = vld [vmem:[#allocation2 + $0x148] sm:$0xf0] }
 0x786   :  { %v4478_v62 = vpop.eup %4477  ;;  %1329 = vmatmul.bf16.vlgmr.msrb.gmra.mxu0 %v1057_v59  ;;  %v3586_v59 = vld [vmem:[#allocation2 + $0x138] sm:$0xf]  ;;  %v3574_v53 = vld [vmem:[#allocation2 + $0x120] sm:$0xf]  ;;  %v4265_v42 = vld [vmem:[#allocation2 + $0xc8] sm:$0xf0] }
 0x787   :  { %v4480_v57 = vpop.eup %4479  ;;  %1343 = vmatmul.bf16.vlgmr.msrb.gmra.mxu1 %v1058_v60  ;;  %v1047_v58 = vadd.f32 1.0, %v4478_v62  ;;  %1605 = vmatpush.bf16.msra.mxu0 %v3599_v48  ;;  %v4280_v60 = vld [vmem:[#allocation2 + $0x140] sm:$0xf0]  ;;  %v3526_v41 = vld [vmem:[#allocation2 + $0xc0] sm:$0xf] }
 0x788   :  { %v1048_v1 = vadd.f32 1.0, %v4480_v57  ;;  %1619 = vmatpush.bf16.msra.mxu1 %v3603_v55  ;;  %1633 = vmatpush.bf16.msrb.mxu2 %v3607_v13  ;;  %v3587_v62 = vor.u32 %v4280_v60, %v3586_v59  ;;  %v3594_v57 = vld [vmem:[#allocation2 + $0x140] sm:$0xf]  ;;  %v4264_v43 = vld [vmem:[#allocation2 + $0xc4] sm:$0xf]  ;;  %v3527_v49 = vor.u32 %v4265_v42, %v3526_v41  ;;  %v4521_v42 = vld [vmem:[%s5321_s5 + $0x8] sm:$0xff] }
 0x789   :  { %v1055_v56 = vmul.f32 %v1047_v58, %v991_v37  ;;  %v3591_v37 = vor.u32 %v4279_v61, %v3588_v36  ;;  %v3595_v58 = vor.u32 %v4281_v63, %v3594_v57  ;;  %v3528_v44 = vld [vmem:[#allocation2 + $0xcc] sm:$0xf0]  ;;  %v3534_v45 = vld [vmem:[#allocation2 + $0xc8] sm:$0xf]  ;;  %v4266_v46 = vld [vmem:[#allocation2 + $0xd0] sm:$0xf0] }
 0x78a   :  { %v1056_v4 = vmul.f32 %v1048_v1, %v992_v0  ;;  %v4277_v0 = vld [vmem:[#allocation2 + $0x128] sm:$0xf0]  ;;  %v4276_v1 = vld [vmem:[#allocation2 + $0x124] sm:$0xf]  ;;  %v3531_v51 = vor.u32 %v4264_v43, %v3528_v44  ;;  %v3535_v54 = vor.u32 %v4266_v46, %v3534_v45 }
 0x78b   :  { %v1059_v5 = vpack.c.bf16 %v1055_v56, %v1051_v2  ;;  %1606 = vmatpush.bf16.msra.mxu0 %v3587_v62  ;;  %v3575_v2 = vor.u32 %v4277_v0, %v3574_v53  ;;  %v3576_v56 = vld [vmem:[#allocation2 + $0x12c] sm:$0xf0] }
 0x78c   :  { %v1060_v6 = vpack.c.bf16 %v1056_v4, %v1052_v3  ;;  %1620 = vmatpush.bf16.msra.mxu1 %v3591_v37  ;;  %1634 = vmatpush.bf16.msrb.mxu2 %v3595_v58  ;;  %v3582_v3 = vld [vmem:[#allocation2 + $0x128] sm:$0xf]  ;;  %v4278_v4 = vld [vmem:[#allocation2 + $0x130] sm:$0xf0] }
 0x78d   :  { %1357 = vmatmul.bf16.vlgmr.msra.gmra.mxu2 %v1059_v5  ;;  %v3579_v5 = vor.u32 %v4276_v1, %v3576_v56 }
 0x78e   :  { %1371 = vmatmul.bf16.vlgmr.msrb.gmra.mxu3 %v1060_v6  ;;  %v3583_v6 = vor.u32 %v4278_v4, %v3582_v3  ;;  %v4432_v3 = vld [vmem:[%s5292_s7 + $0x1] ss:$0 sm:$0xff] }
 0x78f   :  { %1607 = vmatpush.bf16.msra.mxu0 %v3575_v2 }
 0x790   :  { %1621 = vmatpush.bf16.msra.mxu1 %v3579_v5  ;;  %1635 = vmatpush.bf16.msrb.mxu2 %v3583_v6 }
 0x803   :  { %v1330_v23 = vpop.f32.mrf.mxu0 }
 0x804   :  { %v1331_v52 = vadd.f32 %v4431_v7, %v1330_v23  ;;  %v1344_v8 = vpop.f32.mrf.mxu1  ;;  %v3562_v23 = vld [vmem:[#allocation2 + $0x108] sm:$0xf] }
 0x806   :  { %v1345_v10 = vadd.f32 %v1344_v8, %v1331_v52  ;;  %v4273_v52 = vld [vmem:[#allocation2 + $0x10c] sm:$0xf] }
 0x80b   :  { %v1332_v27 = vpop.f32.mrf.mxu0 }
 0x80c   :  { %v1333_v14 = vadd.f32 %v4431_v7, %v1332_v27  ;;  %v1346_v17 = vpop.f32.mrf.mxu1  ;;  %v4274_v7 = vld [vmem:[#allocation2 + $0x110] sm:$0xf0]  ;;  %v3570_v27 = vld [vmem:[#allocation2 + $0x110] sm:$0xf] }
 0x80d   :  { %v3563_v8 = vor.u32 %v4274_v7, %v3562_v23  ;;  %v4433_v7 = vld [vmem:[%s5293_s8 + $0x1] ss:$0 sm:$0xff] }
 0x80e   :  { %v1347_v18 = vadd.f32 %v1346_v17, %v1333_v14  ;;  %v3550_v14 = vld [vmem:[#allocation2 + $0xf0] sm:$0xf]  ;;  %v4270_v17 = vld [vmem:[#allocation2 + $0xf4] sm:$0xf] }
 0x80f   :  { %1608 = vmatpush.bf16.msra.mxu0 %v3563_v8 }
 0x810   :  { %v1358_v9 = vpop.f32.mrf.mxu2 }
 0x811   :  { %v1359_v11 = vadd.f32 %v1358_v9, %v1345_v10  ;;  %v1372_v12 = vpop.f32.mrf.mxu3  ;;  %v3564_v10 = vld [vmem:[#allocation2 + $0x114] sm:$0xf0]  ;;  %v4275_v9 = vld [vmem:[#allocation2 + $0x118] sm:$0xf0] }
 0x813   :  { %v1373_v15 = vadd.f32 %v1372_v12, %v1359_v11  ;;  %v3567_v11 = vor.u32 %v4273_v52, %v3564_v10  ;;  %v3571_v12 = vor.u32 %v4275_v9, %v3570_v27 }
 0x815   :  { %v4940_v16 = vadd.f32 %v1373_v15, %v4870_v47  ;;  %1622 = vmatpush.bf16.msra.mxu1 %v3567_v11  ;;  %1636 = vmatpush.bf16.msrb.mxu2 %v3571_v12  ;;  %v4271_v15 = vld [vmem:[#allocation2 + $0xf8] sm:$0xf0]  ;;  %v3523_v11 = vld [vmem:[%s5295_s10 + $0x3] sm:$0x7]  ;;  %s5323_s10 = sld [smem:[#allocation16_spill]] }
 0x816   :  { %v1470_v12 = vperm.slane %v3523_v11, 0 }
 0x817   :  { %1383 = vadd.xlane.f32.xlu0 %v4940_v16 }
 0x818   :  { %v1360_v19 = vpop.f32.mrf.mxu2 }
 0x819   :  { %v1361_v21 = vadd.f32 %v1360_v19, %v1347_v18  ;;  %v1374_v22 = vpop.f32.mrf.mxu3  ;;  %v3551_v18 = vor.u32 %v4271_v15, %v3550_v14  ;;  %v3552_v19 = vld [vmem:[#allocation2 + $0xfc] sm:$0xf0] }
 0x81b   :  { %v1375_v24 = vadd.f32 %v1374_v22, %v1361_v21  ;;  %v3558_v21 = vld [vmem:[#allocation2 + $0xf8] sm:$0xf]  ;;  %v4272_v22 = vld [vmem:[#allocation2 + $0x100] sm:$0xf0]  ;;  %1609 = vmatpush.bf16.msra.mxu0 %v3551_v18 }
 0x81d   :  { %v4944_v25 = vadd.f32 %v1375_v24, %v4874_v50  ;;  %v3555_v24 = vor.u32 %v4270_v17, %v3552_v19 }
 0x81f   :  { %1385 = vadd.xlane.f32.xlu2 %v4944_v25  ;;  %1623 = vmatpush.bf16.msra.mxu1 %v3555_v24 }
 0x88a   :  { %v1384_v26 = vpop.xlane.xlu0 %1383 }
 0x88b   :  { %v1387_v28 = vmul.f32 %v1384_v26, %v4785_v20  ;;  %v3559_v26 = vor.u32 %v4272_v22, %v3558_v21 }
 0x88d   :  { %v4949_v29 = vsub.f32 %v4940_v16, %v1387_v28  ;;  %v3538_v28 = vld [vmem:[#allocation2 + $0xd8] sm:$0xf]  ;;  %1637 = vmatpush.bf16.msrb.mxu2 %v3559_v26 }
 0x88f   :  { %v1391_v47 = vmul.f32 %v4949_v29, %v4949_v29 }
 0x891   :  { %1393 = vadd.xlane.f32.xlu2 %v1391_v47  ;;  %v4268_v47 = vld [vmem:[#allocation2 + $0xe0] sm:$0xf0]  ;;  %1638 = vmatpush.bf16.msrb.mxu2 %v3547_v40 }
 0x892   :  { %v1386_v30 = vpop.xlane.xlu2 %1385 }
 0x893   :  { %v1388_v31 = vmul.f32 %v1386_v30, %v4785_v20  ;;  %v4267_v30 = vld [vmem:[#allocation2 + $0xdc] sm:$0xf] }
 0x894   :  { %v3543_v39 = vor.u32 %v4267_v30, %v3540_v33 }
 0x895   :  { %v4955_v32 = vsub.f32 %v4944_v25, %v1388_v31  ;;  %1639 = vmatpush.bf16.msrb.mxu2 %v3535_v54 }
 0x896   :  { %1624 = vmatpush.bf16.msra.mxu1 %v3543_v39 }
 0x897   :  { %v1392_v50 = vmul.f32 %v4955_v32, %v4955_v32 }
 0x899   :  { %1395 = vadd.xlane.f32.xlu2 %v1392_v50  ;;  %v3539_v50 = vor.u32 %v4268_v47, %v3538_v28  ;;  %v1472_v28 = vperm.slane %v3523_v11, 2 }
 0x89a   :  { %1625 = vmatpush.bf16.msra.mxu1 %v3531_v51 }
 0x89b   :  { %1610 = vmatpush.bf16.msra.mxu0 %v3539_v50 }
 0x89f   :  { %1611 = vmatpush.bf16.msra.mxu0 %v3527_v49 }
 0x904   :  { %v1394_v31 = vpop.xlane.xlu2 %1393 }
 0x905   :  { %v1397_v38 = vmul.f32 %v1394_v31, %v4785_v20 }
 0x907   :  { %v1399_v48 = vadd.f32 1e-05, %v1397_v38 }
 0x909   :  { %4481 = vrsqrt.f32 %v1399_v48  ;;  %vm1407_vm1 = vweird.f32 %v1399_v48 }
 0x90c   :  { %v1396_v55 = vpop.xlane.xlu2 %1395 }
 0x90d   :  { %v1398_v13 = vmul.f32 %v1396_v55, %v4785_v20 }
 0x90f   :  { %v4482_v59 = vpop.eup %4481  ;;  %v1400_v60 = vadd.f32 1e-05, %v1398_v13 }
 0x910   :  { %v1402_v61 = vmul.f32 %v4482_v59, %v1399_v48  ;;  %vm1408_vm0 = vweird.f32 %v4482_v59  ;;  %v4522_v48 = vld [vmem:[%s5321_s5] sm:$0xff] }
 0x911   :  { %4483 = vrsqrt.f32 %v1400_v60  ;;  %vm1409_vm2 = vmor %vm1407_vm1, %vm1408_vm0  ;;  %vm1417_vm4 = vweird.f32 %v1400_v60 }
 0x912   :  { %v1403_v62 = vmul.f32 %v4482_v59, %v1402_v61 }
 0x914   :  { %v1404_v36 = vmul.f32 0.5, %v1403_v62 }
 0x916   :  { %v1405_v57 = vsub.f32 1.5, %v1404_v36 }
 0x917   :  { %v4484_v63 = vpop.eup %4483 }
 0x918   :  { %v1406_v37 = vmul.f32 %v4482_v59, %v1405_v57  ;;  %v1412_v58 = vmul.f32 %v4484_v63, %v1400_v60  ;;  %vm1418_vm3 = vweird.f32 %v4484_v63 }
 0x919   :  { %vm1419_vm5 = vmor %vm1417_vm4, %vm1418_vm3 }
 0x91a   :  { %v1413_v53 = vmul.f32 %v4484_v63, %v1412_v58  ;;  %v1410_v0 = vsel %vm1409_vm2, %v4482_v59, %v1406_v37 }
 0x91b   :  { %v1421_v56 = vmul.f32 %v1410_v0, %v4949_v29 }
 0x91c   :  { %v1414_v1 = vmul.f32 0.5, %v1413_v53 }
 0x91d   :  { %v1426_v23 = vmul.f32 %v4432_v3, %v1421_v56 }
 0x91e   :  { %v1415_v2 = vsub.f32 1.5, %v1414_v1 }
 0x91f   :  { %v1431_v8 = vadd.f32 %v4433_v7, %v1426_v23 }
 0x920   :  { %v1416_v4 = vmul.f32 %v4484_v63, %v1415_v2 }
 0x922   :  { %v1420_v5 = vsel %vm1419_vm5, %v4484_v63, %v1416_v4 }
 0x923   :  { %v1422_v6 = vmul.f32 %v1420_v5, %v4955_v32  ;;  %v1471_v32 = vperm.slane %v3523_v11, 1 }
 0x925   :  { %v1427_v52 = vmul.f32 %v4432_v3, %v1422_v6 }
 0x927   :  { %v1432_v10 = vadd.f32 %v4433_v7, %v1427_v52 }
 0x929   :  { %v1433_v27 = vpack.c.bf16 %v1432_v10, %v1431_v8 }
 0x92b   :  { %1612 = vmatmul.bf16.vlgmr.msra.gmra.mxu0 %v1433_v27  ;;  %1626 = vmatmul.bf16.vlgmr.msra.gmra.mxu1 %v1433_v27 }
 0x92c   :  { %1640 = vmatmul.bf16.vlgmr.msrb.gmra.mxu2 %v1433_v27 }
 0x9a8   :  { %v1613_v29 = vpop.f32.mrf.mxu0  ;;  %v1627_v9 = vpop.f32.mrf.mxu1 }
 0x9a9   :  { %v1614_v18 = vadd.f32 %v1613_v29, %v1470_v12  ;;  %v1628_v19 = vadd.f32 %v1627_v9, %v1471_v32 }
 0x9af   :  { %v1641_v14 = vpop.f32.mrf.mxu2 }
 0x9b0   :  { %v1615_v15 = vpop.f32.mrf.mxu0  ;;  %v1629_v17 = vpop.f32.mrf.mxu1  ;;  %v1642_v31 = vadd.f32 %v1641_v14, %v1472_v28 }
 0x9b1   :  { %v1616_v21 = vadd.f32 %v1615_v15, %v1470_v12  ;;  %v1630_v22 = vadd.f32 %v1629_v17, %v1471_v32 }
 0x9b3   :  { %v1647_v24 = vpack.c.bf16 %v1630_v22, %v1628_v19  ;;  %v1646_v26 = vpack.c.bf16 %v1616_v21, %v1614_v18 }
 0x9b5   :  { %1717 = vrot.lane.b32.xlu1 %v1647_v24, %s4632_s28  ;;  %1714 = vrot.lane.b32.xlu2 %v1646_v26, %s4632_s28  ;;  %v1653_v47 = vsel %vm437_vm8, %v1647_v24, 0 }
 0x9b6   :  { %1662 = vmatpush.bf16.xpose.msra.mxu3 %v1653_v47 }
 0x9b7   :  { %v1643_v30 = vpop.f32.mrf.mxu2 }
 0x9b8   :  { %v1644_v50 = vadd.f32 %v1643_v30, %v1472_v28 }
 0x9ba   :  { %v1648_v33 = vpack.c.bf16 %v1644_v50, %v1642_v31  ;;  %v4295_v50 = vld [vmem:[%s5296_s11 + $0x78] sm:$0xff] }
 0x9bc   :  { %1706 = vmatpush.bf16.msrb.mxu0 %v1648_v33 }
 0x9bd   :  { %3620 = vmatmul.msk.bf16.vlgmr.msra.gmra.mxu3 %vm437_vm8, %v1646_v26 }
 0x9be   :  { %1863 = vmatpush.bf16.msrb.mxu3 %v4295_v50 }
 0xa0f   :  { %v1715_v38 = vpop.permute.xlu2 %1714 }
 0xa27   :  { %v1718_v34 = vpop.permute.xlu1 %1717 }
 0xa28   :  { %v1723_v35 = vsel %vm437_vm8, %v1718_v34, 0  ;;  %v4293_v34 = vld [vmem:[%s5296_s11 + $0x68] sm:$0xff] }
 0xa29   :  { %1732 = vmatpush.bf16.xpose.msrb.mxu1 %v1723_v35  ;;  %v4292_v35 = vld [vmem:[%s5296_s11 + $0x60] sm:$0xff] }
 0xa30   :  { %3622 = vmatmul.msk.bf16.vlgmr.msrb.gmra.mxu1 %vm437_vm8, %v1715_v38  ;;  %v4291_v38 = vld [vmem:[%s5296_s11 + $0x58] sm:$0xff] }
 0xa40   :  { %v1664_v39 = vpop.f32.mrf.mxu3 }
 0xa41   :  { %v1669_v51 = vmul.f32 0.125, %v1664_v39  ;;  %v4290_v39 = vld [vmem:[%s5296_s11 + $0x50] sm:$0xff] }
 0xa43   :  { %v1671_v59 = vadd.f32 %v4522_v48, %v1669_v51 }
 0xa45   :  { %v1673_v62 = vsel %vm462_vm9, %v1671_v59, -inf }
 0xa48   :  { %v1666_v40 = vpop.f32.mrf.mxu3 }
 0xa49   :  { %v1670_v41 = vmul.f32 0.125, %v1666_v40  ;;  %v4289_v40 = vld [vmem:[%s5296_s11 + $0x48] sm:$0xff] }
 0xa4b   :  { %v1672_v43 = vadd.f32 %v4521_v42, %v1670_v41  ;;  %v4288_v41 = vld [vmem:[%s5296_s11 + $0x40] sm:$0xff] }
 0xa4d   :  { %v1676_v44 = vsel %vm462_vm9, %v1672_v43, -inf }
 0xa4e   :  { %1677 = vmax.xlane.f32.xlu2 %v1676_v44 }
 0xaad   :  { %v1734_v45 = vpop.f32.mrf.mxu1 }
 0xaae   :  { %v1739_v46 = vmul.f32 0.125, %v1734_v45 }
 0xab0   :  { %v1741_v49 = vadd.f32 %v4522_v48, %v1739_v46 }
 0xab2   :  { %v1743_v54 = vsel %vm462_vm9, %v1741_v49, -inf }
 0xab3   :  { %1744 = vmax.xlane.f32.xlu0 %v1743_v54  ;;  %v4434_v54 = vld [vmem:[%s5297_s12 + $0x1] ss:$0 sm:$0xff] }
 0xab5   :  { %v1736_v55 = vpop.f32.mrf.mxu1 }
 0xab6   :  { %v1740_v13 = vmul.f32 0.125, %v1736_v55 }
 0xab8   :  { %v1742_v60 = vadd.f32 %v4521_v42, %v1740_v13 }
 0xaba   :  { %v1746_v61 = vsel %vm462_vm9, %v1742_v60, -inf }
 0xabb   :  { %1747 = vmax.xlane.f32.xlu1 %v1746_v61  ;;  %1674 = vmax.xlane.f32.xlu0 %v1673_v62 }
 0xac1   :  { %v1678_v7 = vpop.xlane.xlu2 %1677 }
 0xac2   :  { %v1680_v52 = vsub.f32 %v1672_v43, %v1678_v7  ;;  %v4325_v7 = vld [vmem:[#allocation5 + $0x1ec] sm:$0xf] }
 0xac4   :  { %v1683_v8 = vmul.f32 1.442695, %v1680_v52  ;;  %v3800_v52 = vld [vmem:[#allocation5 + $0x1f8] sm:$0xf0] }
 0xb26   :  { %v1745_v36 = vpop.xlane.xlu0 %1744 }
 0xb27   :  { %v1749_v57 = vsub.f32 %v1741_v49, %v1745_v36 }
 0xb29   :  { %v1751_v63 = vmul.f32 1.442695, %v1749_v57 }
 0xb2b   :  { %4485 = vpow2.f32 %v1751_v63 }
 0xb2e   :  { %v1748_v37 = vpop.xlane.xlu1 %1747  ;;  %v1675_v58 = vpop.xlane.xlu0 %1674 }
 0xb2f   :  { %v1750_v53 = vsub.f32 %v1742_v60, %v1748_v37  ;;  %v1679_v0 = vsub.f32 %v1671_v59, %v1675_v58 }
 0xb31   :  { %v4486_v1 = vpop.eup %4485  ;;  %v1753_v2 = vmul.f32 1.442695, %v1750_v53  ;;  %v1681_v56 = vmul.f32 1.442695, %v1679_v0  ;;  %v3790_v0 = vld [vmem:[#allocation5 + $0x1e0] sm:$0xf] }
 0xb32   :  { %v1755_v3 = vsel %vm462_vm9, %v4486_v1, 0.0 }
 0xb33   :  { %4487 = vpow2.f32 %v1753_v2  ;;  %1756 = vadd.xlane.f32.xlu0 %v1755_v3  ;;  %v4324_v2 = vld [vmem:[#allocation5 + $0x1e4] sm:$0xf]  ;;  %v3792_v3 = vld [vmem:[#allocation5 + $0x1f0] sm:$0xf0] }
 0xb34   :  { %4489 = vpow2.f32 %v1681_v56 }
 0xb35   :  { %4491 = vpow2.f32 %v1683_v8  ;;  %v3803_v8 = vor.u32 %v4325_v7, %v3800_v52  ;;  %v4305_v52 = vld [vmem:[#allocation5 + $0x14c] sm:$0xf] }
 0xb39   :  { %v4488_v4 = vpop.eup %4487 }
 0xb3a   :  { %v4490_v5 = vpop.eup %4489  ;;  %v1758_v6 = vsel %vm462_vm9, %v4488_v4, 0.0 }
 0xb3b   :  { %1759 = vadd.xlane.f32.xlu0 %v1758_v6  ;;  %v1685_v23 = vsel %vm462_vm9, %v4490_v5, 0.0  ;;  %v4492_v10 = vpop.eup %4491  ;;  %v3795_v6 = vor.u32 %v4324_v2, %v3792_v3  ;;  %v4306_v2 = vld [vmem:[#allocation5 + $0x14c] sm:$0xf0] }
 0xb3c   :  { %1686 = vadd.xlane.f32.xlu1 %v1685_v23  ;;  %v1688_v27 = vsel %vm462_vm9, %v4492_v10, 0.0 }
 0xb3d   :  { %2159 = vmatpush.bf16.msra.mxu1 %v3795_v6  ;;  %v4307_v6 = vld [vmem:[#allocation5 + $0x154] sm:$0xf0] }
 0xb4f   :  { %1767 = vrot.lane.b32.xlu0 %v1648_v33, %s4632_s28  ;;  %v4294_v33 = vld [vmem:[%s5296_s11 + $0x70] sm:$0xff] }
 0xb50   :  { %1864 = vmatpush.bf16.msrb.mxu3 %v4294_v33  ;;  %v4317_v33 = vld [vmem:[#allocation5 + $0x1ac] sm:$0xf] }
 0xb54   :  { %1865 = vmatpush.bf16.msrb.mxu3 %v4293_v34  ;;  %v3768_v34 = vld [vmem:[#allocation5 + $0x1b8] sm:$0xf0] }
 0xb58   :  { %1866 = vmatpush.bf16.msrb.mxu3 %v4292_v35  ;;  %v3771_v35 = vor.u32 %v4317_v33, %v3768_v34  ;;  %v3686_v33 = vld [vmem:[#allocation5 + $0x108] sm:$0xf]  ;;  %v4299_v34 = vld [vmem:[#allocation5 + $0x114] sm:$0xf0] }
 0xb5c   :  { %1867 = vmatpush.bf16.msrb.mxu3 %v4291_v38  ;;  %v3742_v38 = vld [vmem:[#allocation5 + $0x180] sm:$0xf] }
 0xb60   :  { %1868 = vmatpush.bf16.msrb.mxu3 %v4290_v39  ;;  %v4314_v39 = vld [vmem:[#allocation5 + $0x18c] sm:$0xf0] }
 0xb64   :  { %1869 = vmatpush.bf16.msrb.mxu3 %v4289_v40  ;;  %v4312_v40 = vld [vmem:[#allocation5 + $0x184] sm:$0xf] }
 0xb68   :  { %1870 = vmatpush.bf16.msrb.mxu3 %v4288_v41  ;;  %v3743_v41 = vor.u32 %v4314_v39, %v3742_v38  ;;  %v3687_v38 = vor.u32 %v4299_v34, %v3686_v33  ;;  %v4297_v39 = vld [vmem:[#allocation5 + $0x10c] sm:$0xf]  ;;  %v4328_v33 = vld [vmem:[#allocation7 + $0x100] sm:$0xff] }
 0xb69   :  { %v4336_v34 = vld [vmem:[#allocation7 + $0x140] sm:$0xff] }
 0xb6c   :  { %2187 = vmatpush.bf16.msra.mxu3 %v3803_v8  ;;  %v3720_v8 = vld [vmem:[#allocation5 + $0x158] sm:$0xf0] }
 0xb79   :  { %1689 = vadd.xlane.f32.xlu0 %v1688_v27  ;;  %v4322_v27 = vld [vmem:[#allocation5 + $0x1cc] sm:$0xf0] }
 0xba6   :  { %v1757_v29 = vpop.xlane.xlu0 %1756 }
 0xbae   :  { %v1760_v9 = vpop.xlane.xlu0 %1759 }
 0xbaf   :  { %4493 = vrcp.f32 %v1760_v9  ;;  %v1687_v18 = vpop.xlane.xlu1 %1686 }
 0xbb0   :  { %4495 = vrcp.f32 %v1757_v29  ;;  %v4320_v29 = vld [vmem:[#allocation5 + $0x1c4] sm:$0xf] }
 0xbb1   :  { %4497 = vrcp.f32 %v1687_v18  ;;  %v3784_v18 = vld [vmem:[#allocation5 + $0x1d8] sm:$0xf0] }
 0xbb5   :  { %v4494_v11 = vpop.eup %4493 }
 0xbb6   :  { %v4496_v12 = vpop.eup %4495  ;;  %v1764_v32 = vmul.f32 %v4494_v11, %v4488_v4  ;;  %v3798_v4 = vld [vmem:[#allocation5 + $0x1e8] sm:$0xf]  ;;  %v3776_v11 = vld [vmem:[#allocation5 + $0x1d0] sm:$0xf0] }
 0xbb7   :  { %v1763_v14 = vmul.f32 %v4496_v12, %v4486_v1  ;;  %v4498_v21 = vpop.eup %4497  ;;  %v4326_v1 = vld [vmem:[#allocation5 + $0x1ec] sm:$0xf0]  ;;  %v3782_v12 = vld [vmem:[#allocation5 + $0x1c8] sm:$0xf] }
 0xbb8   :  { %v1693_v24 = vmul.f32 %v4498_v21, %v4490_v5  ;;  %v3791_v56 = vor.u32 %v4326_v1, %v3790_v0  ;;  %v4327_v5 = vld [vmem:[#allocation5 + $0x1f4] sm:$0xf0]  ;;  %v3758_v21 = vld [vmem:[#allocation5 + $0x1a0] sm:$0xf] }
 0xbb9   :  { %v1765_v17 = vpack.c.bf16 %v1764_v32, %v1763_v14  ;;  %v3799_v23 = vor.u32 %v4327_v5, %v3798_v4  ;;  %v4323_v32 = vld [vmem:[#allocation5 + $0x1d4] sm:$0xf0]  ;;  %v3779_v14 = vor.u32 %v4320_v29, %v3776_v11  ;;  %v3710_v1 = vld [vmem:[#allocation5 + $0x140] sm:$0xf]  ;;  %v3712_v4 = vld [vmem:[#allocation5 + $0x150] sm:$0xf0] }
 0xbba   :  { %2145 = vmatpush.bf16.msra.mxu0 %v3791_v56  ;;  %v4304_v56 = vld [vmem:[#allocation5 + $0x144] sm:$0xf]  ;;  %v3711_v3 = vor.u32 %v4306_v2, %v3710_v1  ;;  %v3718_v5 = vld [vmem:[#allocation5 + $0x148] sm:$0xf]  ;;  %v4302_v29 = vld [vmem:[#allocation5 + $0x12c] sm:$0xf0] }
 0xbbb   :  { %2160 = vmatpush.bf16.msra.mxu1 %v3779_v14  ;;  %v3719_v7 = vor.u32 %v4307_v6, %v3718_v5  ;;  %v3702_v14 = vld [vmem:[#allocation5 + $0x128] sm:$0xf]  ;;  %v4436_v1 = vld [vmem:[%s5299_s14 + $0x1] ss:$0 sm:$0xff]  ;;  %v4343_v5 = vld [vmem:[#allocation7 + $0x178] sm:$0xff] }
 0xbbc   :  { %v4334_v6 = vld [vmem:[#allocation7 + $0x130] sm:$0xff] }
 0xbc1   :  { %v1768_v15 = vpop.permute.xlu0 %1767 }
 0xbc2   :  { %1780 = vmatpush.bf16.msra.mxu2 %v1768_v15  ;;  %v3783_v15 = vor.u32 %v4323_v32, %v3782_v12  ;;  %v3696_v32 = vld [vmem:[#allocation5 + $0x130] sm:$0xf0] }
 0xbc5   :  { %3623 = vmatmul.msk.bf16.vlgmr.msra.gmra.mxu2 %vm462_vm9, %v1765_v17  ;;  %v4321_v17 = vld [vmem:[#allocation5 + $0x1cc] sm:$0xf] }
 0xbc6   :  { %2173 = vmatpush.bf16.msrb.mxu2 %v3799_v23  ;;  %v3715_v23 = vor.u32 %v4304_v56, %v3712_v4 }
 0xbca   :  { %2174 = vmatpush.bf16.msrb.mxu2 %v3783_v15  ;;  %v4303_v15 = vld [vmem:[#allocation5 + $0x134] sm:$0xf0] }
 0xbec   :  { %v1690_v19 = vpop.xlane.xlu0 %1689 }
 0xbed   :  { %4499 = vrcp.f32 %v1690_v19  ;;  %v3787_v19 = vor.u32 %v4321_v17, %v3784_v18 }
 0xbef   :  { %2188 = vmatpush.bf16.msra.mxu3 %v3787_v19  ;;  %v3703_v19 = vor.u32 %v4303_v15, %v3702_v14  ;;  %v4339_v14 = vld [vmem:[#allocation7 + $0x158] sm:$0xff]  ;;  %v4348_v15 = vld [vmem:[#allocation7 + $0x1a0] sm:$0xff] }
 0xbf3   :  { %v4500_v22 = vpop.eup %4499  ;;  %2189 = vmatpush.bf16.msra.mxu3 %v3771_v35 }
 0xbf4   :  { %v1694_v26 = vmul.f32 %v4500_v22, %v4492_v10  ;;  %v3774_v10 = vld [vmem:[#allocation5 + $0x1c0] sm:$0xf]  ;;  %v4318_v22 = vld [vmem:[#allocation5 + $0x1ac] sm:$0xf0] }
 0xbf5   :  { %v3775_v9 = vor.u32 %v4322_v27, %v3774_v10  ;;  %v3723_v10 = vor.u32 %v4305_v52, %v3720_v8  ;;  %v3694_v27 = vld [vmem:[#allocation5 + $0x120] sm:$0xf]  ;;  %v4333_v52 = vld [vmem:[#allocation7 + $0x128] sm:$0xff] }
 0xbf6   :  { %v1695_v28 = vpack.c.bf16 %v1694_v26, %v1693_v24  ;;  %v4316_v24 = vld [vmem:[#allocation5 + $0x1a4] sm:$0xf]  ;;  %v3759_v26 = vor.u32 %v4318_v22, %v3758_v21  ;;  %v3695_v12 = vor.u32 %v4302_v29, %v3694_v27  ;;  %v4301_v21 = vld [vmem:[#allocation5 + $0x12c] sm:$0xf]  ;;  %v3704_v22 = vld [vmem:[#allocation5 + $0x138] sm:$0xf0] }
 0xbf7   :  { %2146 = vmatpush.bf16.msra.mxu0 %v3775_v9  ;;  %v4300_v9 = vld [vmem:[#allocation5 + $0x124] sm:$0xf]  ;;  %v4341_v8 = vld [vmem:[#allocation7 + $0x168] sm:$0xff]  ;;  %v4358_v27 = vld [vmem:[#allocation7 + $0x1f0] sm:$0xff] }
 0xbf8   :  { %3621 = vmatmul.msk.bf16.vlgmr.msrb.gmra.mxu0 %vm462_vm9, %v1695_v28  ;;  %v3760_v28 = vld [vmem:[#allocation5 + $0x1b0] sm:$0xf0]  ;;  %v3699_v18 = vor.u32 %v4300_v9, %v3696_v32  ;;  %v4332_v29 = vld [vmem:[#allocation7 + $0x120] sm:$0xff]  ;;  %v4331_v32 = vld [vmem:[#allocation7 + $0x118] sm:$0xff] }
 0xbf9   :  { %v4340_v9 = vld [vmem:[#allocation7 + $0x160] sm:$0xff] }
 0xbfb   :  { %2147 = vmatpush.bf16.msra.mxu0 %v3759_v26  ;;  %v3707_v26 = vor.u32 %v4301_v21, %v3704_v22  ;;  %v5058_v21 = vld [vmem:[%s5301_s16 + $0x4] sm:$0xf]  ;;  %v4347_v22 = vld [vmem:[#allocation7 + $0x198] sm:$0xff]  ;;  %s4636_s16 = smov [#allocation8]  }
 0xbfc   :  { %s3111_s30 = sshll.u32 %s4636_s16, 4  ;;  %s3112_s30 = int_to_ptr.vmem [resolvable:$true] %s3111_s30 }
 0xbff   :  { %2148 = vmatpush.bf16.msra.mxu0 %v3743_v41 }
 0xc48   :  { %v1782_v47 = vpop.f32.mrf.mxu2 }
 0xc50   :  { %v1784_v30 = vpop.f32.mrf.mxu2 }
 0xc51   :  { %v4417_v31 = vpack.i.bf16 %v1784_v30, %v1782_v47  ;;  %v3766_v47 = vld [vmem:[#allocation5 + $0x1a8] sm:$0xf]  ;;  %v4319_v30 = vld [vmem:[#allocation5 + $0x1b4] sm:$0xf0] }
 0xc52   :  { %v3767_v50 = vor.u32 %v4319_v30, %v3766_v47  ;;  %v4296_v47 = vld [vmem:[#allocation5 + $0x104] sm:$0xf]  ;;  %v3680_v30 = vld [vmem:[#allocation5 + $0x110] sm:$0xf0] }
 0xc53   :  { %4418 = vrot.lane.b32.xlu2 %v4417_v31, %s4632_s28  ;;  %v3763_v31 = vor.u32 %v4316_v24, %v3760_v28  ;;  %v3678_v24 = vld [vmem:[#allocation5 + $0x100] sm:$0xf]  ;;  %v4298_v28 = vld [vmem:[#allocation5 + $0x10c] sm:$0xf0]  ;;  %v3683_v35 = vor.u32 %v4296_v47, %v3680_v30 }
 0xc54   :  { %2175 = vmatpush.bf16.msrb.mxu2 %v3767_v50  ;;  %v3679_v50 = vor.u32 %v4298_v28, %v3678_v24  ;;  %v4355_v24 = vld [vmem:[#allocation7 + $0x1d8] sm:$0xff]  ;;  %v4337_v28 = vld [vmem:[#allocation7 + $0x148] sm:$0xff]  ;;  %v4346_v47 = vld [vmem:[#allocation7 + $0x190] sm:$0xff] }
 0xc55   :  { %2161 = vmatpush.bf16.msra.mxu1 %v3763_v31  ;;  %v4354_v30 = vld [vmem:[#allocation7 + $0x1d0] sm:$0xff] }
 0xc75   :  { %v1708_v42 = vpop.f32.mrf.mxu0 }
 0xc7d   :  { %v1710_v46 = vpop.f32.mrf.mxu0 }
 0xcad   :  { %v4419_v43 = vpop.permute.xlu2 %4418 }
 0xcae   :  { %v4421_v44 = vunpack.i.h.bf16 %v4419_v43  ;;  %v4420_v45 = vunpack.i.l.bf16 %v4419_v43  ;;  %v3750_v43 = vld [vmem:[#allocation5 + $0x188] sm:$0xf] }
 0xcb0   :  { %v1796_v48 = vsel %vm437_vm8, %v1710_v46, %v4421_v44  ;;  %v1795_v49 = vsel %vm437_vm8, %v1708_v42, %v4420_v45  ;;  %v3744_v42 = vld [vmem:[#allocation5 + $0x190] sm:$0xf0]  ;;  %v4315_v44 = vld [vmem:[#allocation5 + $0x194] sm:$0xf0] }
 0xcb1   :  { %v1797_v51 = vpack.c.bf16 %v1796_v48, %v1795_v49  ;;  %v3747_v45 = vor.u32 %v4312_v40, %v3744_v42  ;;  %v3751_v46 = vor.u32 %v4315_v44, %v3750_v43  ;;  %v4313_v48 = vld [vmem:[#allocation5 + $0x18c] sm:$0xf]  ;;  %v3752_v49 = vld [vmem:[#allocation5 + $0x198] sm:$0xf0] }
 0xcb2   :  { %v3688_v40 = vld [vmem:[#allocation5 + $0x118] sm:$0xf0] }
 0xcb3   :  { %1871 = vmatmul.bf16.vlgmr.msrb.gmra.mxu3 %v1797_v51  ;;  %v3755_v51 = vor.u32 %v4313_v48, %v3752_v49  ;;  %2162 = vmatpush.bf16.msra.mxu1 %v3747_v45  ;;  %v3691_v41 = vor.u32 %v4297_v39, %v3688_v40  ;;  %v4345_v39 = vld [vmem:[#allocation7 + $0x188] sm:$0xff] }
 0xcb4   :  { %2176 = vmatpush.bf16.msrb.mxu2 %v3751_v46  ;;  %v4353_v40 = vld [vmem:[#allocation7 + $0x1c8] sm:$0xff] }
 0xcb5   :  { %2190 = vmatpush.bf16.msra.mxu3 %v3755_v51 }
 0xd36   :  { %v1872_v55 = vpop.f32.mrf.mxu3 }
 0xd37   :  { %v1877_v13 = vadd.f32 %v1872_v55, %v4940_v16  ;;  %v4310_v55 = vld [vmem:[#allocation5 + $0x16c] sm:$0xf0] }
 0xd39   :  { %v5026_v59 = vadd.f32 %v4434_v54, %v1877_v13  ;;  %v4308_v13 = vld [vmem:[#allocation5 + $0x164] sm:$0xf] }
 0xd3b   :  { %1890 = vadd.xlane.f32.xlu1 %v5026_v59 }
 0xd3e   :  { %v1874_v60 = vpop.f32.mrf.mxu3 }
 0xd3f   :  { %v1878_v61 = vadd.f32 %v1874_v60, %v4944_v25 }
 0xd41   :  { %v5030_v62 = vadd.f32 %v4434_v54, %v1878_v61  ;;  %v3726_v54 = vld [vmem:[#allocation5 + $0x160] sm:$0xf]  ;;  %v3728_v61 = vld [vmem:[#allocation5 + $0x170] sm:$0xf0] }
 0xd42   :  { %v3727_v60 = vor.u32 %v4310_v55, %v3726_v54 }
 0xd43   :  { %1892 = vadd.xlane.f32.xlu1 %v5030_v62 }
 0xd44   :  { %2149 = vmatpush.bf16.msra.mxu0 %v3727_v60 }
 0xd48   :  { %2150 = vmatpush.bf16.msra.mxu0 %v3711_v3 }
 0xd4c   :  { %2151 = vmatpush.bf16.msra.mxu0 %v3695_v12  ;;  %v4357_v12 = vld [vmem:[#allocation7 + $0x1e8] sm:$0xff] }
 0xd50   :  { %2152 = vmatpush.bf16.msra.mxu0 %v3679_v50  ;;  %v1978_v50 = vperm.slane %v5058_v21, 1 }
 0xdae   :  { %v1891_v36 = vpop.xlane.xlu1 %1890 }
 0xdaf   :  { %v1894_v57 = vmul.f32 %v1891_v36, %v4785_v20  ;;  %v3734_v36 = vld [vmem:[#allocation5 + $0x168] sm:$0xf] }
 0xdb1   :  { %v5035_v63 = vsub.f32 %v5026_v59, %v1894_v57  ;;  %v4311_v57 = vld [vmem:[#allocation5 + $0x174] sm:$0xf0] }
 0xdb3   :  { %v1898_v16 = vmul.f32 %v5035_v63, %v5035_v63 }
 0xdb5   :  { %1900 = vadd.xlane.f32.xlu1 %v1898_v16  ;;  %v3731_v16 = vor.u32 %v4308_v13, %v3728_v61 }
 0xdb6   :  { %v1893_v37 = vpop.xlane.xlu1 %1892 }
 0xdb7   :  { %v1895_v58 = vmul.f32 %v1893_v37, %v4785_v20  ;;  %v3735_v37 = vor.u32 %v4311_v57, %v3734_v36  ;;  %2163 = vmatpush.bf16.msra.mxu1 %v3731_v16  ;;  %v4435_v16 = vld [vmem:[%s5298_s13 + $0x1] ss:$0 sm:$0xff] }
 0xdb9   :  { %v5041_v53 = vsub.f32 %v5030_v62, %v1895_v58  ;;  %v4309_v58 = vld [vmem:[#allocation5 + $0x16c] sm:$0xf]  ;;  %2177 = vmatpush.bf16.msrb.mxu2 %v3735_v37 }
 0xdbb   :  { %v1899_v25 = vmul.f32 %v5041_v53, %v5041_v53  ;;  %2164 = vmatpush.bf16.msra.mxu1 %v3715_v23  ;;  %v4342_v23 = vld [vmem:[#allocation7 + $0x170] sm:$0xff] }
 0xdbd   :  { %1902 = vadd.xlane.f32.xlu2 %v1899_v25  ;;  %v3736_v25 = vld [vmem:[#allocation5 + $0x178] sm:$0xf0]  ;;  %2178 = vmatpush.bf16.msrb.mxu2 %v3719_v7 }
 0xdbe   :  { %v3739_v0 = vor.u32 %v4309_v58, %v3736_v25  ;;  %v4359_v7 = vld [vmem:[#allocation7 + $0x1f8] sm:$0xff] }
 0xdbf   :  { %2165 = vmatpush.bf16.msra.mxu1 %v3699_v18  ;;  %v4330_v18 = vld [vmem:[#allocation7 + $0x110] sm:$0xff] }
 0xdc0   :  { %2191 = vmatpush.bf16.msra.mxu3 %v3739_v0 }
 0xdc1   :  { %2179 = vmatpush.bf16.msrb.mxu2 %v3703_v19  ;;  %v4338_v19 = vld [vmem:[#allocation7 + $0x150] sm:$0xff] }
 0xdc3   :  { %2166 = vmatpush.bf16.msra.mxu1 %v3683_v35 }
 0xdc4   :  { %2192 = vmatpush.bf16.msra.mxu3 %v3723_v10  ;;  %v4350_v10 = vld [vmem:[#allocation7 + $0x1b0] sm:$0xff] }
 0xdc5   :  { %2180 = vmatpush.bf16.msrb.mxu2 %v3687_v38 }
 0xdc7   :  { %2553 = vmatpush.bf16.msrb.mxu1 %v4343_v5  ;;  %v2599_v5 = vld [vmem:[%s5322_s22 + $0x8] sm:$0xff] }
 0xdc8   :  { %2193 = vmatpush.bf16.msra.mxu3 %v3707_v26  ;;  %v4329_v26 = vld [vmem:[#allocation7 + $0x108] sm:$0xff] }
 0xdcb   :  { %2554 = vmatpush.bf16.msrb.mxu1 %v4342_v23 }
 0xdcc   :  { %2194 = vmatpush.bf16.msra.mxu3 %v3691_v41 }
 0xdcf   :  { %2555 = vmatpush.bf16.msrb.mxu1 %v4341_v8 }
 0xdd0   :  { %2581 = vmatpush.bf16.msrb.mxu3 %v4359_v7  ;;  %v4366_v7 = vld [vmem:[%s5304_s19 + $0x30] sm:$0xff] }
 0xdd3   :  { %2556 = vmatpush.bf16.msrb.mxu1 %v4340_v9  ;;  %v4375_v9 = vld [vmem:[%s5304_s19 + $0x78] sm:$0xff] }
 0xdd4   :  { %2582 = vmatpush.bf16.msrb.mxu3 %v4358_v27 }
 0xdd7   :  { %2557 = vmatpush.bf16.msrb.mxu1 %v4339_v14 }
 0xdd8   :  { %2583 = vmatpush.bf16.msrb.mxu3 %v4357_v12  ;;  %v4391_v12 = vld [vmem:[%s5304_s19 + $0xf8] sm:$0xff] }
 0xddb   :  { %2558 = vmatpush.bf16.msrb.mxu1 %v4338_v19 }
 0xddf   :  { %2559 = vmatpush.bf16.msrb.mxu1 %v4337_v28 }
 0xde3   :  { %2560 = vmatpush.bf16.msrb.mxu1 %v4336_v34 }
 0xe28   :  { %v1901_v11 = vpop.xlane.xlu1 %1900 }
 0xe29   :  { %v1904_v17 = vmul.f32 %v1901_v11, %v4785_v20  ;;  %v4349_v11 = vld [vmem:[#allocation7 + $0x1a8] sm:$0xff] }
 0xe2b   :  { %v1906_v31 = vadd.f32 1e-05, %v1904_v17  ;;  %v4356_v17 = vld [vmem:[#allocation7 + $0x1e0] sm:$0xff] }
 0xe2c   :  { %2584 = vmatpush.bf16.msrb.mxu3 %v4356_v17 }
 0xe2d   :  { %4501 = vrsqrt.f32 %v1906_v31  ;;  %vm1914_vm7 = vweird.f32 %v1906_v31 }
 0xe30   :  { %v1903_v42 = vpop.xlane.xlu2 %1902  ;;  %2585 = vmatpush.bf16.msrb.mxu3 %v4355_v24 }
 0xe31   :  { %v1905_v43 = vmul.f32 %v1903_v42, %v4785_v20 }
 0xe33   :  { %v4502_v44 = vpop.eup %4501  ;;  %v1907_v45 = vadd.f32 1e-05, %v1905_v43 }
 0xe34   :  { %v1909_v46 = vmul.f32 %v4502_v44, %v1906_v31  ;;  %vm1915_vm6 = vweird.f32 %v4502_v44  ;;  %v1977_v31 = vperm.slane %v5058_v21, 0  ;;  %2586 = vmatpush.bf16.msrb.mxu3 %v4354_v30 }
 0xe35   :  { %4503 = vrsqrt.f32 %v1907_v45  ;;  %vm1916_vm8 = vmor %vm1914_vm7, %vm1915_vm6  ;;  %vm1924_vm11 = vweird.f32 %v1907_v45 }
 0xe36   :  { %v1910_v48 = vmul.f32 %v4502_v44, %v1909_v46  ;;  %v1980_v46 = vperm.slane %v5058_v21, 3 }
 0xe38   :  { %v1911_v49 = vmul.f32 0.5, %v1910_v48  ;;  %2587 = vmatpush.bf16.msrb.mxu3 %v4353_v40  ;;  %v4344_v48 = vld [vmem:[#allocation7 + $0x180] sm:$0xff] }
 0xe3a   :  { %v1912_v51 = vsub.f32 1.5, %v1911_v49  ;;  %v4352_v49 = vld [vmem:[#allocation7 + $0x1c0] sm:$0xff] }
 0xe3b   :  { %v4504_v54 = vpop.eup %4503 }
 0xe3c   :  { %v1913_v55 = vmul.f32 %v4502_v44, %v1912_v51  ;;  %v1919_v13 = vmul.f32 %v4504_v54, %v1907_v45  ;;  %vm1925_vm10 = vweird.f32 %v4504_v54  ;;  %v1979_v45 = vperm.slane %v5058_v21, 2  ;;  %2588 = vmatpush.bf16.msrb.mxu3 %v4352_v49 }
 0xe3d   :  { %vm1926_vm12 = vmor %vm1924_vm11, %vm1925_vm10 }
 0xe3e   :  { %v1920_v60 = vmul.f32 %v4504_v54, %v1919_v13  ;;  %v1917_v61 = vsel %vm1916_vm8, %v4502_v44, %v1913_v55 }
 0xe3f   :  { %v1928_v20 = vmul.f32 %v1917_v61, %v5035_v63  ;;  %v4335_v63 = vld [vmem:[#allocation7 + $0x138] sm:$0xff] }
 0xe40   :  { %v1921_v36 = vmul.f32 0.5, %v1920_v60  ;;  %2539 = vmatpush.bf16.msrb.mxu0 %v4335_v63 }
 0xe41   :  { %v1933_v0 = vmul.f32 %v4435_v16, %v1928_v20 }
 0xe42   :  { %v1922_v57 = vsub.f32 1.5, %v1921_v36 }
 0xe43   :  { %v1938_v56 = vadd.f32 %v4436_v1, %v1933_v0 }
 0xe44   :  { %v1923_v37 = vmul.f32 %v4504_v54, %v1922_v57  ;;  %2540 = vmatpush.bf16.msrb.mxu0 %v4334_v6  ;;  %v4367_v6 = vld [vmem:[%s5304_s19 + $0x38] sm:$0xff] }
 0xe46   :  { %v1927_v58 = vsel %vm1926_vm12, %v4504_v54, %v1923_v37 }
 0xe47   :  { %v1929_v25 = vmul.f32 %v1927_v58, %v5041_v53  ;;  %v4351_v53 = vld [vmem:[#allocation7 + $0x1b8] sm:$0xff] }
 0xe48   :  { %2567 = vmatpush.bf16.msra.mxu2 %v4351_v53  ;;  %2541 = vmatpush.bf16.msrb.mxu0 %v4333_v52 }
 0xe49   :  { %v1934_v2 = vmul.f32 %v4435_v16, %v1929_v25 }
 0xe4b   :  { %v1939_v3 = vadd.f32 %v4436_v1, %v1934_v2 }
 0xe4c   :  { %2568 = vmatpush.bf16.msra.mxu2 %v4350_v10  ;;  %2542 = vmatpush.bf16.msrb.mxu0 %v4332_v29  ;;  %v4635_v29 = vmov 0  }
 0xe4d   :  { %v1940_v4 = vpack.c.bf16 %v1939_v3, %v1938_v56  ;;  %4422 = vset.pattern.permute.xlu1 %v4635_v29  ;;  %4423 = vset.pattern.permute.xlu0 %v4635_v29 }
 0xe4e   :  { %2685 = vperm.xlu1 %4422, %v2599_v5   ;;  %4424 = vset.pattern.permute.xlu2 %v4635_v29 }
 0xe4f   :  { %2153 = vmatmul.bf16.vlgmr.msra.gmra.mxu0 %v1940_v4  ;;  %2167 = vmatmul.bf16.vlgmr.msra.gmra.mxu1 %v1940_v4 }
 0xe50   :  { %2181 = vmatmul.bf16.vlgmr.msrb.gmra.mxu2 %v1940_v4  ;;  %2195 = vmatmul.bf16.vlgmr.msra.gmra.mxu3 %v1940_v4 }
 0xe51   :  { %2569 = vmatpush.bf16.msra.mxu2 %v4349_v11  ;;  %2543 = vmatpush.bf16.msrb.mxu0 %v4331_v32  ;;  %v4383_v11 = vld [vmem:[%s5304_s19 + $0xb8] sm:$0xff] }
 0xe52   :  { %2760 = vmatpush.bf16.msra.mxu1 %v4375_v9  ;;  %2952 = vmatpush.bf16.msra.mxu3 %v4391_v12 }
 0xe55   :  { %2570 = vmatpush.bf16.msra.mxu2 %v4348_v15  ;;  %2544 = vmatpush.bf16.msrb.mxu0 %v4330_v18 }
 0xe59   :  { %2571 = vmatpush.bf16.msra.mxu2 %v4347_v22  ;;  %2545 = vmatpush.bf16.msrb.mxu0 %v4329_v26 }
 0xe5d   :  { %2572 = vmatpush.bf16.msra.mxu2 %v4346_v47  ;;  %2546 = vmatpush.bf16.msrb.mxu0 %v4328_v33  ;;  %v4365_v47 = vld [vmem:[%s5304_s19 + $0x28] sm:$0xff] }
 0xe61   :  { %2573 = vmatpush.bf16.msra.mxu2 %v4345_v39  ;;  %2664 = vmatpush.bf16.msra.mxu0 %v4367_v6 }
 0xe65   :  { %2574 = vmatpush.bf16.msra.mxu2 %v4344_v48  ;;  %2665 = vmatpush.bf16.msra.mxu0 %v4366_v7 }
 0xe69   :  { %2856 = vmatpush.bf16.msrb.mxu2 %v4383_v11  ;;  %2666 = vmatpush.bf16.msra.mxu0 %v4365_v47  ;;  %v4361_v47 = vld [vmem:[%s5304_s19 + $0x8] sm:$0xff] }
 0xecc   :  { %v2154_v35 = vpop.f32.mrf.mxu0  ;;  %v2168_v38 = vpop.f32.mrf.mxu1 }
 0xecd   :  { %v5062_v41 = vadd.f32 %v2154_v35, %v1977_v31  ;;  %v5064_v42 = vadd.f32 %v2168_v38, %v1978_v50  ;;  %v2598_v35 = vld [vmem:[%s5322_s22] sm:$0xff] }
 0xece   :  { %2680 = vperm.xlu1 %4422, %v2598_v35   ;;  %v4379_v35 = vld [vmem:[%s5304_s19 + $0x98] sm:$0xff] }
 0xecf   :  { %v2209_v43 = vmul.f32 0.044715, %v5062_v41  ;;  %v2210_v44 = vmul.f32 0.044715, %v5064_v42 }
 0xed1   :  { %v2217_v51 = vmul.f32 %v2209_v43, %v5062_v41  ;;  %v2218_v54 = vmul.f32 %v2210_v44, %v5064_v42  ;;  %v4364_v43 = vld [vmem:[%s5304_s19 + $0x20] sm:$0xff] }
 0xed2   :  { %2667 = vmatpush.bf16.msra.mxu0 %v4364_v43  ;;  %v4370_v43 = vld [vmem:[%s5304_s19 + $0x50] sm:$0xff] }
 0xed3   :  { %v2225_v55 = vmul.f32 %v2217_v51, %v5062_v41  ;;  %v2226_v13 = vmul.f32 %v2218_v54, %v5064_v42  ;;  %v2182_v60 = vpop.f32.mrf.mxu2  ;;  %v2196_v61 = vpop.f32.mrf.mxu3 }
 0xed4   :  { %v5074_v36 = vadd.f32 %v2182_v60, %v1979_v45  ;;  %v5076_v57 = vadd.f32 %v2196_v61, %v1980_v46  ;;  %v2156_v20 = vpop.f32.mrf.mxu0  ;;  %v2170_v16 = vpop.f32.mrf.mxu1 }
 0xed5   :  { %v2233_v37 = vadd.f32 %v2225_v55, %v5062_v41  ;;  %v5079_v58 = vadd.f32 %v2156_v20, %v1977_v31  ;;  %v5081_v25 = vadd.f32 %v2170_v16, %v1978_v50  ;;  %v2234_v0 = vadd.f32 %v2226_v13, %v5064_v42 }
 0xed6   :  { %v2211_v1 = vmul.f32 0.044715, %v5074_v36  ;;  %v2212_v2 = vmul.f32 0.044715, %v5076_v57  ;;  %v2201_v20 = vmul.f32 0.5, %v5062_v41 }
 0xed7   :  { %v2213_v56 = vmul.f32 0.044715, %v5079_v58  ;;  %v2214_v63 = vmul.f32 0.044715, %v5081_v25  ;;  %v2241_v23 = vmul.f32 0.7978846, %v2233_v37 }
 0xed8   :  { %v2219_v3 = vmul.f32 %v2211_v1, %v5074_v36  ;;  %v2220_v4 = vmul.f32 %v2212_v2, %v5076_v57  ;;  %v2242_v52 = vmul.f32 0.7978846, %v2234_v0  ;;  %v2205_v16 = vmul.f32 0.5, %v5079_v58  ;;  %v3965_v0 = vld [vmem:[%s5322_s22 + $0x10] sm:$0xff] }
 0xed9   :  { %v2221_v53 = vmul.f32 %v2213_v56, %v5079_v58  ;;  %v2222_v27 = vmul.f32 %v2214_v63, %v5081_v25  ;;  %4505 = vtanh.f32 %v2241_v23  ;;  %v2202_v1 = vmul.f32 0.5, %v5064_v42  ;;  %2776 = vperm.xlu1 %4422, %v3965_v0  }
 0xeda   :  { %v2227_v8 = vmul.f32 %v2219_v3, %v5074_v36  ;;  %v2228_v10 = vmul.f32 %v2220_v4, %v5076_v57  ;;  %4507 = vtanh.f32 %v2242_v52  ;;  %v2206_v2 = vmul.f32 0.5, %v5081_v25 }
 0xedb   :  { %v2229_v32 = vmul.f32 %v2221_v53, %v5079_v58  ;;  %v2184_v14 = vpop.f32.mrf.mxu2  ;;  %v2198_v15 = vpop.f32.mrf.mxu3  ;;  %v2230_v18 = vmul.f32 %v2222_v27, %v5081_v25  ;;  %v2203_v42 = vmul.f32 0.5, %v5074_v36  ;;  %v2204_v27 = vmul.f32 0.5, %v5076_v57 }
 0xedc   :  { %v2235_v17 = vadd.f32 %v2227_v8, %v5074_v36  ;;  %v5115_v19 = vadd.f32 %v2184_v14, %v1979_v45  ;;  %v2236_v21 = vadd.f32 %v2228_v10, %v5076_v57  ;;  %v5119_v24 = vadd.f32 %v2198_v15, %v1980_v46  ;;  %v4363_v36 = vld [vmem:[%s5304_s19 + $0x18] sm:$0xff]  ;;  %v4382_v57 = vld [vmem:[%s5304_s19 + $0xb0] sm:$0xff] }
 0xedd   :  { %v2237_v22 = vadd.f32 %v2229_v32, %v5079_v58  ;;  %v2238_v26 = vadd.f32 %v2230_v18, %v5081_v25  ;;  %v4374_v18 = vld [vmem:[%s5304_s19 + $0x70] sm:$0xff]  ;;  %2668 = vmatpush.bf16.msra.mxu0 %v4363_v36  ;;  %2857 = vmatpush.bf16.msrb.mxu2 %v4382_v57 }
 0xede   :  { %v2215_v28 = vmul.f32 0.044715, %v5115_v19  ;;  %v2216_v31 = vmul.f32 0.044715, %v5119_v24  ;;  %v2243_v50 = vmul.f32 0.7978846, %v2235_v17  ;;  %2761 = vmatpush.bf16.msra.mxu1 %v4374_v18 }
 0xedf   :  { %v2245_v30 = vmul.f32 0.7978846, %v2237_v22  ;;  %v2246_v33 = vmul.f32 0.7978846, %v2238_v26  ;;  %v2244_v38 = vmul.f32 0.7978846, %v2236_v21  ;;  %v4506_v44 = vpop.eup %4505 }
 0xee0   :  { %v2223_v34 = vmul.f32 %v2215_v28, %v5115_v19  ;;  %v2224_v39 = vmul.f32 %v2216_v31, %v5119_v24  ;;  %v4508_v46 = vpop.eup %4507  ;;  %v2257_v54 = vadd.f32 1.0, %v4506_v44  ;;  %v2207_v25 = vmul.f32 0.5, %v5115_v19  ;;  %v4362_v21 = vld [vmem:[%s5304_s19 + $0x10] sm:$0xff]  ;;  %v4373_v22 = vld [vmem:[%s5304_s19 + $0x68] sm:$0xff]  ;;  %v4380_v31 = vld [vmem:[%s5304_s19 + $0xa0] sm:$0xff] }
 0xee1   :  { %4509 = vtanh.f32 %v2245_v30  ;;  %v2258_v60 = vadd.f32 1.0, %v4508_v46  ;;  %v2208_v29 = vmul.f32 0.5, %v5119_v24  ;;  %v4381_v26 = vld [vmem:[%s5304_s19 + $0xa8] sm:$0xff]  ;;  %2669 = vmatpush.bf16.msra.mxu0 %v4362_v21  ;;  %v4372_v30 = vld [vmem:[%s5304_s19 + $0x60] sm:$0xff]  ;;  %v4378_v44 = vld [vmem:[%s5304_s19 + $0x90] sm:$0xff] }
 0xee2   :  { %v2231_v40 = vmul.f32 %v2223_v34, %v5115_v19  ;;  %4511 = vtanh.f32 %v2246_v33  ;;  %v2232_v45 = vmul.f32 %v2224_v39, %v5119_v24  ;;  %v2265_v4 = vmul.f32 %v2257_v54, %v2201_v20  ;;  %v4389_v28 = vld [vmem:[%s5304_s19 + $0xe8] sm:$0xff]  ;;  %2762 = vmatpush.bf16.msra.mxu1 %v4373_v22  ;;  %2858 = vmatpush.bf16.msrb.mxu2 %v4381_v26  ;;  %v4360_v33 = vld [vmem:[%s5304_s19] sm:$0xff]  ;;  %v4371_v34 = vld [vmem:[%s5304_s19 + $0x58] sm:$0xff] }
 0xee3   :  { %4513 = vtanh.f32 %v2243_v50  ;;  %v2266_v6 = vmul.f32 %v2258_v60, %v2202_v1  ;;  %v4388_v50 = vld [vmem:[%s5304_s19 + $0xe0] sm:$0xff]  ;;  %v4399_v39 = vld [vmem:[%s5304_s19 + $0x138] sm:$0xff]  ;;  %v4398_v46 = vld [vmem:[%s5304_s19 + $0x130] sm:$0xff] }
 0xee4   :  { %v2239_v48 = vadd.f32 %v2231_v40, %v5115_v19  ;;  %v2240_v49 = vadd.f32 %v2232_v45, %v5119_v24  ;;  %4515 = vtanh.f32 %v2244_v38  ;;  %v4390_v19 = vld [vmem:[%s5304_s19 + $0xf0] sm:$0xff]  ;;  %v4015_v24 = vld [vmem:[%s5322_s22 + $0x20] sm:$0xff]  ;;  %v4387_v38 = vld [vmem:[%s5304_s19 + $0xd8] sm:$0xff] }
 0xee5   :  { %2953 = vmatpush.bf16.msra.mxu3 %v4390_v19  ;;  %2872 = vperm.xlu1 %4422, %v4015_v24   ;;  %v4066_v40 = vld [vmem:[%s5322_s22 + $0x38] sm:$0xff]  ;;  %v4386_v45 = vld [vmem:[%s5304_s19 + $0xd0] sm:$0xff]  ;;  %v4397_v54 = vld [vmem:[%s5304_s19 + $0x128] sm:$0xff] }
 0xee6   :  { %v2247_v51 = vmul.f32 0.7978846, %v2239_v48  ;;  %v2248_v13 = vmul.f32 0.7978846, %v2240_v49  ;;  %2670 = vmatpush.bf16.msra.mxu0 %v4361_v47  ;;  %2763 = vmatpush.bf16.msra.mxu1 %v4372_v30  ;;  %v4369_v48 = vld [vmem:[%s5304_s19 + $0x48] sm:$0xff]  ;;  %v4376_v60 = vld [vmem:[%s5304_s19 + $0x80] sm:$0xff] }
 0xee7   :  { %v4510_v55 = vpop.eup %4509  ;;  %2859 = vmatpush.bf16.msrb.mxu2 %v4380_v31  ;;  %v4377_v49 = vld [vmem:[%s5304_s19 + $0x88] sm:$0xff]  ;;  %v4396_v20 = vld [vmem:[%s5304_s19 + $0x120] sm:$0xff]  ;;  %v4394_v1 = vld [vmem:[%s5304_s19 + $0x110] sm:$0xff] }
 0xee8   :  { %v4512_v61 = vpop.eup %4511  ;;  %v2261_v37 = vadd.f32 1.0, %v4510_v55  ;;  %4517 = vtanh.f32 %v2247_v51  ;;  %v4385_v51 = vld [vmem:[%s5304_s19 + $0xc8] sm:$0xff] }
 0xee9   :  { %v2262_v56 = vadd.f32 1.0, %v4512_v61  ;;  %4519 = vtanh.f32 %v2248_v13  ;;  %v4514_v3 = vpop.eup %4513  ;;  %2954 = vmatpush.bf16.msra.mxu3 %v4389_v28  ;;  %v4116_v55 = vld [vmem:[%s5322_s22 + $0x48] sm:$0xff]  ;;  %v4368_v13 = vld [vmem:[%s5304_s19 + $0x40] sm:$0xff] }
 0xeea   :  { %v2269_v63 = vmul.f32 %v2261_v37, %v2205_v16  ;;  %v4516_v5 = vpop.eup %4515  ;;  %v2259_v53 = vadd.f32 1.0, %v4514_v3  ;;  %2671 = vmatpush.bf16.msra.mxu0 %v4360_v33  ;;  %2764 = vmatpush.bf16.msra.mxu1 %v4371_v34  ;;  %v4384_v61 = vld [vmem:[%s5304_s19 + $0xc0] sm:$0xff]  ;;  %v4395_v16 = vld [vmem:[%s5304_s19 + $0x118] sm:$0xff] }
 0xeeb   :  { %v2270_v41 = vmul.f32 %v2262_v56, %v2206_v2  ;;  %v2260_v52 = vadd.f32 1.0, %v4516_v5  ;;  %2860 = vmatpush.bf16.msrb.mxu2 %v4379_v35  ;;  %v3966_v37 = vld [vmem:[%s5322_s22 + $0x18] sm:$0xff]  ;;  %v4393_v2 = vld [vmem:[%s5304_s19 + $0x108] sm:$0xff]  ;;  %v4437_v56 = vld [vmem:[%s5303_s18 + $0x1] ss:$0 sm:$0xff] }
 0xeec   :  { %v2273_v58 = vpack.c.bf16 %v2269_v63, %v2265_v4  ;;  %v2267_v11 = vmul.f32 %v2259_v53, %v2203_v42  ;;  %2781 = vperm.xlu0 %4423, %v3966_v37   ;;  %v4392_v4 = vld [vmem:[%s5304_s19 + $0x100] sm:$0xff] }
 0xeed   :  { %v2274_v23 = vpack.c.bf16 %v2270_v41, %v2266_v6  ;;  %v2268_v32 = vmul.f32 %v2260_v52, %v2204_v27  ;;  %2955 = vmatpush.bf16.msra.mxu3 %v4388_v50  ;;  %2973 = vperm.xlu1 %4422, %v4066_v40  }
 0xeee   :  { %v4518_v7 = vpop.eup %4517  ;;  %2547 = vmatmul.bf16.vlgmr.msrb.gmra.mxu0 %v2273_v58  ;;  %2765 = vmatpush.bf16.msra.mxu1 %v4370_v43  ;;  %v4065_v58 = vld [vmem:[%s5322_s22 + $0x30] sm:$0xff] }
 0xeef   :  { %v4520_v8 = vpop.eup %4519  ;;  %2561 = vmatmul.bf16.vlgmr.msrb.gmra.mxu1 %v2274_v23  ;;  %v2263_v10 = vadd.f32 1.0, %v4518_v7  ;;  %3048 = vmatpush.bf16.msrb.mxu0 %v4399_v39  ;;  %v4016_v23 = vld [vmem:[%s5322_s22 + $0x28] sm:$0xff] }
 0xef0   :  { %v2264_v9 = vadd.f32 1.0, %v4520_v8  ;;  %2861 = vmatpush.bf16.msrb.mxu2 %v4378_v44  ;;  %2877 = vperm.xlu2 %4424, %v4016_v23  }
 0xef1   :  { %v2271_v12 = vmul.f32 %v2263_v10, %v2207_v25  ;;  %2956 = vmatpush.bf16.msra.mxu3 %v4387_v38  ;;  %v4115_v10 = vld [vmem:[%s5322_s22 + $0x40] sm:$0xff] }
 0xef2   :  { %v2272_v14 = vmul.f32 %v2264_v9, %v2208_v29  ;;  %2766 = vmatpush.bf16.msra.mxu1 %v4369_v48 }
 0xef3   :  { %v2275_v15 = vpack.c.bf16 %v2271_v12, %v2267_v11  ;;  %3049 = vmatpush.bf16.msrb.mxu0 %v4398_v46 }
 0xef4   :  { %v2276_v17 = vpack.c.bf16 %v2272_v14, %v2268_v32  ;;  %2862 = vmatpush.bf16.msrb.mxu2 %v4377_v49  ;;  %2968 = vperm.xlu0 %4423, %v4065_v58  }
 0xef5   :  { %2575 = vmatmul.bf16.vlgmr.msra.gmra.mxu2 %v2275_v15  ;;  %2957 = vmatpush.bf16.msra.mxu3 %v4386_v45  ;;  %v2686_v15 = vpop.permute.xlu1 %2685 }
 0xef6   :  { %2589 = vmatmul.bf16.vlgmr.msrb.gmra.mxu3 %v2276_v17  ;;  %3069 = vperm.xlu1 %4422, %v4116_v55  }
 0xef7   :  { %3050 = vmatpush.bf16.msrb.mxu0 %v4397_v54  ;;  %2767 = vmatpush.bf16.msra.mxu1 %v4368_v13 }
 0xef8   :  { %2863 = vmatpush.bf16.msrb.mxu2 %v4376_v60  ;;  %3064 = vperm.xlu2 %4424, %v4115_v10  }
 0xef9   :  { %2958 = vmatpush.bf16.msra.mxu3 %v4385_v51 }
 0xefb   :  { %3051 = vmatpush.bf16.msrb.mxu0 %v4396_v20 }
 0xefd   :  { %2959 = vmatpush.bf16.msra.mxu3 %v4384_v61 }
 0xeff   :  { %3052 = vmatpush.bf16.msrb.mxu0 %v4395_v16 }
 0xf03   :  { %3053 = vmatpush.bf16.msrb.mxu0 %v4394_v1  ;;  %v4438_v1 = vld [vmem:[%s5305_s20] ss:$0 sm:$0xff] }
 0xf07   :  { %3054 = vmatpush.bf16.msrb.mxu0 %v4393_v2 }
 0xf0b   :  { %3055 = vmatpush.bf16.msrb.mxu0 %v4392_v4 }
 0xf40   :  { %v2681_v17 = vpop.permute.xlu1 %2680 }
 0xf4a   :  { %v2878_v28 = vpop.permute.xlu2 %2877 }
 0xf4b   :  { %v2777_v36 = vpop.permute.xlu1 %2776 }
 0xf52   :  { %v3065_v46 = vpop.permute.xlu2 %3064 }
 0xf57   :  { %v2873_v19 = vpop.permute.xlu1 %2872 }
 0xf5e   :  { %v2782_v26 = vpop.permute.xlu0 %2781 }
 0xf5f   :  { %v2974_v47 = vpop.permute.xlu1 %2973 }
 0xf66   :  { %v2969_v45 = vpop.permute.xlu0 %2968 }
 0xf68   :  { %v3070_v51 = vpop.permute.xlu1 %3069 }
 0xf6b   :  { %v2548_v0 = vpop.f32.mrf.mxu0 }
 0xf6c   :  { %v2562_v3 = vpop.f32.mrf.mxu1  ;;  %v2549_v63 = vadd.f32 %v4437_v56, %v2548_v0  ;;  %v3076_v0 = vld [vmem:[%s5323_s10] sm:$0x3] }
 0xf6e   :  { %v2563_v53 = vadd.f32 %v2562_v3, %v2549_v63 }
 0xf73   :  { %v2550_v5 = vpop.f32.mrf.mxu0 }
 0xf74   :  { %v2551_v7 = vadd.f32 %v4437_v56, %v2550_v5  ;;  %v2564_v8 = vpop.f32.mrf.mxu1 }
 0xf76   :  { %v2565_v42 = vadd.f32 %v2564_v8, %v2551_v7 }
 0xf78   :  { %v2576_v6 = vpop.f32.mrf.mxu2 }
 0xf79   :  { %v2590_v41 = vpop.f32.mrf.mxu3  ;;  %v2577_v52 = vadd.f32 %v2576_v6, %v2563_v53 }
 0xf7b   :  { %v2591_v27 = vadd.f32 %v2590_v41, %v2577_v52 }
 0xf7d   :  { %v2595_v12 = vadd.f32 %v2591_v27, %v5026_v59 }
 0xf80   :  { %v2578_v25 = vpop.f32.mrf.mxu2 }
 0xf81   :  { %v2579_v29 = vadd.f32 %v2578_v25, %v2565_v42  ;;  %v2592_v9 = vpop.f32.mrf.mxu3 }
 0xf83   :  { %v2593_v11 = vadd.f32 %v2592_v9, %v2579_v29 }
 0xf85   :  { %v2596_v32 = vadd.f32 %v2593_v11, %v5030_v62 }
 0xf87   :  { %v2597_v14 = vpack.c.bf16 %v2596_v32, %v2595_v12 }
 0xf89   :  { %2672 = vmatmul.bf16.vlgmr.msra.gmra.mxu0 %v2597_v14  ;;  %2768 = vmatmul.bf16.vlgmr.msra.gmra.mxu1 %v2597_v14 }
 0xf8a   :  { %2864 = vmatmul.bf16.vlgmr.msrb.gmra.mxu2 %v2597_v14  ;;  %2960 = vmatmul.bf16.vlgmr.msra.gmra.mxu3 %v2597_v14 }
 0xf99   :  { %3056 = vmatmul.bf16.vlgmr.msrb.gmra.mxu0 %v2597_v14 }
0x1006   :  { %v2673_v18 = vpop.f32.mrf.mxu0  ;;  %v2769_v57 = vpop.f32.mrf.mxu1 }
0x1007   :  { %v2688_v33 = vmul.f32 %v2681_v17, %v2673_v18  ;;  %v2784_v34 = vmul.f32 %v2777_v36, %v2769_v57 }
0x1009   :  { %v2786_v43 = vadd.f32 %v2784_v34, %v2688_v33 }
0x100d   :  { %v2865_v21 = vpop.f32.mrf.mxu2  ;;  %v2961_v24 = vpop.f32.mrf.mxu3 }
0x100e   :  { %v2675_v22 = vpop.f32.mrf.mxu0  ;;  %v2771_v59 = vpop.f32.mrf.mxu1  ;;  %v2880_v38 = vmul.f32 %v2873_v19, %v2865_v21  ;;  %v2976_v55 = vmul.f32 %v2969_v45, %v2961_v24 }
0x100f   :  { %v2689_v62 = vmul.f32 %v2686_v15, %v2675_v22  ;;  %v2785_v30 = vmul.f32 %v2782_v26, %v2771_v59 }
0x1010   :  { %v2882_v48 = vadd.f32 %v2880_v38, %v2786_v43 }
0x1011   :  { %v2787_v39 = vadd.f32 %v2785_v30, %v2689_v62 }
0x1012   :  { %v2978_v20 = vadd.f32 %v2976_v55, %v2882_v48 }
0x1015   :  { %v2867_v31 = vpop.f32.mrf.mxu2  ;;  %v2963_v40 = vpop.f32.mrf.mxu3 }
0x1016   :  { %v3057_v50 = vpop.f32.mrf.mxu0  ;;  %v2881_v35 = vmul.f32 %v2878_v28, %v2867_v31  ;;  %v2977_v49 = vmul.f32 %v2974_v47, %v2963_v40 }
0x1017   :  { %v3072_v60 = vmul.f32 %v3065_v46, %v3057_v50 }
0x1018   :  { %v2883_v44 = vadd.f32 %v2881_v35, %v2787_v39 }
0x1019   :  { %v3074_v37 = vadd.f32 %v3072_v60, %v2978_v20 }
0x101a   :  { %v2979_v13 = vadd.f32 %v2977_v49, %v2883_v44 }
0x101e   :  { %v3059_v54 = vpop.f32.mrf.mxu0 }
0x101f   :  { %v3073_v61 = vmul.f32 %v3070_v51, %v3059_v54 }
0x1021   :  { %v3075_v16 = vadd.f32 %v3073_v61, %v2979_v13 }
0x1023   :  { %3098 = vmatpush.msrb.mxu1 %v3075_v16 }
0x1025   :  { %3099 = vmatpush.msrb.mxu1 %v3074_v37 }
0x1026   :  { %4165 = vmatmul.msk.f32.vlgmr.msrb.gmra.mxu1 %vm462_vm9, %v3076_v0 }
0x10a3   :  { %v3101_v2 = vpop.f32.mrf.mxu1 }
0x10a4   :  { %v3102_v56 = vadd.f32 %v4438_v1, %v3101_v2 }
0x10a6   :  { %3105 = vst.msk [vmem:[#allocation8] sm:$0x3] %vm3104_vm13, %v3102_v56 }
0x10a7   :  { %3116 = dma.vmem_to_hbm [thread:$0]  %s3112_s30, 32, %s3114_s1, [#allocation4]  }
0x10a8   :  { %4623 = dma.done.wait [#allocation4], 32  }
0x10a9   :  { %4624 = vsyncadd [#allocation4], 4294967264 }
0x10aa   :  { %3121 = vsyncpa [#allocation3], 1 }
0x10ab   :  { %3122 = vsyncpa [#allocation6], 1 }
0x10ac   :  { %3123 = vsyncpa [#allocation4], 1 }

</bundles_post_ra>
